<compile_context>
chip_gen: v7x
topology: tpu7x:2x2x1
jax: 0.10.0
libtpu: 0.0.40
codegen_flags: <defaults>
</compile_context>

<pallas_src>
import math

import jax
import jax.numpy as jnp
from jax.experimental import pallas as pl
from jax.experimental.pallas import tpu as pltpu

# ---- model hyper-parameters (PyTorch defaults of TransformerAutoencoder) -------------------
INPUT_DIM = 72
EMBED_DIM = 12
NUM_HEADS = 2
FF_DIM = 2048          # nn.TransformerEncoder/DecoderLayer default dim_feedforward
MAX_LEN = 48
LN_EPS = 1e-5
OUT_PAD = 128          # lane-dense output width (cols 72:128 are zero padding)

# ---- packed-parameter slab layouts (all offsets lane/sublane aligned) -----------------------

W12_ITEMS = (                                    # matrices with D rows, packed along columns
    ("e_qkv", 3 * EMBED_DIM), ("e_out", EMBED_DIM),
    ("d_sa_qkv", 3 * EMBED_DIM), ("d_sa_out", EMBED_DIM),
    ("d_ca_qkv", 3 * EMBED_DIM), ("d_ca_out", EMBED_DIM),
    ("fc", INPUT_DIM),
    ("e_ff1", FF_DIM), ("d_ff1", FF_DIM),
)
VEC_ITEMS = (                                    # biases / LN params, packed along columns
    ("e_qkv_b", 3 * EMBED_DIM), ("e_out_b", EMBED_DIM),
    ("e_ln1_g", EMBED_DIM), ("e_ln1_b", EMBED_DIM),
    ("e_ff1_b", FF_DIM), ("e_ff2_b", EMBED_DIM),
    ("e_ln2_g", EMBED_DIM), ("e_ln2_b", EMBED_DIM),
    ("d_sa_qkv_b", 3 * EMBED_DIM), ("d_sa_out_b", EMBED_DIM),
    ("d_ln1_g", EMBED_DIM), ("d_ln1_b", EMBED_DIM),
    ("d_ca_qkv_b", 3 * EMBED_DIM), ("d_ca_out_b", EMBED_DIM),
    ("d_ln2_g", EMBED_DIM), ("d_ln2_b", EMBED_DIM),
    ("d_ff1_b", FF_DIM), ("d_ff2_b", EMBED_DIM),
    ("d_ln3_g", EMBED_DIM), ("d_ln3_b", EMBED_DIM),
    ("fc_b", INPUT_DIM),
)


def _round_up(n, m=128):
    return ((n + m - 1) // m) * m


def _layout(items):
    off, cur = {}, 0
    for name, width in items:
        off[name] = cur
        cur += _round_up(width)          # keep every slice lane-aligned
    return off, cur


W12_OFF, W12_COLS = _layout(W12_ITEMS)
VEC_OFF, VEC_COLS = _layout(VEC_ITEMS)
W12_W = dict(W12_ITEMS)
VEC_W = dict(VEC_ITEMS)

# tall slab: lane-dense (rows, 128) bf16
#   rows [0:72)      fused conv taps  (Cin, 3*D) in cols [0:36)
#   rows [80:2128)   encoder FFN down-proj (F, D) in cols [0:12)
#   rows [2128:4176) decoder FFN down-proj (F, D) in cols [0:12)
WT_LANES = 128
WT_CONV_ROW = 0
WT_EFF2_ROW = 80                          # 72 rounded up to a 16-row bf16 tile boundary
WT_DFF2_ROW = WT_EFF2_ROW + FF_DIM        # 2128
WT_ROWS = WT_DFF2_ROW + FF_DIM            # 4176


# ---- positional encoding (matches PyTorch interleaved sin/cos) ------------------------------

def _positional_encoding(embed_dim, max_len):
    pos = jnp.arange(max_len, dtype=jnp.float32)[:, None]
    div = jnp.exp(jnp.arange(0, embed_dim, 2, dtype=jnp.float32)
                  * (-math.log(10000.0) / embed_dim))
    sin = jnp.sin(pos * div)
    cos = jnp.cos(pos * div)
    return jnp.stack([sin, cos], axis=-1).reshape(max_len, embed_dim)


# ---- Pallas kernel: one batch block per grid step, everything resident in VMEM --------------

def fwd_kernel(x_ref, pe_ref, w12_ref, wt_ref, vec_ref, out_ref):
    D, H, F, Cin = EMBED_DIM, NUM_HEADS, FF_DIM, INPUT_DIM
    dh = D // H
    BBLK, L = x_ref.shape[0], x_ref.shape[1]
    R = BBLK * L                                 # flattened rows for all matmuls
    scale = 1.0 / math.sqrt(dh)

    def w12(name, width=None):                   # (D, width) static, lane-aligned, bf16
        o = W12_OFF[name]
        w = W12_W[name] if width is None else width
        return w12_ref[:, o:o + w]

    def vec(name, width=None):                   # (1, width) static, lane-aligned, f32
        o = VEC_OFF[name]
        w = VEC_W[name] if width is None else width
        return vec_ref[:, o:o + w]

    def bf16(v):
        return v.astype(jnp.bfloat16)

    def matmul(a, w):                            # bf16 x bf16 MXU matmul, f32 accumulation
        return jnp.dot(bf16(a), w, preferred_element_type=jnp.float32)

    def layernorm(v, gname, bname):              # f32
        mu = jnp.mean(v, axis=-1, keepdims=True)
        vc = v - mu
        var = jnp.mean(vc * vc, axis=-1, keepdims=True)
        return vc * jax.lax.rsqrt(var + LN_EPS) * vec(gname) + vec(bname)

    def mha(q_in, kv_in, prefix, self_attn):
        # q_in / kv_in: (R, D) f32
        qkv_w = w12(prefix + "_qkv")             # (D, 3D) bf16
        qkv_b = vec(prefix + "_qkv_b")           # (1, 3D) f32
        if self_attn:                            # fused QKV: one MXU matmul
            qkv = matmul(q_in, qkv_w) + qkv_b
            q, k, v = qkv[:, :D], qkv[:, D:2 * D], qkv[:, 2 * D:]
        else:                                    # Q from tgt, fused KV from memory
            q = matmul(q_in, qkv_w[:, :D]) + qkv_b[:, :D]
            kv = matmul(kv_in, qkv_w[:, D:]) + qkv_b[:, D:]
            k, v = kv[:, :D], kv[:, D:]
        q3 = (q * scale).reshape(BBLK, L, D)     # per-sequence views for attention
        k3 = k.reshape(BBLK, L, D)
        v3 = v.reshape(BBLK, L, D)
        wo = w12(prefix + "_out")                # (D, D) bf16
        out = None
        for h in range(H):                       # unrolled head loop: no stack/concat
            sl = slice(h * dh, (h + 1) * dh)
            s = jnp.einsum('bqd,bkd->bqk', bf16(q3[..., sl]), bf16(k3[..., sl]),
                           preferred_element_type=jnp.float32)
            s = s - jnp.max(s, axis=-1, keepdims=True)
            p = jnp.exp(s)
            p = p * pl.reciprocal(jnp.sum(p, axis=-1, keepdims=True), approx=True)
            o_h = jnp.einsum('bqk,bkd->bqd', bf16(p), bf16(v3[..., sl]),
                             preferred_element_type=jnp.float32)     # (BBLK, L, dh)
            # concat(o_h) @ Wo  ==  sum_h o_h @ Wo[h*dh:(h+1)*dh, :]
            contrib = matmul(o_h.reshape(R, dh), wo[sl, :])
            out = contrib if out is None else out + contrib
        return out + vec(prefix + "_out_b")

    def ffn(v, w1name, b1name, w2_row, b2name):
        z = matmul(v, w12(w1name)) + vec(b1name)
        z = jnp.maximum(z, 0.0)                  # ReLU (PyTorch default)
        w2 = wt_ref[w2_row:w2_row + F, :D]       # (F, D) bf16, lane-dense slab
        return matmul(z, w2) + vec(b2name)

    # ---- TokenEmbedding: circular conv1d(k=3) = one fused tap matmul + per-seq shifts ----
    x_flat = x_ref[...].reshape(R, Cin)
    y = matmul(x_flat, wt_ref[WT_CONV_ROW:WT_CONV_ROW + Cin, :3 * D])     # (R, 3D)
    y3 = y.reshape(BBLK, L, 3 * D)
    y0, y1, y2 = y3[..., :D], y3[..., D:2 * D], y3[..., 2 * D:]
    # circular shift within each sequence: row t takes tap value from t-1 / t+1
    y0s = jnp.concatenate([y0[:, L - 1:, :], y0[:, :L - 1, :]], axis=1)
    y2s = jnp.concatenate([y2[:, 1:, :], y2[:, :1, :]], axis=1)

    # ---- PositionalEncoding ----
    h3 = y0s + y1 + y2s + pe_ref[...]            # (BBLK, L, D) + (L, D) broadcast
    h = h3.reshape(R, D)
    # TODO(synk): dropout (p=0.1) applied as eval-mode identity (no stochastic masking).

    # ---- TransformerEncoderLayer (post-norm) ----
    h = layernorm(h + mha(h, h, "e", True), "e_ln1_g", "e_ln1_b")
    h = layernorm(h + ffn(h, "e_ff1", "e_ff1_b", WT_EFF2_ROW, "e_ff2_b"),
                  "e_ln2_g", "e_ln2_b")
    enc = h

    # ---- TransformerDecoderLayer (post-norm), tgt = memory = enc ----
    t = layernorm(enc + mha(enc, enc, "d_sa", True), "d_ln1_g", "d_ln1_b")
    t = layernorm(t + mha(t, enc, "d_ca", False), "d_ln2_g", "d_ln2_b")
    t = layernorm(t + ffn(t, "d_ff1", "d_ff1_b", WT_DFF2_ROW, "d_ff2_b"),
                  "d_ln3_g", "d_ln3_b")

    # ---- fc_out: lane-dense 128-wide store (cols 72:128 are zeros from padded weight) ----
    out = matmul(t, w12("fc", OUT_PAD)) + vec("fc_b", OUT_PAD)            # (R, 128)
    out_ref[...] = out.reshape(BBLK, L, OUT_PAD)


@jax.jit
def transformer_ae_forward(x, pe, w12_slab, wt_slab, vec_slab):
    """x: (B, L, INPUT_DIM) float32; slabs produced by pack_params()."""
    B, L, Cin = x.shape
    D = EMBED_DIM
    # Flatten batch into the matmul M dimension: aim for ~128 rows per grid step.
    bblk = min(B, max(1, 128 // L))
    nblk = pl.cdiv(B, bblk)
    b_pad = nblk * bblk
    if b_pad != B:
        x = jnp.pad(x, ((0, b_pad - B), (0, 0), (0, 0)))

    out = pl.pallas_call(
        fwd_kernel,
        out_shape=jax.ShapeDtypeStruct((b_pad, L, OUT_PAD), jnp.float32),
        grid_spec=pltpu.PrefetchScalarGridSpec(
            num_scalar_prefetch=0,
            grid=(nblk,),
            in_specs=[
                pl.BlockSpec((bblk, L, Cin), lambda b: (b, 0, 0)),    # x: batch block
                pl.BlockSpec((L, D), lambda b: (0, 0)),               # positional encoding
                pl.BlockSpec(w12_slab.shape, lambda b: (0, 0)),       # row-D weight slab (bf16)
                pl.BlockSpec(wt_slab.shape, lambda b: (0, 0)),        # lane-dense tall slab (bf16)
                pl.BlockSpec(vec_slab.shape, lambda b: (0, 0)),       # bias / LN slab (f32)
            ],
            out_specs=pl.BlockSpec((bblk, L, OUT_PAD), lambda b: (b, 0, 0)),
        ),
        compiler_params=pltpu.CompilerParams(
            dimension_semantics=("parallel",)),      # v7x: two TCs split the batch blocks
    )(x, pe, w12_slab, wt_slab, vec_slab)
    return out[:B, :, :Cin]                          # drop batch pad + lane padding


# ---- synthetic parameters + host-side packing ------------------------------------------------

def init_params(key):
    D, F, Cin = EMBED_DIM, FF_DIM, INPUT_DIM
    spec = {
        "conv_w": (3 * Cin, D),
        "e_qkv_w": (D, 3 * D), "e_qkv_b": (1, 3 * D),
        "e_out_w": (D, D), "e_out_b": (1, D),
        "e_ff1_w": (D, F), "e_ff1_b": (1, F),
        "e_ff2_w": (F, D), "e_ff2_b": (1, D),
        "d_sa_qkv_w": (D, 3 * D), "d_sa_qkv_b": (1, 3 * D),
        "d_sa_out_w": (D, D), "d_sa_out_b": (1, D),
        "d_ca_qkv_w": (D, 3 * D), "d_ca_qkv_b": (1, 3 * D),
        "d_ca_out_w": (D, D), "d_ca_out_b": (1, D),
        "d_ff1_w": (D, F), "d_ff1_b": (1, F),
        "d_ff2_w": (F, D), "d_ff2_b": (1, D),
        "fc_w": (D, Cin), "fc_b": (1, Cin),
    }
    params = {}
    keys = jax.random.split(key, len(spec))
    for k, (name, shape) in zip(keys, sorted(spec.items())):
        if name.endswith("_w"):
            params[name] = (jax.random.normal(k, shape, jnp.float32)
                            / jnp.sqrt(jnp.float32(shape[0])))
        else:
            params[name] = jax.random.normal(k, shape, jnp.float32) * 0.01
    for name in ("e_ln1", "e_ln2", "d_ln1", "d_ln2", "d_ln3"):
        params[name + "_g"] = jnp.ones((1, D), jnp.float32)
        params[name + "_b"] = jnp.zeros((1, D), jnp.float32)
    return params


def pack_params(p):
    D, F, Cin = EMBED_DIM, FF_DIM, INPUT_DIM
    # (D, cols) slab: all row-D weights, 128-aligned column slots, bf16.
    w12 = jnp.zeros((D, W12_COLS), jnp.float32)
    for name, width in W12_ITEMS:
        o = W12_OFF[name]
        w12 = w12.at[:, o:o + width].set(p[name + "_w"])
    # (1, cols) slab: biases / LN params, f32.
    vec = jnp.zeros((1, VEC_COLS), jnp.float32)
    for name, width in VEC_ITEMS:
        o = VEC_OFF[name]
        vec = vec.at[:, o:o + width].set(p[name])
    # lane-dense tall slab (rows, 128): fused conv taps + FFN down-projections, bf16.
    wt = jnp.zeros((WT_ROWS, WT_LANES), jnp.float32)
    conv_fused = jnp.concatenate(
        [p["conv_w"][0:Cin], p["conv_w"][Cin:2 * Cin], p["conv_w"][2 * Cin:]], axis=1)
    wt = wt.at[WT_CONV_ROW:WT_CONV_ROW + Cin, :3 * D].set(conv_fused)
    wt = wt.at[WT_EFF2_ROW:WT_EFF2_ROW + F, :D].set(p["e_ff2_w"])
    wt = wt.at[WT_DFF2_ROW:WT_DFF2_ROW + F, :D].set(p["d_ff2_w"])
    return w12.astype(jnp.bfloat16), wt.astype(jnp.bfloat16), vec


# ---- pure-JAX reference (f32, unfused) -------------------------------------------------------

def reference_forward(x, p):
    B, L, Cin = x.shape
    D, H = EMBED_DIM, NUM_HEADS
    dh = D // H

    def ln(v, g, b):
        mu = jnp.mean(v, -1, keepdims=True)
        vc = v - mu
        var = jnp.mean(vc * vc, -1, keepdims=True)
        return vc * jax.lax.rsqrt(var + LN_EPS) * g + b

    def mha(q_in, kv_in, wqkv, bqkv, wo, bo):
        q = q_in @ wqkv[:, :D] + bqkv[:, :D]
        k = kv_in @ wqkv[:, D:2 * D] + bqkv[:, D:2 * D]
        v = kv_in @ wqkv[:, 2 * D:] + bqkv[:, 2 * D:]
        outs = []
        for h in range(H):
            sl = slice(h * dh, (h + 1) * dh)
            s = jnp.einsum('bqd,bkd->bqk', q[..., sl], k[..., sl]) / math.sqrt(dh)
            a = jax.nn.softmax(s, axis=-1)
            outs.append(jnp.einsum('bqk,bkd->bqd', a, v[..., sl]))
        return jnp.concatenate(outs, axis=-1) @ wo + bo

    def ffn(v, w1, b1, w2, b2):
        return jnp.maximum(v @ w1 + b1, 0.0) @ w2 + b2

    xm1 = jnp.roll(x, 1, axis=1)
    xp1 = jnp.roll(x, -1, axis=1)
    h = (xm1 @ p["conv_w"][:Cin] + x @ p["conv_w"][Cin:2 * Cin]
         + xp1 @ p["conv_w"][2 * Cin:])
    h = h + _positional_encoding(D, MAX_LEN)[:L][None]
    h = ln(h + mha(h, h, p["e_qkv_w"], p["e_qkv_b"], p["e_out_w"], p["e_out_b"]),
           p["e_ln1_g"], p["e_ln1_b"])
    h = ln(h + ffn(h, p["e_ff1_w"], p["e_ff1_b"], p["e_ff2_w"], p["e_ff2_b"]),
           p["e_ln2_g"], p["e_ln2_b"])
    enc = h
    t = ln(enc + mha(enc, enc, p["d_sa_qkv_w"], p["d_sa_qkv_b"],
                     p["d_sa_out_w"], p["d_sa_out_b"]), p["d_ln1_g"], p["d_ln1_b"])
    t = ln(t + mha(t, enc, p["d_ca_qkv_w"], p["d_ca_qkv_b"],
                   p["d_ca_out_w"], p["d_ca_out_b"]), p["d_ln2_g"], p["d_ln2_b"])
    t = ln(t + ffn(t, p["d_ff1_w"], p["d_ff1_b"], p["d_ff2_w"], p["d_ff2_b"]),
           p["d_ln3_g"], p["d_ln3_b"])
    return t @ p["fc_w"] + p["fc_b"]


if __name__ == "__main__":
    key = jax.random.PRNGKey(0)
    k_x, k_p = jax.random.split(key)

    B, L = 2, 8
    x = jax.random.normal(k_x, (B, L, INPUT_DIM), jnp.float32)
    raw_params = init_params(k_p)
    w12_slab, wt_slab, vec_slab = pack_params(raw_params)
    pe = _positional_encoding(EMBED_DIM, MAX_LEN)[:L]

    out = transformer_ae_forward(x, pe, w12_slab, wt_slab, vec_slab)
    out = jax.block_until_ready(out)
    assert out.shape == (B, L, INPUT_DIM), out.shape

    ref = jax.block_until_ready(reference_forward(x, raw_params))
    assert jnp.all(jnp.isfinite(out))
    # bf16 weights in the kernel vs an f32 reference -> slightly wider tolerance than pure f32.
    assert jnp.allclose(out, ref, atol=3e-2, rtol=3e-2), (
        float(jnp.max(jnp.abs(out - ref))))

    print("KERNEL_OK")
</pallas_src>

<mosaic_0001>
module attributes {stable_mosaic.version = 11 : i64} {
  func.func @fwd_kernel(%arg0: i32, %arg1: memref<2x8x72xf32, #tpu.memory_space<vmem>>, %arg2: memref<8x12xf32, #tpu.memory_space<vmem>>, %arg3: memref<12x4992xbf16, #tpu.memory_space<vmem>>, %arg4: memref<4176x128xbf16, #tpu.memory_space<vmem>>, %arg5: memref<1x6528xf32, #tpu.memory_space<vmem>>, %arg6: memref<2x8x128xf32, #tpu.memory_space<vmem>>) attributes {dimension_semantics = [#tpu.dimension_semantics<parallel>], iteration_bounds = array<i64: 1>, scalar_prefetch = 0 : i64, scratch_operands = 0 : i64, tpu.core_type = #tpu.core_type<tc>, window_params = [{transform_indices = @transform_0, window_bounds = array<i64: 2, 8, 72>}, {pipeline_mode = #tpu.pipeline_mode<synchronous>, transform_indices = @transform_1, window_bounds = array<i64: 8, 12>}, {pipeline_mode = #tpu.pipeline_mode<synchronous>, transform_indices = @transform_2, window_bounds = array<i64: 12, 4992>}, {pipeline_mode = #tpu.pipeline_mode<synchronous>, transform_indices = @transform_3, window_bounds = array<i64: 4176, 128>}, {pipeline_mode = #tpu.pipeline_mode<synchronous>, transform_indices = @transform_4, window_bounds = array<i64: 1, 6528>}, {transform_indices = @transform_5, window_bounds = array<i64: 2, 8, 128>}]} {
    %c0 = arith.constant 0 : index
    %c0_0 = arith.constant 0 : index
    %c0_1 = arith.constant 0 : index
    %0 = vector.load %arg1[%c0, %c0_0, %c0_1] : memref<2x8x72xf32, #tpu.memory_space<vmem>>, vector<2x8x72xf32>
    %1 = vector.shape_cast %0 : vector<2x8x72xf32> to vector<16x72xf32>
    %c0_2 = arith.constant 0 : index
    %c0_3 = arith.constant 0 : index
    %2 = vector.load %arg4[%c0_2, %c0_3] : memref<4176x128xbf16, #tpu.memory_space<vmem>>, vector<72x36xbf16>
    %3 = arith.truncf %1 : vector<16x72xf32> to vector<16x72xbf16>
    %cst = arith.constant dense<0.000000e+00> : vector<16x36xf32>
    %4 = tpu.matmul %3, %2, %cst {dimension_numbers = #tpu.dot_dimension_numbers<[1], [0], [0], [1], [0, 0, 1, 1], [], []>} : vector<16x72xbf16>, vector<72x36xbf16>, vector<16x36xf32> -> vector<16x36xf32>
    %5 = vector.shape_cast %4 : vector<16x36xf32> to vector<2x8x36xf32>
    %6 = vector.extract_strided_slice %5 {offsets = [0, 0, 0], sizes = [2, 8, 12], strides = [1, 1, 1]} : vector<2x8x36xf32> to vector<2x8x12xf32>
    %7 = vector.extract_strided_slice %5 {offsets = [0, 0, 12], sizes = [2, 8, 12], strides = [1, 1, 1]} : vector<2x8x36xf32> to vector<2x8x12xf32>
    %8 = vector.extract_strided_slice %5 {offsets = [0, 0, 24], sizes = [2, 8, 12], strides = [1, 1, 1]} : vector<2x8x36xf32> to vector<2x8x12xf32>
    %9 = vector.extract_strided_slice %6 {offsets = [0, 7, 0], sizes = [2, 1, 12], strides = [1, 1, 1]} : vector<2x8x12xf32> to vector<2x1x12xf32>
    %10 = vector.extract_strided_slice %6 {offsets = [0, 0, 0], sizes = [2, 7, 12], strides = [1, 1, 1]} : vector<2x8x12xf32> to vector<2x7x12xf32>
    %11 = tpu.concatenate %9, %10 in 1 : vector<2x1x12xf32>, vector<2x7x12xf32> -> vector<2x8x12xf32>
    %12 = vector.extract_strided_slice %8 {offsets = [0, 1, 0], sizes = [2, 7, 12], strides = [1, 1, 1]} : vector<2x8x12xf32> to vector<2x7x12xf32>
    %13 = vector.extract_strided_slice %8 {offsets = [0, 0, 0], sizes = [2, 1, 12], strides = [1, 1, 1]} : vector<2x8x12xf32> to vector<2x1x12xf32>
    %14 = tpu.concatenate %12, %13 in 1 : vector<2x7x12xf32>, vector<2x1x12xf32> -> vector<2x8x12xf32>
    %15 = arith.addf %11, %7 : vector<2x8x12xf32>
    %16 = arith.addf %15, %14 : vector<2x8x12xf32>
    %c0_4 = arith.constant 0 : index
    %c0_5 = arith.constant 0 : index
    %17 = vector.load %arg2[%c0_4, %c0_5] : memref<8x12xf32, #tpu.memory_space<vmem>>, vector<8x12xf32>
    %18 = vector.shape_cast %17 : vector<8x12xf32> to vector<1x8x12xf32>
    %19 = vector.broadcast %18 : vector<1x8x12xf32> to vector<2x8x12xf32>
    %20 = arith.addf %16, %19 : vector<2x8x12xf32>
    %21 = vector.shape_cast %20 : vector<2x8x12xf32> to vector<16x12xf32>
    %c0_6 = arith.constant 0 : index
    %c0_7 = arith.constant 0 : index
    %22 = vector.load %arg3[%c0_6, %c0_7] : memref<12x4992xbf16, #tpu.memory_space<vmem>>, vector<12x36xbf16>
    %c0_8 = arith.constant 0 : index
    %c0_9 = arith.constant 0 : index
    %23 = vector.load %arg5[%c0_8, %c0_9] : memref<1x6528xf32, #tpu.memory_space<vmem>>, vector<1x36xf32>
    %24 = arith.truncf %21 : vector<16x12xf32> to vector<16x12xbf16>
    %cst_10 = arith.constant dense<0.000000e+00> : vector<16x36xf32>
    %25 = tpu.matmul %24, %22, %cst_10 {dimension_numbers = #tpu.dot_dimension_numbers<[1], [0], [0], [1], [0, 0, 1, 1], [], []>} : vector<16x12xbf16>, vector<12x36xbf16>, vector<16x36xf32> -> vector<16x36xf32>
    %26 = vector.broadcast %23 : vector<1x36xf32> to vector<16x36xf32>
    %27 = arith.addf %25, %26 : vector<16x36xf32>
    %28 = vector.extract_strided_slice %27 {offsets = [0, 0], sizes = [16, 12], strides = [1, 1]} : vector<16x36xf32> to vector<16x12xf32>
    %29 = vector.extract_strided_slice %27 {offsets = [0, 12], sizes = [16, 12], strides = [1, 1]} : vector<16x36xf32> to vector<16x12xf32>
    %30 = vector.extract_strided_slice %27 {offsets = [0, 24], sizes = [16, 12], strides = [1, 1]} : vector<16x36xf32> to vector<16x12xf32>
    %cst_11 = arith.constant 0.408248305 : f32
    %31 = vector.broadcast %cst_11 : f32 to vector<16x12xf32>
    %32 = arith.mulf %28, %31 : vector<16x12xf32>
    %33 = vector.shape_cast %32 : vector<16x12xf32> to vector<2x8x12xf32>
    %34 = vector.shape_cast %29 : vector<16x12xf32> to vector<2x8x12xf32>
    %35 = vector.shape_cast %30 : vector<16x12xf32> to vector<2x8x12xf32>
    %c0_12 = arith.constant 0 : index
    %c128 = arith.constant 128 : index
    %36 = vector.load %arg3[%c0_12, %c128] : memref<12x4992xbf16, #tpu.memory_space<vmem>>, vector<12x12xbf16>
    %37 = vector.extract_strided_slice %33 {offsets = [0, 0, 0], sizes = [2, 8, 6], strides = [1, 1, 1]} : vector<2x8x12xf32> to vector<2x8x6xf32>
    %38 = arith.truncf %37 : vector<2x8x6xf32> to vector<2x8x6xbf16>
    %39 = vector.extract_strided_slice %34 {offsets = [0, 0, 0], sizes = [2, 8, 6], strides = [1, 1, 1]} : vector<2x8x12xf32> to vector<2x8x6xf32>
    %40 = arith.truncf %39 : vector<2x8x6xf32> to vector<2x8x6xbf16>
    "tpu.trace_start"() <{level = 10 : i32, message = "bqd,bkd->bqk"}> : () -> ()
    %cst_13 = arith.constant dense<0.000000e+00> : vector<2x8x8xf32>
    %41 = tpu.matmul %38, %40, %cst_13 {dimension_numbers = #tpu.dot_dimension_numbers<[2], [2], [1], [1], [0, 0, 0, 1, 1, 1], [0], [0]>} : vector<2x8x6xbf16>, vector<2x8x6xbf16>, vector<2x8x8xf32> -> vector<2x8x8xf32>
    "tpu.trace_stop"() : () -> ()
    %cst_14 = arith.constant dense<0xFF800000> : vector<2x8xf32>
    %42 = vector.multi_reduction <maximumf>, %41, %cst_14 [2] : vector<2x8x8xf32> to vector<2x8xf32>
    %43 = vector.shape_cast %42 : vector<2x8xf32> to vector<2x8x1xf32>
    %44 = vector.broadcast %43 : vector<2x8x1xf32> to vector<2x8x8xf32>
    %45 = arith.subf %41, %44 : vector<2x8x8xf32>
    %46 = math.exp %45 : vector<2x8x8xf32>
    %cst_15 = arith.constant dense<0.000000e+00> : vector<2x8xf32>
    %47 = vector.multi_reduction <add>, %46, %cst_15 [2] : vector<2x8x8xf32> to vector<2x8xf32>
    %48 = vector.shape_cast %47 : vector<2x8xf32> to vector<2x8x1xf32>
    %49 = tpu.reciprocal %48 {approx = true} : vector<2x8x1xf32> -> vector<2x8x1xf32>
    %50 = vector.broadcast %49 : vector<2x8x1xf32> to vector<2x8x8xf32>
    %51 = arith.mulf %46, %50 : vector<2x8x8xf32>
    %52 = arith.truncf %51 : vector<2x8x8xf32> to vector<2x8x8xbf16>
    %53 = vector.extract_strided_slice %35 {offsets = [0, 0, 0], sizes = [2, 8, 6], strides = [1, 1, 1]} : vector<2x8x12xf32> to vector<2x8x6xf32>
    %54 = arith.truncf %53 : vector<2x8x6xf32> to vector<2x8x6xbf16>
    "tpu.trace_start"() <{level = 10 : i32, message = "bqk,bkd->bqd"}> : () -> ()
    %cst_16 = arith.constant dense<0.000000e+00> : vector<2x8x6xf32>
    %55 = tpu.matmul %52, %54, %cst_16 {dimension_numbers = #tpu.dot_dimension_numbers<[2], [1], [1], [2], [0, 0, 0, 1, 1, 2], [0], [0]>} : vector<2x8x8xbf16>, vector<2x8x6xbf16>, vector<2x8x6xf32> -> vector<2x8x6xf32>
    "tpu.trace_stop"() : () -> ()
    %56 = vector.shape_cast %55 : vector<2x8x6xf32> to vector<16x6xf32>
    %57 = vector.extract_strided_slice %36 {offsets = [0, 0], sizes = [6, 12], strides = [1, 1]} : vector<12x12xbf16> to vector<6x12xbf16>
    %58 = arith.truncf %56 : vector<16x6xf32> to vector<16x6xbf16>
    %cst_17 = arith.constant dense<0.000000e+00> : vector<16x12xf32>
    %59 = tpu.matmul %58, %57, %cst_17 {dimension_numbers = #tpu.dot_dimension_numbers<[1], [0], [0], [1], [0, 0, 1, 1], [], []>} : vector<16x6xbf16>, vector<6x12xbf16>, vector<16x12xf32> -> vector<16x12xf32>
    %60 = vector.extract_strided_slice %33 {offsets = [0, 0, 6], sizes = [2, 8, 6], strides = [1, 1, 1]} : vector<2x8x12xf32> to vector<2x8x6xf32>
    %61 = arith.truncf %60 : vector<2x8x6xf32> to vector<2x8x6xbf16>
    %62 = vector.extract_strided_slice %34 {offsets = [0, 0, 6], sizes = [2, 8, 6], strides = [1, 1, 1]} : vector<2x8x12xf32> to vector<2x8x6xf32>
    %63 = arith.truncf %62 : vector<2x8x6xf32> to vector<2x8x6xbf16>
    "tpu.trace_start"() <{level = 10 : i32, message = "bqd,bkd->bqk"}> : () -> ()
    %cst_18 = arith.constant dense<0.000000e+00> : vector<2x8x8xf32>
    %64 = tpu.matmul %61, %63, %cst_18 {dimension_numbers = #tpu.dot_dimension_numbers<[2], [2], [1], [1], [0, 0, 0, 1, 1, 1], [0], [0]>} : vector<2x8x6xbf16>, vector<2x8x6xbf16>, vector<2x8x8xf32> -> vector<2x8x8xf32>
    "tpu.trace_stop"() : () -> ()
    %cst_19 = arith.constant dense<0xFF800000> : vector<2x8xf32>
    %65 = vector.multi_reduction <maximumf>, %64, %cst_19 [2] : vector<2x8x8xf32> to vector<2x8xf32>
    %66 = vector.shape_cast %65 : vector<2x8xf32> to vector<2x8x1xf32>
    %67 = vector.broadcast %66 : vector<2x8x1xf32> to vector<2x8x8xf32>
    %68 = arith.subf %64, %67 : vector<2x8x8xf32>
    %69 = math.exp %68 : vector<2x8x8xf32>
    %cst_20 = arith.constant dense<0.000000e+00> : vector<2x8xf32>
    %70 = vector.multi_reduction <add>, %69, %cst_20 [2] : vector<2x8x8xf32> to vector<2x8xf32>
    %71 = vector.shape_cast %70 : vector<2x8xf32> to vector<2x8x1xf32>
    %72 = tpu.reciprocal %71 {approx = true} : vector<2x8x1xf32> -> vector<2x8x1xf32>
    %73 = vector.broadcast %72 : vector<2x8x1xf32> to vector<2x8x8xf32>
    %74 = arith.mulf %69, %73 : vector<2x8x8xf32>
    %75 = arith.truncf %74 : vector<2x8x8xf32> to vector<2x8x8xbf16>
    %76 = vector.extract_strided_slice %35 {offsets = [0, 0, 6], sizes = [2, 8, 6], strides = [1, 1, 1]} : vector<2x8x12xf32> to vector<2x8x6xf32>
    %77 = arith.truncf %76 : vector<2x8x6xf32> to vector<2x8x6xbf16>
    "tpu.trace_start"() <{level = 10 : i32, message = "bqk,bkd->bqd"}> : () -> ()
    %cst_21 = arith.constant dense<0.000000e+00> : vector<2x8x6xf32>
    %78 = tpu.matmul %75, %77, %cst_21 {dimension_numbers = #tpu.dot_dimension_numbers<[2], [1], [1], [2], [0, 0, 0, 1, 1, 2], [0], [0]>} : vector<2x8x8xbf16>, vector<2x8x6xbf16>, vector<2x8x6xf32> -> vector<2x8x6xf32>
    "tpu.trace_stop"() : () -> ()
    %79 = vector.shape_cast %78 : vector<2x8x6xf32> to vector<16x6xf32>
    %80 = vector.extract_strided_slice %36 {offsets = [6, 0], sizes = [6, 12], strides = [1, 1]} : vector<12x12xbf16> to vector<6x12xbf16>
    %81 = arith.truncf %79 : vector<16x6xf32> to vector<16x6xbf16>
    %cst_22 = arith.constant dense<0.000000e+00> : vector<16x12xf32>
    %82 = tpu.matmul %81, %80, %cst_22 {dimension_numbers = #tpu.dot_dimension_numbers<[1], [0], [0], [1], [0, 0, 1, 1], [], []>} : vector<16x6xbf16>, vector<6x12xbf16>, vector<16x12xf32> -> vector<16x12xf32>
    %83 = arith.addf %59, %82 : vector<16x12xf32>
    %c0_23 = arith.constant 0 : index
    %c128_24 = arith.constant 128 : index
    %84 = vector.load %arg5[%c0_23, %c128_24] : memref<1x6528xf32, #tpu.memory_space<vmem>>, vector<1x12xf32>
    %85 = vector.broadcast %84 : vector<1x12xf32> to vector<16x12xf32>
    %86 = arith.addf %83, %85 : vector<16x12xf32>
    %87 = arith.addf %21, %86 : vector<16x12xf32>
    %cst_25 = arith.constant dense<0.000000e+00> : vector<16xf32>
    %88 = vector.multi_reduction <add>, %87, %cst_25 [1] : vector<16x12xf32> to vector<16xf32>
    %89 = vector.shape_cast %88 : vector<16xf32> to vector<16x1xf32>
    %cst_26 = arith.constant 1.200000e+01 : f32
    %90 = vector.broadcast %cst_26 : f32 to vector<16x1xf32>
    %91 = arith.divf %89, %90 : vector<16x1xf32>
    %92 = vector.broadcast %91 : vector<16x1xf32> to vector<16x12xf32>
    %93 = arith.subf %87, %92 : vector<16x12xf32>
    %94 = arith.mulf %93, %93 : vector<16x12xf32>
    %cst_27 = arith.constant dense<0.000000e+00> : vector<16xf32>
    %95 = vector.multi_reduction <add>, %94, %cst_27 [1] : vector<16x12xf32> to vector<16xf32>
    %96 = vector.shape_cast %95 : vector<16xf32> to vector<16x1xf32>
    %cst_28 = arith.constant 1.200000e+01 : f32
    %97 = vector.broadcast %cst_28 : f32 to vector<16x1xf32>
    %98 = arith.divf %96, %97 : vector<16x1xf32>
    %cst_29 = arith.constant 9.99999974E-6 : f32
    %99 = vector.broadcast %cst_29 : f32 to vector<16x1xf32>
    %100 = arith.addf %98, %99 : vector<16x1xf32>
    %101 = math.rsqrt %100 : vector<16x1xf32>
    %102 = vector.broadcast %101 : vector<16x1xf32> to vector<16x12xf32>
    %103 = arith.mulf %93, %102 : vector<16x12xf32>
    %c0_30 = arith.constant 0 : index
    %c256 = arith.constant 256 : index
    %104 = vector.load %arg5[%c0_30, %c256] : memref<1x6528xf32, #tpu.memory_space<vmem>>, vector<1x12xf32>
    %105 = vector.broadcast %104 : vector<1x12xf32> to vector<16x12xf32>
    %106 = arith.mulf %103, %105 : vector<16x12xf32>
    %c0_31 = arith.constant 0 : index
    %c384 = arith.constant 384 : index
    %107 = vector.load %arg5[%c0_31, %c384] : memref<1x6528xf32, #tpu.memory_space<vmem>>, vector<1x12xf32>
    %108 = vector.broadcast %107 : vector<1x12xf32> to vector<16x12xf32>
    %109 = arith.addf %106, %108 : vector<16x12xf32>
    %c0_32 = arith.constant 0 : index
    %c896 = arith.constant 896 : index
    %110 = vector.load %arg3[%c0_32, %c896] : memref<12x4992xbf16, #tpu.memory_space<vmem>>, vector<12x2048xbf16>
    %111 = arith.truncf %109 : vector<16x12xf32> to vector<16x12xbf16>
    %cst_33 = arith.constant dense<0.000000e+00> : vector<16x2048xf32>
    %112 = tpu.matmul %111, %110, %cst_33 {dimension_numbers = #tpu.dot_dimension_numbers<[1], [0], [0], [1], [0, 0, 1, 1], [], []>} : vector<16x12xbf16>, vector<12x2048xbf16>, vector<16x2048xf32> -> vector<16x2048xf32>
    %c0_34 = arith.constant 0 : index
    %c512 = arith.constant 512 : index
    %113 = vector.load %arg5[%c0_34, %c512] : memref<1x6528xf32, #tpu.memory_space<vmem>>, vector<1x2048xf32>
    %114 = vector.broadcast %113 : vector<1x2048xf32> to vector<16x2048xf32>
    %115 = arith.addf %112, %114 : vector<16x2048xf32>
    %cst_35 = arith.constant 0.000000e+00 : f32
    %116 = vector.broadcast %cst_35 : f32 to vector<16x2048xf32>
    %117 = arith.maximumf %115, %116 : vector<16x2048xf32>
    %c80 = arith.constant 80 : index
    %c0_36 = arith.constant 0 : index
    %118 = vector.load %arg4[%c80, %c0_36] : memref<4176x128xbf16, #tpu.memory_space<vmem>>, vector<2048x12xbf16>
    %119 = arith.truncf %117 : vector<16x2048xf32> to vector<16x2048xbf16>
    %cst_37 = arith.constant dense<0.000000e+00> : vector<16x12xf32>
    %120 = tpu.matmul %119, %118, %cst_37 {dimension_numbers = #tpu.dot_dimension_numbers<[1], [0], [0], [1], [0, 0, 1, 1], [], []>} : vector<16x2048xbf16>, vector<2048x12xbf16>, vector<16x12xf32> -> vector<16x12xf32>
    %c0_38 = arith.constant 0 : index
    %c2560 = arith.constant 2560 : index
    %121 = vector.load %arg5[%c0_38, %c2560] : memref<1x6528xf32, #tpu.memory_space<vmem>>, vector<1x12xf32>
    %122 = vector.broadcast %121 : vector<1x12xf32> to vector<16x12xf32>
    %123 = arith.addf %120, %122 : vector<16x12xf32>
    %124 = arith.addf %109, %123 : vector<16x12xf32>
    %cst_39 = arith.constant dense<0.000000e+00> : vector<16xf32>
    %125 = vector.multi_reduction <add>, %124, %cst_39 [1] : vector<16x12xf32> to vector<16xf32>
    %126 = vector.shape_cast %125 : vector<16xf32> to vector<16x1xf32>
    %cst_40 = arith.constant 1.200000e+01 : f32
    %127 = vector.broadcast %cst_40 : f32 to vector<16x1xf32>
    %128 = arith.divf %126, %127 : vector<16x1xf32>
    %129 = vector.broadcast %128 : vector<16x1xf32> to vector<16x12xf32>
    %130 = arith.subf %124, %129 : vector<16x12xf32>
    %131 = arith.mulf %130, %130 : vector<16x12xf32>
    %cst_41 = arith.constant dense<0.000000e+00> : vector<16xf32>
    %132 = vector.multi_reduction <add>, %131, %cst_41 [1] : vector<16x12xf32> to vector<16xf32>
    %133 = vector.shape_cast %132 : vector<16xf32> to vector<16x1xf32>
    %cst_42 = arith.constant 1.200000e+01 : f32
    %134 = vector.broadcast %cst_42 : f32 to vector<16x1xf32>
    %135 = arith.divf %133, %134 : vector<16x1xf32>
    %cst_43 = arith.constant 9.99999974E-6 : f32
    %136 = vector.broadcast %cst_43 : f32 to vector<16x1xf32>
    %137 = arith.addf %135, %136 : vector<16x1xf32>
    %138 = math.rsqrt %137 : vector<16x1xf32>
    %139 = vector.broadcast %138 : vector<16x1xf32> to vector<16x12xf32>
    %140 = arith.mulf %130, %139 : vector<16x12xf32>
    %c0_44 = arith.constant 0 : index
    %c2688 = arith.constant 2688 : index
    %141 = vector.load %arg5[%c0_44, %c2688] : memref<1x6528xf32, #tpu.memory_space<vmem>>, vector<1x12xf32>
    %142 = vector.broadcast %141 : vector<1x12xf32> to vector<16x12xf32>
    %143 = arith.mulf %140, %142 : vector<16x12xf32>
    %c0_45 = arith.constant 0 : index
    %c2816 = arith.constant 2816 : index
    %144 = vector.load %arg5[%c0_45, %c2816] : memref<1x6528xf32, #tpu.memory_space<vmem>>, vector<1x12xf32>
    %145 = vector.broadcast %144 : vector<1x12xf32> to vector<16x12xf32>
    %146 = arith.addf %143, %145 : vector<16x12xf32>
    %c0_46 = arith.constant 0 : index
    %c256_47 = arith.constant 256 : index
    %147 = vector.load %arg3[%c0_46, %c256_47] : memref<12x4992xbf16, #tpu.memory_space<vmem>>, vector<12x36xbf16>
    %c0_48 = arith.constant 0 : index
    %c2944 = arith.constant 2944 : index
    %148 = vector.load %arg5[%c0_48, %c2944] : memref<1x6528xf32, #tpu.memory_space<vmem>>, vector<1x36xf32>
    %149 = arith.truncf %146 : vector<16x12xf32> to vector<16x12xbf16>
    %cst_49 = arith.constant dense<0.000000e+00> : vector<16x36xf32>
    %150 = tpu.matmul %149, %147, %cst_49 {dimension_numbers = #tpu.dot_dimension_numbers<[1], [0], [0], [1], [0, 0, 1, 1], [], []>} : vector<16x12xbf16>, vector<12x36xbf16>, vector<16x36xf32> -> vector<16x36xf32>
    %151 = vector.broadcast %148 : vector<1x36xf32> to vector<16x36xf32>
    %152 = arith.addf %150, %151 : vector<16x36xf32>
    %153 = vector.extract_strided_slice %152 {offsets = [0, 0], sizes = [16, 12], strides = [1, 1]} : vector<16x36xf32> to vector<16x12xf32>
    %154 = vector.extract_strided_slice %152 {offsets = [0, 12], sizes = [16, 12], strides = [1, 1]} : vector<16x36xf32> to vector<16x12xf32>
    %155 = vector.extract_strided_slice %152 {offsets = [0, 24], sizes = [16, 12], strides = [1, 1]} : vector<16x36xf32> to vector<16x12xf32>
    %cst_50 = arith.constant 0.408248305 : f32
    %156 = vector.broadcast %cst_50 : f32 to vector<16x12xf32>
    %157 = arith.mulf %153, %156 : vector<16x12xf32>
    %158 = vector.shape_cast %157 : vector<16x12xf32> to vector<2x8x12xf32>
    %159 = vector.shape_cast %154 : vector<16x12xf32> to vector<2x8x12xf32>
    %160 = vector.shape_cast %155 : vector<16x12xf32> to vector<2x8x12xf32>
    %c0_51 = arith.constant 0 : index
    %c384_52 = arith.constant 384 : index
    %161 = vector.load %arg3[%c0_51, %c384_52] : memref<12x4992xbf16, #tpu.memory_space<vmem>>, vector<12x12xbf16>
    %162 = vector.extract_strided_slice %158 {offsets = [0, 0, 0], sizes = [2, 8, 6], strides = [1, 1, 1]} : vector<2x8x12xf32> to vector<2x8x6xf32>
    %163 = arith.truncf %162 : vector<2x8x6xf32> to vector<2x8x6xbf16>
    %164 = vector.extract_strided_slice %159 {offsets = [0, 0, 0], sizes = [2, 8, 6], strides = [1, 1, 1]} : vector<2x8x12xf32> to vector<2x8x6xf32>
    %165 = arith.truncf %164 : vector<2x8x6xf32> to vector<2x8x6xbf16>
    "tpu.trace_start"() <{level = 10 : i32, message = "bqd,bkd->bqk"}> : () -> ()
    %cst_53 = arith.constant dense<0.000000e+00> : vector<2x8x8xf32>
    %166 = tpu.matmul %163, %165, %cst_53 {dimension_numbers = #tpu.dot_dimension_numbers<[2], [2], [1], [1], [0, 0, 0, 1, 1, 1], [0], [0]>} : vector<2x8x6xbf16>, vector<2x8x6xbf16>, vector<2x8x8xf32> -> vector<2x8x8xf32>
    "tpu.trace_stop"() : () -> ()
    %cst_54 = arith.constant dense<0xFF800000> : vector<2x8xf32>
    %167 = vector.multi_reduction <maximumf>, %166, %cst_54 [2] : vector<2x8x8xf32> to vector<2x8xf32>
    %168 = vector.shape_cast %167 : vector<2x8xf32> to vector<2x8x1xf32>
    %169 = vector.broadcast %168 : vector<2x8x1xf32> to vector<2x8x8xf32>
    %170 = arith.subf %166, %169 : vector<2x8x8xf32>
    %171 = math.exp %170 : vector<2x8x8xf32>
    %cst_55 = arith.constant dense<0.000000e+00> : vector<2x8xf32>
    %172 = vector.multi_reduction <add>, %171, %cst_55 [2] : vector<2x8x8xf32> to vector<2x8xf32>
    %173 = vector.shape_cast %172 : vector<2x8xf32> to vector<2x8x1xf32>
    %174 = tpu.reciprocal %173 {approx = true} : vector<2x8x1xf32> -> vector<2x8x1xf32>
    %175 = vector.broadcast %174 : vector<2x8x1xf32> to vector<2x8x8xf32>
    %176 = arith.mulf %171, %175 : vector<2x8x8xf32>
    %177 = arith.truncf %176 : vector<2x8x8xf32> to vector<2x8x8xbf16>
    %178 = vector.extract_strided_slice %160 {offsets = [0, 0, 0], sizes = [2, 8, 6], strides = [1, 1, 1]} : vector<2x8x12xf32> to vector<2x8x6xf32>
    %179 = arith.truncf %178 : vector<2x8x6xf32> to vector<2x8x6xbf16>
    "tpu.trace_start"() <{level = 10 : i32, message = "bqk,bkd->bqd"}> : () -> ()
    %cst_56 = arith.constant dense<0.000000e+00> : vector<2x8x6xf32>
    %180 = tpu.matmul %177, %179, %cst_56 {dimension_numbers = #tpu.dot_dimension_numbers<[2], [1], [1], [2], [0, 0, 0, 1, 1, 2], [0], [0]>} : vector<2x8x8xbf16>, vector<2x8x6xbf16>, vector<2x8x6xf32> -> vector<2x8x6xf32>
    "tpu.trace_stop"() : () -> ()
    %181 = vector.shape_cast %180 : vector<2x8x6xf32> to vector<16x6xf32>
    %182 = vector.extract_strided_slice %161 {offsets = [0, 0], sizes = [6, 12], strides = [1, 1]} : vector<12x12xbf16> to vector<6x12xbf16>
    %183 = arith.truncf %181 : vector<16x6xf32> to vector<16x6xbf16>
    %cst_57 = arith.constant dense<0.000000e+00> : vector<16x12xf32>
    %184 = tpu.matmul %183, %182, %cst_57 {dimension_numbers = #tpu.dot_dimension_numbers<[1], [0], [0], [1], [0, 0, 1, 1], [], []>} : vector<16x6xbf16>, vector<6x12xbf16>, vector<16x12xf32> -> vector<16x12xf32>
    %185 = vector.extract_strided_slice %158 {offsets = [0, 0, 6], sizes = [2, 8, 6], strides = [1, 1, 1]} : vector<2x8x12xf32> to vector<2x8x6xf32>
    %186 = arith.truncf %185 : vector<2x8x6xf32> to vector<2x8x6xbf16>
    %187 = vector.extract_strided_slice %159 {offsets = [0, 0, 6], sizes = [2, 8, 6], strides = [1, 1, 1]} : vector<2x8x12xf32> to vector<2x8x6xf32>
    %188 = arith.truncf %187 : vector<2x8x6xf32> to vector<2x8x6xbf16>
    "tpu.trace_start"() <{level = 10 : i32, message = "bqd,bkd->bqk"}> : () -> ()
    %cst_58 = arith.constant dense<0.000000e+00> : vector<2x8x8xf32>
    %189 = tpu.matmul %186, %188, %cst_58 {dimension_numbers = #tpu.dot_dimension_numbers<[2], [2], [1], [1], [0, 0, 0, 1, 1, 1], [0], [0]>} : vector<2x8x6xbf16>, vector<2x8x6xbf16>, vector<2x8x8xf32> -> vector<2x8x8xf32>
    "tpu.trace_stop"() : () -> ()
    %cst_59 = arith.constant dense<0xFF800000> : vector<2x8xf32>
    %190 = vector.multi_reduction <maximumf>, %189, %cst_59 [2] : vector<2x8x8xf32> to vector<2x8xf32>
    %191 = vector.shape_cast %190 : vector<2x8xf32> to vector<2x8x1xf32>
    %192 = vector.broadcast %191 : vector<2x8x1xf32> to vector<2x8x8xf32>
    %193 = arith.subf %189, %192 : vector<2x8x8xf32>
    %194 = math.exp %193 : vector<2x8x8xf32>
    %cst_60 = arith.constant dense<0.000000e+00> : vector<2x8xf32>
    %195 = vector.multi_reduction <add>, %194, %cst_60 [2] : vector<2x8x8xf32> to vector<2x8xf32>
    %196 = vector.shape_cast %195 : vector<2x8xf32> to vector<2x8x1xf32>
    %197 = tpu.reciprocal %196 {approx = true} : vector<2x8x1xf32> -> vector<2x8x1xf32>
    %198 = vector.broadcast %197 : vector<2x8x1xf32> to vector<2x8x8xf32>
    %199 = arith.mulf %194, %198 : vector<2x8x8xf32>
    %200 = arith.truncf %199 : vector<2x8x8xf32> to vector<2x8x8xbf16>
    %201 = vector.extract_strided_slice %160 {offsets = [0, 0, 6], sizes = [2, 8, 6], strides = [1, 1, 1]} : vector<2x8x12xf32> to vector<2x8x6xf32>
    %202 = arith.truncf %201 : vector<2x8x6xf32> to vector<2x8x6xbf16>
    "tpu.trace_start"() <{level = 10 : i32, message = "bqk,bkd->bqd"}> : () -> ()
    %cst_61 = arith.constant dense<0.000000e+00> : vector<2x8x6xf32>
    %203 = tpu.matmul %200, %202, %cst_61 {dimension_numbers = #tpu.dot_dimension_numbers<[2], [1], [1], [2], [0, 0, 0, 1, 1, 2], [0], [0]>} : vector<2x8x8xbf16>, vector<2x8x6xbf16>, vector<2x8x6xf32> -> vector<2x8x6xf32>
    "tpu.trace_stop"() : () -> ()
    %204 = vector.shape_cast %203 : vector<2x8x6xf32> to vector<16x6xf32>
    %205 = vector.extract_strided_slice %161 {offsets = [6, 0], sizes = [6, 12], strides = [1, 1]} : vector<12x12xbf16> to vector<6x12xbf16>
    %206 = arith.truncf %204 : vector<16x6xf32> to vector<16x6xbf16>
    %cst_62 = arith.constant dense<0.000000e+00> : vector<16x12xf32>
    %207 = tpu.matmul %206, %205, %cst_62 {dimension_numbers = #tpu.dot_dimension_numbers<[1], [0], [0], [1], [0, 0, 1, 1], [], []>} : vector<16x6xbf16>, vector<6x12xbf16>, vector<16x12xf32> -> vector<16x12xf32>
    %208 = arith.addf %184, %207 : vector<16x12xf32>
    %c0_63 = arith.constant 0 : index
    %c3072 = arith.constant 3072 : index
    %209 = vector.load %arg5[%c0_63, %c3072] : memref<1x6528xf32, #tpu.memory_space<vmem>>, vector<1x12xf32>
    %210 = vector.broadcast %209 : vector<1x12xf32> to vector<16x12xf32>
    %211 = arith.addf %208, %210 : vector<16x12xf32>
    %212 = arith.addf %146, %211 : vector<16x12xf32>
    %cst_64 = arith.constant dense<0.000000e+00> : vector<16xf32>
    %213 = vector.multi_reduction <add>, %212, %cst_64 [1] : vector<16x12xf32> to vector<16xf32>
    %214 = vector.shape_cast %213 : vector<16xf32> to vector<16x1xf32>
    %cst_65 = arith.constant 1.200000e+01 : f32
    %215 = vector.broadcast %cst_65 : f32 to vector<16x1xf32>
    %216 = arith.divf %214, %215 : vector<16x1xf32>
    %217 = vector.broadcast %216 : vector<16x1xf32> to vector<16x12xf32>
    %218 = arith.subf %212, %217 : vector<16x12xf32>
    %219 = arith.mulf %218, %218 : vector<16x12xf32>
    %cst_66 = arith.constant dense<0.000000e+00> : vector<16xf32>
    %220 = vector.multi_reduction <add>, %219, %cst_66 [1] : vector<16x12xf32> to vector<16xf32>
    %221 = vector.shape_cast %220 : vector<16xf32> to vector<16x1xf32>
    %cst_67 = arith.constant 1.200000e+01 : f32
    %222 = vector.broadcast %cst_67 : f32 to vector<16x1xf32>
    %223 = arith.divf %221, %222 : vector<16x1xf32>
    %cst_68 = arith.constant 9.99999974E-6 : f32
    %224 = vector.broadcast %cst_68 : f32 to vector<16x1xf32>
    %225 = arith.addf %223, %224 : vector<16x1xf32>
    %226 = math.rsqrt %225 : vector<16x1xf32>
    %227 = vector.broadcast %226 : vector<16x1xf32> to vector<16x12xf32>
    %228 = arith.mulf %218, %227 : vector<16x12xf32>
    %c0_69 = arith.constant 0 : index
    %c3200 = arith.constant 3200 : index
    %229 = vector.load %arg5[%c0_69, %c3200] : memref<1x6528xf32, #tpu.memory_space<vmem>>, vector<1x12xf32>
    %230 = vector.broadcast %229 : vector<1x12xf32> to vector<16x12xf32>
    %231 = arith.mulf %228, %230 : vector<16x12xf32>
    %c0_70 = arith.constant 0 : index
    %c3328 = arith.constant 3328 : index
    %232 = vector.load %arg5[%c0_70, %c3328] : memref<1x6528xf32, #tpu.memory_space<vmem>>, vector<1x12xf32>
    %233 = vector.broadcast %232 : vector<1x12xf32> to vector<16x12xf32>
    %234 = arith.addf %231, %233 : vector<16x12xf32>
    %c0_71 = arith.constant 0 : index
    %c512_72 = arith.constant 512 : index
    %235 = vector.load %arg3[%c0_71, %c512_72] : memref<12x4992xbf16, #tpu.memory_space<vmem>>, vector<12x36xbf16>
    %c0_73 = arith.constant 0 : index
    %c3456 = arith.constant 3456 : index
    %236 = vector.load %arg5[%c0_73, %c3456] : memref<1x6528xf32, #tpu.memory_space<vmem>>, vector<1x36xf32>
    %237 = vector.extract_strided_slice %235 {offsets = [0, 0], sizes = [12, 12], strides = [1, 1]} : vector<12x36xbf16> to vector<12x12xbf16>
    %238 = arith.truncf %234 : vector<16x12xf32> to vector<16x12xbf16>
    %cst_74 = arith.constant dense<0.000000e+00> : vector<16x12xf32>
    %239 = tpu.matmul %238, %237, %cst_74 {dimension_numbers = #tpu.dot_dimension_numbers<[1], [0], [0], [1], [0, 0, 1, 1], [], []>} : vector<16x12xbf16>, vector<12x12xbf16>, vector<16x12xf32> -> vector<16x12xf32>
    %240 = vector.extract_strided_slice %236 {offsets = [0, 0], sizes = [1, 12], strides = [1, 1]} : vector<1x36xf32> to vector<1x12xf32>
    %241 = vector.broadcast %240 : vector<1x12xf32> to vector<16x12xf32>
    %242 = arith.addf %239, %241 : vector<16x12xf32>
    %243 = vector.extract_strided_slice %235 {offsets = [0, 12], sizes = [12, 24], strides = [1, 1]} : vector<12x36xbf16> to vector<12x24xbf16>
    %244 = arith.truncf %146 : vector<16x12xf32> to vector<16x12xbf16>
    %cst_75 = arith.constant dense<0.000000e+00> : vector<16x24xf32>
    %245 = tpu.matmul %244, %243, %cst_75 {dimension_numbers = #tpu.dot_dimension_numbers<[1], [0], [0], [1], [0, 0, 1, 1], [], []>} : vector<16x12xbf16>, vector<12x24xbf16>, vector<16x24xf32> -> vector<16x24xf32>
    %246 = vector.extract_strided_slice %236 {offsets = [0, 12], sizes = [1, 24], strides = [1, 1]} : vector<1x36xf32> to vector<1x24xf32>
    %247 = vector.broadcast %246 : vector<1x24xf32> to vector<16x24xf32>
    %248 = arith.addf %245, %247 : vector<16x24xf32>
    %249 = vector.extract_strided_slice %248 {offsets = [0, 0], sizes = [16, 12], strides = [1, 1]} : vector<16x24xf32> to vector<16x12xf32>
    %250 = vector.extract_strided_slice %248 {offsets = [0, 12], sizes = [16, 12], strides = [1, 1]} : vector<16x24xf32> to vector<16x12xf32>
    %cst_76 = arith.constant 0.408248305 : f32
    %251 = vector.broadcast %cst_76 : f32 to vector<16x12xf32>
    %252 = arith.mulf %242, %251 : vector<16x12xf32>
    %253 = vector.shape_cast %252 : vector<16x12xf32> to vector<2x8x12xf32>
    %254 = vector.shape_cast %249 : vector<16x12xf32> to vector<2x8x12xf32>
    %255 = vector.shape_cast %250 : vector<16x12xf32> to vector<2x8x12xf32>
    %c0_77 = arith.constant 0 : index
    %c640 = arith.constant 640 : index
    %256 = vector.load %arg3[%c0_77, %c640] : memref<12x4992xbf16, #tpu.memory_space<vmem>>, vector<12x12xbf16>
    %257 = vector.extract_strided_slice %253 {offsets = [0, 0, 0], sizes = [2, 8, 6], strides = [1, 1, 1]} : vector<2x8x12xf32> to vector<2x8x6xf32>
    %258 = arith.truncf %257 : vector<2x8x6xf32> to vector<2x8x6xbf16>
    %259 = vector.extract_strided_slice %254 {offsets = [0, 0, 0], sizes = [2, 8, 6], strides = [1, 1, 1]} : vector<2x8x12xf32> to vector<2x8x6xf32>
    %260 = arith.truncf %259 : vector<2x8x6xf32> to vector<2x8x6xbf16>
    "tpu.trace_start"() <{level = 10 : i32, message = "bqd,bkd->bqk"}> : () -> ()
    %cst_78 = arith.constant dense<0.000000e+00> : vector<2x8x8xf32>
    %261 = tpu.matmul %258, %260, %cst_78 {dimension_numbers = #tpu.dot_dimension_numbers<[2], [2], [1], [1], [0, 0, 0, 1, 1, 1], [0], [0]>} : vector<2x8x6xbf16>, vector<2x8x6xbf16>, vector<2x8x8xf32> -> vector<2x8x8xf32>
    "tpu.trace_stop"() : () -> ()
    %cst_79 = arith.constant dense<0xFF800000> : vector<2x8xf32>
    %262 = vector.multi_reduction <maximumf>, %261, %cst_79 [2] : vector<2x8x8xf32> to vector<2x8xf32>
    %263 = vector.shape_cast %262 : vector<2x8xf32> to vector<2x8x1xf32>
    %264 = vector.broadcast %263 : vector<2x8x1xf32> to vector<2x8x8xf32>
    %265 = arith.subf %261, %264 : vector<2x8x8xf32>
    %266 = math.exp %265 : vector<2x8x8xf32>
    %cst_80 = arith.constant dense<0.000000e+00> : vector<2x8xf32>
    %267 = vector.multi_reduction <add>, %266, %cst_80 [2] : vector<2x8x8xf32> to vector<2x8xf32>
    %268 = vector.shape_cast %267 : vector<2x8xf32> to vector<2x8x1xf32>
    %269 = tpu.reciprocal %268 {approx = true} : vector<2x8x1xf32> -> vector<2x8x1xf32>
    %270 = vector.broadcast %269 : vector<2x8x1xf32> to vector<2x8x8xf32>
    %271 = arith.mulf %266, %270 : vector<2x8x8xf32>
    %272 = arith.truncf %271 : vector<2x8x8xf32> to vector<2x8x8xbf16>
    %273 = vector.extract_strided_slice %255 {offsets = [0, 0, 0], sizes = [2, 8, 6], strides = [1, 1, 1]} : vector<2x8x12xf32> to vector<2x8x6xf32>
    %274 = arith.truncf %273 : vector<2x8x6xf32> to vector<2x8x6xbf16>
    "tpu.trace_start"() <{level = 10 : i32, message = "bqk,bkd->bqd"}> : () -> ()
    %cst_81 = arith.constant dense<0.000000e+00> : vector<2x8x6xf32>
    %275 = tpu.matmul %272, %274, %cst_81 {dimension_numbers = #tpu.dot_dimension_numbers<[2], [1], [1], [2], [0, 0, 0, 1, 1, 2], [0], [0]>} : vector<2x8x8xbf16>, vector<2x8x6xbf16>, vector<2x8x6xf32> -> vector<2x8x6xf32>
    "tpu.trace_stop"() : () -> ()
    %276 = vector.shape_cast %275 : vector<2x8x6xf32> to vector<16x6xf32>
    %277 = vector.extract_strided_slice %256 {offsets = [0, 0], sizes = [6, 12], strides = [1, 1]} : vector<12x12xbf16> to vector<6x12xbf16>
    %278 = arith.truncf %276 : vector<16x6xf32> to vector<16x6xbf16>
    %cst_82 = arith.constant dense<0.000000e+00> : vector<16x12xf32>
    %279 = tpu.matmul %278, %277, %cst_82 {dimension_numbers = #tpu.dot_dimension_numbers<[1], [0], [0], [1], [0, 0, 1, 1], [], []>} : vector<16x6xbf16>, vector<6x12xbf16>, vector<16x12xf32> -> vector<16x12xf32>
    %280 = vector.extract_strided_slice %253 {offsets = [0, 0, 6], sizes = [2, 8, 6], strides = [1, 1, 1]} : vector<2x8x12xf32> to vector<2x8x6xf32>
    %281 = arith.truncf %280 : vector<2x8x6xf32> to vector<2x8x6xbf16>
    %282 = vector.extract_strided_slice %254 {offsets = [0, 0, 6], sizes = [2, 8, 6], strides = [1, 1, 1]} : vector<2x8x12xf32> to vector<2x8x6xf32>
    %283 = arith.truncf %282 : vector<2x8x6xf32> to vector<2x8x6xbf16>
    "tpu.trace_start"() <{level = 10 : i32, message = "bqd,bkd->bqk"}> : () -> ()
    %cst_83 = arith.constant dense<0.000000e+00> : vector<2x8x8xf32>
    %284 = tpu.matmul %281, %283, %cst_83 {dimension_numbers = #tpu.dot_dimension_numbers<[2], [2], [1], [1], [0, 0, 0, 1, 1, 1], [0], [0]>} : vector<2x8x6xbf16>, vector<2x8x6xbf16>, vector<2x8x8xf32> -> vector<2x8x8xf32>
    "tpu.trace_stop"() : () -> ()
    %cst_84 = arith.constant dense<0xFF800000> : vector<2x8xf32>
    %285 = vector.multi_reduction <maximumf>, %284, %cst_84 [2] : vector<2x8x8xf32> to vector<2x8xf32>
    %286 = vector.shape_cast %285 : vector<2x8xf32> to vector<2x8x1xf32>
    %287 = vector.broadcast %286 : vector<2x8x1xf32> to vector<2x8x8xf32>
    %288 = arith.subf %284, %287 : vector<2x8x8xf32>
    %289 = math.exp %288 : vector<2x8x8xf32>
    %cst_85 = arith.constant dense<0.000000e+00> : vector<2x8xf32>
    %290 = vector.multi_reduction <add>, %289, %cst_85 [2] : vector<2x8x8xf32> to vector<2x8xf32>
    %291 = vector.shape_cast %290 : vector<2x8xf32> to vector<2x8x1xf32>
    %292 = tpu.reciprocal %291 {approx = true} : vector<2x8x1xf32> -> vector<2x8x1xf32>
    %293 = vector.broadcast %292 : vector<2x8x1xf32> to vector<2x8x8xf32>
    %294 = arith.mulf %289, %293 : vector<2x8x8xf32>
    %295 = arith.truncf %294 : vector<2x8x8xf32> to vector<2x8x8xbf16>
    %296 = vector.extract_strided_slice %255 {offsets = [0, 0, 6], sizes = [2, 8, 6], strides = [1, 1, 1]} : vector<2x8x12xf32> to vector<2x8x6xf32>
    %297 = arith.truncf %296 : vector<2x8x6xf32> to vector<2x8x6xbf16>
    "tpu.trace_start"() <{level = 10 : i32, message = "bqk,bkd->bqd"}> : () -> ()
    %cst_86 = arith.constant dense<0.000000e+00> : vector<2x8x6xf32>
    %298 = tpu.matmul %295, %297, %cst_86 {dimension_numbers = #tpu.dot_dimension_numbers<[2], [1], [1], [2], [0, 0, 0, 1, 1, 2], [0], [0]>} : vector<2x8x8xbf16>, vector<2x8x6xbf16>, vector<2x8x6xf32> -> vector<2x8x6xf32>
    "tpu.trace_stop"() : () -> ()
    %299 = vector.shape_cast %298 : vector<2x8x6xf32> to vector<16x6xf32>
    %300 = vector.extract_strided_slice %256 {offsets = [6, 0], sizes = [6, 12], strides = [1, 1]} : vector<12x12xbf16> to vector<6x12xbf16>
    %301 = arith.truncf %299 : vector<16x6xf32> to vector<16x6xbf16>
    %cst_87 = arith.constant dense<0.000000e+00> : vector<16x12xf32>
    %302 = tpu.matmul %301, %300, %cst_87 {dimension_numbers = #tpu.dot_dimension_numbers<[1], [0], [0], [1], [0, 0, 1, 1], [], []>} : vector<16x6xbf16>, vector<6x12xbf16>, vector<16x12xf32> -> vector<16x12xf32>
    %303 = arith.addf %279, %302 : vector<16x12xf32>
    %c0_88 = arith.constant 0 : index
    %c3584 = arith.constant 3584 : index
    %304 = vector.load %arg5[%c0_88, %c3584] : memref<1x6528xf32, #tpu.memory_space<vmem>>, vector<1x12xf32>
    %305 = vector.broadcast %304 : vector<1x12xf32> to vector<16x12xf32>
    %306 = arith.addf %303, %305 : vector<16x12xf32>
    %307 = arith.addf %234, %306 : vector<16x12xf32>
    %cst_89 = arith.constant dense<0.000000e+00> : vector<16xf32>
    %308 = vector.multi_reduction <add>, %307, %cst_89 [1] : vector<16x12xf32> to vector<16xf32>
    %309 = vector.shape_cast %308 : vector<16xf32> to vector<16x1xf32>
    %cst_90 = arith.constant 1.200000e+01 : f32
    %310 = vector.broadcast %cst_90 : f32 to vector<16x1xf32>
    %311 = arith.divf %309, %310 : vector<16x1xf32>
    %312 = vector.broadcast %311 : vector<16x1xf32> to vector<16x12xf32>
    %313 = arith.subf %307, %312 : vector<16x12xf32>
    %314 = arith.mulf %313, %313 : vector<16x12xf32>
    %cst_91 = arith.constant dense<0.000000e+00> : vector<16xf32>
    %315 = vector.multi_reduction <add>, %314, %cst_91 [1] : vector<16x12xf32> to vector<16xf32>
    %316 = vector.shape_cast %315 : vector<16xf32> to vector<16x1xf32>
    %cst_92 = arith.constant 1.200000e+01 : f32
    %317 = vector.broadcast %cst_92 : f32 to vector<16x1xf32>
    %318 = arith.divf %316, %317 : vector<16x1xf32>
    %cst_93 = arith.constant 9.99999974E-6 : f32
    %319 = vector.broadcast %cst_93 : f32 to vector<16x1xf32>
    %320 = arith.addf %318, %319 : vector<16x1xf32>
    %321 = math.rsqrt %320 : vector<16x1xf32>
    %322 = vector.broadcast %321 : vector<16x1xf32> to vector<16x12xf32>
    %323 = arith.mulf %313, %322 : vector<16x12xf32>
    %c0_94 = arith.constant 0 : index
    %c3712 = arith.constant 3712 : index
    %324 = vector.load %arg5[%c0_94, %c3712] : memref<1x6528xf32, #tpu.memory_space<vmem>>, vector<1x12xf32>
    %325 = vector.broadcast %324 : vector<1x12xf32> to vector<16x12xf32>
    %326 = arith.mulf %323, %325 : vector<16x12xf32>
    %c0_95 = arith.constant 0 : index
    %c3840 = arith.constant 3840 : index
    %327 = vector.load %arg5[%c0_95, %c3840] : memref<1x6528xf32, #tpu.memory_space<vmem>>, vector<1x12xf32>
    %328 = vector.broadcast %327 : vector<1x12xf32> to vector<16x12xf32>
    %329 = arith.addf %326, %328 : vector<16x12xf32>
    %c0_96 = arith.constant 0 : index
    %c2944_97 = arith.constant 2944 : index
    %330 = vector.load %arg3[%c0_96, %c2944_97] : memref<12x4992xbf16, #tpu.memory_space<vmem>>, vector<12x2048xbf16>
    %331 = arith.truncf %329 : vector<16x12xf32> to vector<16x12xbf16>
    %cst_98 = arith.constant dense<0.000000e+00> : vector<16x2048xf32>
    %332 = tpu.matmul %331, %330, %cst_98 {dimension_numbers = #tpu.dot_dimension_numbers<[1], [0], [0], [1], [0, 0, 1, 1], [], []>} : vector<16x12xbf16>, vector<12x2048xbf16>, vector<16x2048xf32> -> vector<16x2048xf32>
    %c0_99 = arith.constant 0 : index
    %c3968 = arith.constant 3968 : index
    %333 = vector.load %arg5[%c0_99, %c3968] : memref<1x6528xf32, #tpu.memory_space<vmem>>, vector<1x2048xf32>
    %334 = vector.broadcast %333 : vector<1x2048xf32> to vector<16x2048xf32>
    %335 = arith.addf %332, %334 : vector<16x2048xf32>
    %cst_100 = arith.constant 0.000000e+00 : f32
    %336 = vector.broadcast %cst_100 : f32 to vector<16x2048xf32>
    %337 = arith.maximumf %335, %336 : vector<16x2048xf32>
    %c2128 = arith.constant 2128 : index
    %c0_101 = arith.constant 0 : index
    %338 = vector.load %arg4[%c2128, %c0_101] : memref<4176x128xbf16, #tpu.memory_space<vmem>>, vector<2048x12xbf16>
    %339 = arith.truncf %337 : vector<16x2048xf32> to vector<16x2048xbf16>
    %cst_102 = arith.constant dense<0.000000e+00> : vector<16x12xf32>
    %340 = tpu.matmul %339, %338, %cst_102 {dimension_numbers = #tpu.dot_dimension_numbers<[1], [0], [0], [1], [0, 0, 1, 1], [], []>} : vector<16x2048xbf16>, vector<2048x12xbf16>, vector<16x12xf32> -> vector<16x12xf32>
    %c0_103 = arith.constant 0 : index
    %c6016 = arith.constant 6016 : index
    %341 = vector.load %arg5[%c0_103, %c6016] : memref<1x6528xf32, #tpu.memory_space<vmem>>, vector<1x12xf32>
    %342 = vector.broadcast %341 : vector<1x12xf32> to vector<16x12xf32>
    %343 = arith.addf %340, %342 : vector<16x12xf32>
    %344 = arith.addf %329, %343 : vector<16x12xf32>
    %cst_104 = arith.constant dense<0.000000e+00> : vector<16xf32>
    %345 = vector.multi_reduction <add>, %344, %cst_104 [1] : vector<16x12xf32> to vector<16xf32>
    %346 = vector.shape_cast %345 : vector<16xf32> to vector<16x1xf32>
    %cst_105 = arith.constant 1.200000e+01 : f32
    %347 = vector.broadcast %cst_105 : f32 to vector<16x1xf32>
    %348 = arith.divf %346, %347 : vector<16x1xf32>
    %349 = vector.broadcast %348 : vector<16x1xf32> to vector<16x12xf32>
    %350 = arith.subf %344, %349 : vector<16x12xf32>
    %351 = arith.mulf %350, %350 : vector<16x12xf32>
    %cst_106 = arith.constant dense<0.000000e+00> : vector<16xf32>
    %352 = vector.multi_reduction <add>, %351, %cst_106 [1] : vector<16x12xf32> to vector<16xf32>
    %353 = vector.shape_cast %352 : vector<16xf32> to vector<16x1xf32>
    %cst_107 = arith.constant 1.200000e+01 : f32
    %354 = vector.broadcast %cst_107 : f32 to vector<16x1xf32>
    %355 = arith.divf %353, %354 : vector<16x1xf32>
    %cst_108 = arith.constant 9.99999974E-6 : f32
    %356 = vector.broadcast %cst_108 : f32 to vector<16x1xf32>
    %357 = arith.addf %355, %356 : vector<16x1xf32>
    %358 = math.rsqrt %357 : vector<16x1xf32>
    %359 = vector.broadcast %358 : vector<16x1xf32> to vector<16x12xf32>
    %360 = arith.mulf %350, %359 : vector<16x12xf32>
    %c0_109 = arith.constant 0 : index
    %c6144 = arith.constant 6144 : index
    %361 = vector.load %arg5[%c0_109, %c6144] : memref<1x6528xf32, #tpu.memory_space<vmem>>, vector<1x12xf32>
    %362 = vector.broadcast %361 : vector<1x12xf32> to vector<16x12xf32>
    %363 = arith.mulf %360, %362 : vector<16x12xf32>
    %c0_110 = arith.constant 0 : index
    %c6272 = arith.constant 6272 : index
    %364 = vector.load %arg5[%c0_110, %c6272] : memref<1x6528xf32, #tpu.memory_space<vmem>>, vector<1x12xf32>
    %365 = vector.broadcast %364 : vector<1x12xf32> to vector<16x12xf32>
    %366 = arith.addf %363, %365 : vector<16x12xf32>
    %c0_111 = arith.constant 0 : index
    %c768 = arith.constant 768 : index
    %367 = vector.load %arg3[%c0_111, %c768] : memref<12x4992xbf16, #tpu.memory_space<vmem>>, vector<12x128xbf16>
    %368 = arith.truncf %366 : vector<16x12xf32> to vector<16x12xbf16>
    %cst_112 = arith.constant dense<0.000000e+00> : vector<16x128xf32>
    %369 = tpu.matmul %368, %367, %cst_112 {dimension_numbers = #tpu.dot_dimension_numbers<[1], [0], [0], [1], [0, 0, 1, 1], [], []>} : vector<16x12xbf16>, vector<12x128xbf16>, vector<16x128xf32> -> vector<16x128xf32>
    %c0_113 = arith.constant 0 : index
    %c6400 = arith.constant 6400 : index
    %370 = vector.load %arg5[%c0_113, %c6400] : memref<1x6528xf32, #tpu.memory_space<vmem>>, vector<1x128xf32>
    %371 = vector.broadcast %370 : vector<1x128xf32> to vector<16x128xf32>
    %372 = arith.addf %369, %371 : vector<16x128xf32>
    %373 = vector.shape_cast %372 : vector<16x128xf32> to vector<2x8x128xf32>
    %c0_114 = arith.constant 0 : index
    %c0_115 = arith.constant 0 : index
    %c0_116 = arith.constant 0 : index
    %374 = vector.load %arg6[%c0_114, %c0_115, %c0_116] : memref<2x8x128xf32, #tpu.memory_space<vmem>>, vector<2x8x128xf32>
    tpu.vector_store %arg6[%c0_114, %c0_115, %c0_116], %373 {strides = array<i32>} : memref<2x8x128xf32, #tpu.memory_space<vmem>>, vector<2x8x128xf32>,
    return
  }
  func.func @transform_0(%arg0: i32) -> (i32, i32, i32) {
    %c0_i32 = arith.constant 0 : i32
    %c0_i32_0 = arith.constant 0 : i32
    %c0_i32_1 = arith.constant 0 : i32
    return %arg0, %c0_i32, %c0_i32_0 : i32, i32, i32
  }
  func.func @transform_1(%arg0: i32) -> (i32, i32) {
    %c0_i32 = arith.constant 0 : i32
    %c0_i32_0 = arith.constant 0 : i32
    %c0_i32_1 = arith.constant 0 : i32
    return %c0_i32, %c0_i32_0 : i32, i32
  }
  func.func @transform_2(%arg0: i32) -> (i32, i32) {
    %c0_i32 = arith.constant 0 : i32
    %c0_i32_0 = arith.constant 0 : i32
    %c0_i32_1 = arith.constant 0 : i32
    return %c0_i32, %c0_i32_0 : i32, i32
  }
  func.func @transform_3(%arg0: i32) -> (i32, i32) {
    %c0_i32 = arith.constant 0 : i32
    %c0_i32_0 = arith.constant 0 : i32
    %c0_i32_1 = arith.constant 0 : i32
    return %c0_i32, %c0_i32_0 : i32, i32
  }
  func.func @transform_4(%arg0: i32) -> (i32, i32) {
    %c0_i32 = arith.constant 0 : i32
    %c0_i32_0 = arith.constant 0 : i32
    %c0_i32_1 = arith.constant 0 : i32
    return %c0_i32, %c0_i32_0 : i32, i32
  }
  func.func @transform_5(%arg0: i32) -> (i32, i32, i32) {
    %c0_i32 = arith.constant 0 : i32
    %c0_i32_0 = arith.constant 0 : i32
    %c0_i32_1 = arith.constant 0 : i32
    return %arg0, %c0_i32, %c0_i32_0 : i32, i32, i32
  }
}

</mosaic_0001>

<bundles_post_ra>
// kernel: transformer_ae_forward.1
= control target key start
LH: loop header
LB: loop body
LE: loop exit
PB: predicated region body
PF: predicated region fallthrough
CT: control target
= control target key end

     0   :  { %10 = vsyncpa [#allocation3], 0  ;;  %s8632_s0 = inlined_call_operand.hbm [shape: f32[2,8,72], index: 0, kind: input, shape index: {}]   ;;  %s8633_s1 = inlined_call_operand.hbm [shape: f32[8,12], index: 1, kind: input, shape index: {}]   ;;  %s8634_s2 = inlined_call_operand.hbm [shape: bf16[12,4992], index: 2, kind: input, shape index: {}]   ;;  %s8635_s3 = inlined_call_operand.hbm [shape: bf16[4176,128], index: 3, kind: input, shape index: {}]   ;;  %s8636_s4 = inlined_call_operand.hbm [shape: f32[1,6528], index: 4, kind: input, shape index: {}]   ;;  %s8637_s5 = inlined_call_operand.hbm [shape: f32[2,8,128], index: 5, kind: output, shape index: {}]  }
   0x1   :  { %11 = vsyncpa [#allocation6], 0 }
   0x2   :  { %12 = vsyncpa [#allocation9], 0 }
   0x3   :  { %13 = vsyncpa [#allocation4], 0  ;;  %s7955_s18 = smov [#allocation5]   ;;  %s7956_s20 = smov [#allocation8]  }
   0x4   :  { %s32_s19 = sshll.u32 %s7955_s18, 4  ;;  %s53_s21 = sshll.u32 %s7956_s20, 4  ;;  %s33_s19 = int_to_ptr.vmem [resolvable:$true] %s32_s19  ;;  %s8005_s21 = int_to_ptr.vmem [resolvable:$true] %s53_s21 }
   0x5   :  { %s7815_s24 = scalar_lea.hbm %s8633_s1, 128 }
   0x6   :  { %p7816_p0 = scmp.ne.s32.totalorder %s8633_s1, %s7815_s24  ;;  %p7819_p1 = scmp.lt.u32.totalorder %s7815_s24, %s8633_s1 }
   0x8   :  { %p7821_p2 = pnand %p7819_p1, %p7816_p0 }
   0xa   :  { %7824 = shalt.err (!%p7821_p2)
}
   0xb   :  { %s7825_s29 = scalar_lea.vmem %s33_s19, 128  ;;  %p7830_p4 = scmp.lt.s32.totalorder %s33_s19, %s33_s19 }
   0xc   :  { %p7826_p3 = scmp.ne.s32.totalorder %s33_s19, %s7825_s29  ;;  %p7831_p5 = scmp.lt.s32.totalorder %s7825_s29, %s7825_s29 }
   0xe   :  { %p7832_p6 = por %p7831_p5, %p7830_p4 }
  0x10   :  { %p7833_p7 = pnand %p7832_p6, %p7826_p3 }
  0x12   :  { %7836 = shalt.err (!%p7833_p7)
}
  0x13   :  { %35 = dma.hbm_to_vmem [thread:$0]  %s8633_s1, 128, %s33_s19, [#allocation6]  }
  0x14   :  { %s7837_s9 = scalar_lea.hbm %s8635_s3, 33408 }
  0x15   :  { %p7838_p8 = scmp.ne.s32.totalorder %s8635_s3, %s7837_s9  ;;  %p7841_p9 = scmp.lt.u32.totalorder %s7837_s9, %s8635_s3 }
  0x17   :  { %p7843_p10 = pnand %p7841_p9, %p7838_p8 }
  0x19   :  { %7846 = shalt.err (!%p7843_p10)
}
  0x1a   :  { %s7847_s14 = scalar_lea.vmem %s8005_s21, 33408  ;;  %p7852_p12 = scmp.lt.s32.totalorder %s8005_s21, %s8005_s21 }
  0x1b   :  { %p7848_p11 = scmp.ne.s32.totalorder %s8005_s21, %s7847_s14  ;;  %p7853_p13 = scmp.lt.s32.totalorder %s7847_s14, %s7847_s14 }
  0x1d   :  { %p7854_p0 = por %p7853_p13, %p7852_p12 }
  0x1f   :  { %p7855_p1 = pnand %p7854_p0, %p7848_p11 }
  0x21   :  { %7858 = shalt.err (!%p7855_p1)
}
  0x22   :  { %s7957_s1 = smov 64   ;;  %s7958_s15 = smov 4  }
  0x23   :  { %59 = dma.hbm_to_vmem [thread:$0]  %s8635_s3, 33408, %s8005_s21, [#allocation9], %s7957_s1, %s7957_s1, %s7958_s15  }
  0x24   :  { %s7959_s18 = smov [#allocation2]   ;;  %s7859_s23 = scalar_lea.hbm %s8632_s0, 256 }
  0x25   :  { %s19_s19 = sshll.u32 %s7959_s18, 4  ;;  %p7860_p2 = scmp.ne.s32.totalorder %s8632_s0, %s7859_s23  ;;  %s20_s19 = int_to_ptr.vmem [resolvable:$true] %s19_s19 }
  0x26   :  { %p7863_p3 = scmp.lt.u32.totalorder %s7859_s23, %s8632_s0 }
  0x28   :  { %p7865_p4 = pnand %p7863_p3, %p7860_p2 }
  0x2a   :  { %7868 = shalt.err (!%p7865_p4)
}
  0x2b   :  { %s7869_s28 = scalar_lea.vmem %s20_s19, 256  ;;  %p7874_p6 = scmp.lt.s32.totalorder %s20_s19, %s20_s19 }
  0x2c   :  { %p7870_p5 = scmp.ne.s32.totalorder %s20_s19, %s7869_s28  ;;  %p7875_p7 = scmp.lt.s32.totalorder %s7869_s28, %s7869_s28 }
  0x2e   :  { %p7876_p8 = por %p7875_p7, %p7874_p6 }
  0x30   :  { %p7877_p9 = pnand %p7876_p8, %p7870_p5 }
  0x32   :  { %7880 = shalt.err (!%p7877_p9)
}
  0x33   :  { %s7960_s3 = smov 128   ;;  %s7961_s21 = smov 8  }
  0x34   :  { %25 = dma.hbm_to_vmem [thread:$0]  %s8632_s0, 256, %s20_s19, [#allocation3], %s7960_s3, %s7960_s3, %s7961_s21  }
  0x35   :  { %s7962_s6 = smov [#allocation7]   ;;  %s7881_s10 = scalar_lea.hbm %s8634_s2, 4992 }
  0x36   :  { %s41_s7 = sshll.u32 %s7962_s6, 4  ;;  %p7882_p10 = scmp.ne.s32.totalorder %s8634_s2, %s7881_s10  ;;  %s42_s7 = int_to_ptr.vmem [resolvable:$true] %s41_s7 }
  0x37   :  { %p7885_p11 = scmp.lt.u32.totalorder %s7881_s10, %s8634_s2 }
  0x39   :  { %p7887_p12 = pnand %p7885_p11, %p7882_p10 }
  0x3b   :  { %7890 = shalt.err (!%p7887_p12)
}
  0x3c   :  { %s7891_s1 = scalar_lea.vmem %s42_s7, 4992  ;;  %p7896_p0 = scmp.lt.s32.totalorder %s42_s7, %s42_s7 }
  0x3d   :  { %p7892_p13 = scmp.ne.s32.totalorder %s42_s7, %s7891_s1  ;;  %p7897_p1 = scmp.lt.s32.totalorder %s7891_s1, %s7891_s1 }
  0x3f   :  { %p7898_p2 = por %p7897_p1, %p7896_p0 }
  0x41   :  { %p7899_p3 = pnand %p7898_p2, %p7892_p13 }
  0x43   :  { %7902 = shalt.err (!%p7899_p3)
}
  0x44   :  { %s7963_s0 = smov 2496   ;;  %s7964_s15 = smov 156  }
  0x45   :  { %47 = dma.hbm_to_vmem [thread:$0]  %s8634_s2, 4992, %s42_s7, [#allocation6], %s7963_s0, %s7963_s0, %s7964_s15  }
  0x46   :  { %s7965_s18 = smov [#allocation10]   ;;  %s7903_s23 = scalar_lea.hbm %s8636_s4, 816 }
  0x47   :  { %s66_s19 = sshll.u32 %s7965_s18, 4  ;;  %p7904_p4 = scmp.ne.s32.totalorder %s8636_s4, %s7903_s23  ;;  %s67_s19 = int_to_ptr.vmem [resolvable:$true] %s66_s19 }
  0x48   :  { %p7907_p5 = scmp.lt.u32.totalorder %s7903_s23, %s8636_s4 }
  0x4a   :  { %p7909_p6 = pnand %p7907_p5, %p7904_p4 }
  0x4c   :  { %7912 = shalt.err (!%p7909_p6)
}
  0x4d   :  { %s7913_s28 = scalar_lea.vmem %s67_s19, 816  ;;  %s7917_s2 = scalar_lea.vmem %s67_s19, 832 }
  0x4e   :  { %p7914_p7 = scmp.ne.s32.totalorder %s67_s19, %s7913_s28  ;;  %p7918_p8 = scmp.lt.s32.totalorder %s67_s19, %s67_s19 }
  0x4f   :  { %p7919_p9 = scmp.lt.s32.totalorder %s7917_s2, %s7913_s28 }
  0x51   :  { %p7920_p10 = por %p7919_p9, %p7918_p8 }
  0x53   :  { %p7921_p11 = pnand %p7920_p10, %p7914_p7 }
  0x55   :  { %7924 = shalt.err (!%p7921_p11)
}
  0x56   :  { %69 = dma.hbm_to_vmem [thread:$0]  %s8636_s4, 816, %s67_s19, [#allocation9]  }
  0x57   :  { %7947 = dma.done.wait [#allocation3], 256  }
  0x58   :  { %7948 = vsyncadd [#allocation3], 4294967040 }
  0x59   :  { %7949 = dma.done.wait [#allocation6], 5120  }
  0x5a   :  { %7950 = vsyncadd [#allocation6], 4294962176 }
  0x5b   :  { %7951 = dma.done.wait [#allocation9], 34224  }
  0x5c   :  { %7952 = vsyncadd [#allocation9], 4294933072  ;;  %v7966_v0 = vmov 0.0   ;;  %vm7967_vm0 = vmmov 0   ;;  %v7431_v1 = vld [vmem:[#allocation8] sm:$0xff]   ;;  %v7432_v2 = vld [vmem:[#allocation8 + $0x8] sm:$0xff]  }
  0x5d   :  { %7187 = vmatprep.subr.bf16.mxu0 %v7966_v0  ;;  %7197 = vmatprep.mubr.msk.bf16.mxu0 %vm7967_vm0, %v7966_v0  ;;  %v7433_v3 = vld [vmem:[#allocation8 + $0x10] sm:$0xff]   ;;  %v7435_v4 = vld [vmem:[#allocation8 + $0x20] ss:$0 sps:$4 sm:$0xff]   ;;  %vm129_vm1 = vcmask 1043456   ;;  %v7434_v5 = vld [vmem:[#allocation8 + $0x18] sm:$0xff]   ;;  %vm125_vm2 = vcmask 588800  }
  0x5e   :  { %7201 = vmatprep.subr.bf16.mxu1 %v7966_v0  ;;  %7203 = vmatprep.mubr.msk.bf16.mxu1 %vm7967_vm0, %v7966_v0  ;;  %v131_v6 = vsel %vm129_vm1, %v7435_v4, 0  ;;  %v86_v7 = vld [vmem:[#allocation2] sm:$0xff]  ;;  %v87_v8 = vld [vmem:[#allocation2 + $0x8] sm:$0xff]  ;;  %v7436_v10 = vld [vmem:[#allocation7] ss:$156 sps:$4 sm:$0x3f]  }
  0x5f   :  { %7188 = vmatpush3.bf16.msra.mxu0 %v7431_v1  ;;  %v97_v9 = vpack.c.bf16 %v87_v8, %v86_v7  ;;  %vm230_vm3 = vcmask 1045504   ;;  %s7968_s4 = smov 116   ;;  %s7969_s6 = smov 104   ;;  %v208_v26 = vld [vmem:[#allocation5] sm:$0xff]  ;;  %vm226_vm4 = vcmask 97280   ;;  %vm286_vm5 = vcmask 48128  }
  0x60   :  { %7189 = vmatprep.subr.bf16.mxu0 %v7966_v0  ;;  %v232_v11 = vsel %vm230_vm3, %v7436_v10, 0  ;;  %v6378_v32 = vld [vmem:[#allocation10] ss:$0 sm:$0xff]  ;;  %vm382_vm6 = vcmask 64512   ;;  %s7970_s7 = smov 110   ;;  %s7971_s8 = smov 122  }
  0x61   :  { %7202 = vmatpush3.bf16.msra.mxu1 %v232_v11  ;;  %s7972_s9 = smov 98   ;;  %vm736_vm7 = vcmask 1042432   ;;  %s7974_s10 = smov [#allocation11]  }
  0x62   :  { %7207 = vmatprep.subr.bf16.mxu1 %v7966_v0  ;;  %s6358_s11 = sshll.u32 %s7974_s10, 4  ;;  %s6359_s11 = int_to_ptr.vmem [resolvable:$true] %s6358_s11 }
  0x63   :  { %7190 = vmatpush3.bf16.msra.mxu0 %v7432_v2  ;;  %s7925_s12 = scalar_lea.vmem %s6359_s11, 256  ;;  %p7930_p13 = scmp.lt.s32.totalorder %s6359_s11, %s6359_s11 }
  0x64   :  { %7191 = vmatprep.subr.bf16.mxu0 %v7966_v0  ;;  %p7926_p12 = scmp.ne.s32.totalorder %s6359_s11, %s7925_s12  ;;  %p7931_p0 = scmp.lt.s32.totalorder %s7925_s12, %s7925_s12 }
  0x66   :  { %p7932_p1 = por %p7931_p0, %p7930_p13 }
  0x67   :  { %7192 = vmatpush3.bf16.msra.mxu0 %v7433_v3 }
  0x68   :  { %7193 = vmatprep.subr.bf16.mxu0 %v7966_v0  ;;  %p7933_p2 = pnand %p7932_p1, %p7926_p12 }
  0x6b   :  { %7194 = vmatpush3.bf16.msra.mxu0 %v7434_v5 }
  0x6c   :  { %7195 = vmatprep.subr.bf16.mxu0 %v7966_v0 }
  0x6f   :  { %7196 = vmatpush3.bf16.msra.mxu0 %v131_v6 }
  0x70   :  { %7219 = vmatprep.subr.bf16.mxu0 %v7966_v0 }
  0x72   :  { %7198 = vmatmul.mubr.msk.bf16.vlgmr.msra.gmra.mrb[0].mxu0 %vm125_vm2, %v97_v9 }
  0x73   :  { %7221 = vmatprep.mubr.msk.bf16.mxu0 %vm7967_vm0, %v7966_v0 }
 0x145   :  { %v167_v12 = vpop.f32.mrb[0].mxu0 }
 0x146   :  { %190 = vrot.lane.b32.xlu0 %v167_v12, %s7968_s4  ;;  %v7199_v13 = vpop.f32.mrb[1].mxu0  ;;  %v183_v14 = vrot.slane %v167_v12, 1  ;;  %v176_v18 = vrot.slane %v167_v12, 7 }
 0x147   :  { %v170_v15 = vpop.f32.mrb[2].mxu0 }
 0x148   :  { %200 = vrot.lane.b32.xlu1 %v183_v14, %s7969_s6  ;;  %v7200_v16 = vpop.f32.mrb[3].mxu0  ;;  %v184_v17 = vrot.slane %v170_v15, 1  ;;  %v177_v22 = vrot.slane %v170_v15, 7 }
 0x14a   :  { %192 = vrot.lane.b32.xlu0 %v170_v15, %s7968_s4 }
 0x14c   :  { %202 = vrot.lane.b32.xlu1 %v184_v17, %s7969_s6 }
 0x1b8   :  { %v191_v19 = vpop.permute.xlu0 %190 }
 0x1b9   :  { %v196_v20 = vadd.f32 %v191_v19, %v176_v18 }
 0x1ba   :  { %v201_v21 = vpop.permute.xlu1 %200 }
 0x1bb   :  { %v206_v24 = vadd.f32 %v201_v21, %v196_v20 }
 0x1bc   :  { %v193_v23 = vpop.permute.xlu0 %192 }
 0x1bd   :  { %v197_v25 = vadd.f32 %v193_v23, %v177_v22  ;;  %v8095_v29 = vadd.f32 %v208_v26, %v206_v24 }
 0x1be   :  { %v203_v27 = vpop.permute.xlu1 %202 }
 0x1bf   :  { %v207_v28 = vadd.f32 %v203_v27, %v197_v25 }
 0x1c1   :  { %v8097_v30 = vadd.f32 %v208_v26, %v207_v28 }
 0x1c3   :  { %v214_v31 = vpack.c.bf16 %v8097_v30, %v8095_v29 }
 0x1c5   :  { %7204 = vmatmul.mubr.msk.bf16.vlgmr.msra.gmra.mrb[0].mxu1 %vm226_vm4, %v214_v31 }
 0x1c6   :  { %7209 = vmatprep.mubr.msk.bf16.mxu1 %vm7967_vm0, %v7966_v0 }
 0x298   :  { %v268_v33 = vpop.f32.mrb[0].mxu1 }
 0x299   :  { %v269_v34 = vadd.f32 %v6378_v32, %v268_v33  ;;  %v7205_v35 = vpop.f32.mrb[1].mxu1 }
 0x29a   :  { %v271_v36 = vpop.f32.mrb[2].mxu1 }
 0x29b   :  { %v8104_v37 = vpack.c.bf16 %v269_v34, %v269_v34  ;;  %v272_v38 = vadd.f32 %v6378_v32, %v271_v36  ;;  %v7206_v39 = vpop.f32.mrb[3].mxu1  ;;  %v275_v43 = vmul.f32 0.4082483, %v269_v34 }
 0x29d   :  { %v8106_v40 = vpack.c.bf16 %v272_v38, %v272_v38  ;;  %284 = vrot.lane.b32.xlu0 %v8104_v37, %s7968_s4  ;;  %v279_v45 = vpack.c.bf16 %v275_v43, %v275_v43  ;;  %v276_v47 = vmul.f32 0.4082483, %v272_v38 }
 0x29f   :  { %334 = vrot.lane.b32.xlu1 %v8106_v40, %s7968_s4  ;;  %v280_v48 = vpack.c.bf16 %v276_v47, %v276_v47 }
 0x30f   :  { %v285_v41 = vpop.permute.xlu0 %284 }
 0x310   :  { %v291_v42 = vsel %vm286_vm5, %v285_v41, 0 }
 0x311   :  { %7208 = vmatpush3.bf16.xpose.msra.mxu1 %v291_v42  ;;  %v335_v44 = vpop.permute.xlu1 %334 }
 0x312   :  { %7213 = vmatprep.subr.bf16.mxu1 %v7966_v0  ;;  %v340_v46 = vsel %vm286_vm5, %v335_v44, 0 }
 0x318   :  { %7210 = vmatmul.mubr.msk.bf16.vlgmr.msra.gmra.mrb[4].mxu1 %vm286_vm5, %v279_v45 }
 0x319   :  { %7214 = vmatpush3.bf16.xpose.msra.mxu1 %v340_v46  ;;  %7215 = vmatprep.mubr.msk.bf16.mxu1 %vm7967_vm0, %v7966_v0 }
 0x31a   :  { %7225 = vmatprep.subr.bf16.mxu1 %v7966_v0 }
 0x320   :  { %7216 = vmatmul.mubr.msk.bf16.vlgmr.msra.gmra.mrb[8].mxu1 %vm286_vm5, %v280_v48 }
 0x321   :  { %7227 = vmatprep.mubr.msk.bf16.mxu1 %vm7967_vm0, %v7966_v0 }
 0x3eb   :  { %v327_v49 = vpop.f32.mrb[4].mxu1 }
 0x3ec   :  { %v7211_v50 = vpop.f32.mrb[5].mxu1  ;;  %v383_v51 = vsel %vm382_vm6, %v327_v49, -inf }
 0x3ed   :  { %384 = vmax.xlane.f32.xlu0 %v383_v51  ;;  %v330_v52 = vpop.f32.mrb[6].mxu1 }
 0x3ee   :  { %v7212_v53 = vpop.f32.mrb[7].mxu1 }
 0x3f3   :  { %v376_v54 = vpop.f32.mrb[8].mxu1 }
 0x3f4   :  { %v7217_v55 = vpop.f32.mrb[9].mxu1  ;;  %v386_v56 = vsel %vm382_vm6, %v376_v54, -inf }
 0x3f5   :  { %387 = vmax.xlane.f32.xlu1 %v386_v56  ;;  %v379_v57 = vpop.f32.mrb[10].mxu1 }
 0x3f6   :  { %v7218_v58 = vpop.f32.mrb[11].mxu1 }
 0x406   :  { %407 = vrot.lane.b32.xlu1 %v8104_v37, %s7969_s6 }
 0x40a   :  { %507 = vrot.lane.b32.xlu1 %v8104_v37, %s7970_s7 }
 0x40e   :  { %558 = vrot.lane.b32.xlu1 %v8106_v40, %s7970_s7 }
 0x412   :  { %556 = vrot.lane.b32.xlu1 %v280_v48, %s7971_s8 }
 0x47a   :  { %v385_v59 = vpop.xlane.xlu0 %384 }
 0x47b   :  { %v389_v60 = vsub.f32 %v327_v49, %v385_v59 }
 0x47d   :  { %v391_v61 = vmul.f32 1.442695, %v389_v60 }
 0x47f   :  { %7747 = vpow2.f32 %v391_v61 }
 0x482   :  { %v388_v62 = vpop.xlane.xlu1 %387 }
 0x483   :  { %v390_v63 = vsub.f32 %v376_v54, %v388_v62 }
 0x485   :  { %v393_v1 = vmul.f32 1.442695, %v390_v63 }
 0x486   :  { %v408_v2 = vpop.permute.xlu1 %407 }
 0x487   :  { %7749 = vpow2.f32 %v393_v1  ;;  %v413_v3 = vsel %vm129_vm1, %v408_v2, 0 }
 0x488   :  { %7220 = vmatpush3.bf16.msra.mxu0 %v413_v3 }
 0x489   :  { %v7748_v4 = vpop.eup %7747  ;;  %7231 = vmatprep.subr.bf16.mxu0 %v7966_v0 }
 0x48a   :  { %v395_v5 = vsel %vm382_vm6, %v7748_v4, 0.0  ;;  %v508_v13 = vpop.permute.xlu1 %507 }
 0x48b   :  { %396 = vadd.xlane.f32.xlu0 %v395_v5  ;;  %v513_v16 = vsel %vm286_vm5, %v508_v13, 0 }
 0x48e   :  { %v559_v19 = vpop.permute.xlu1 %558 }
 0x48f   :  { %v564_v22 = vsel %vm286_vm5, %v559_v19, 0 }
 0x491   :  { %v7750_v6 = vpop.eup %7749 }
 0x492   :  { %v398_v7 = vsel %vm382_vm6, %v7750_v6, 0.0  ;;  %v557_v23 = vpop.permute.xlu1 %556 }
 0x493   :  { %399 = vadd.xlane.f32.xlu0 %v398_v7 }
 0x4a9   :  { %455 = vrot.lane.b32.xlu0 %v8106_v40, %s7969_s6 }
 0x4ad   :  { %505 = vrot.lane.b32.xlu0 %v279_v45, %s7971_s8 }
 0x518   :  { %v397_v8 = vpop.xlane.xlu0 %396 }
 0x519   :  { %7751 = vrcp.f32 %v397_v8 }
 0x520   :  { %v400_v9 = vpop.xlane.xlu0 %399 }
 0x521   :  { %7753 = vrcp.f32 %v400_v9 }
 0x523   :  { %v7752_v10 = vpop.eup %7751 }
 0x524   :  { %v403_v11 = vmul.f32 %v7752_v10, %v7748_v4  ;;  %v456_v12 = vpop.permute.xlu0 %455 }
 0x525   :  { %v461_v14 = vsel %vm129_vm1, %v456_v12, 0 }
 0x526   :  { %7226 = vmatpush3.bf16.msra.mxu1 %v461_v14  ;;  %v405_v15 = vpack.c.bf16 %v403_v11, %v403_v11 }
 0x527   :  { %7237 = vmatprep.subr.bf16.mxu1 %v7966_v0 }
 0x528   :  { %7222 = vmatmul.mubr.msk.bf16.vlgmr.msra.gmra.mrb[4].mxu0 %vm382_vm6, %v405_v15  ;;  %v506_v21 = vpop.permute.xlu0 %505 }
 0x529   :  { %7232 = vmatpush3.bf16.xpose.msra.mxu0 %v513_v16  ;;  %7233 = vmatprep.mubr.msk.bf16.mxu0 %vm7967_vm0, %v7966_v0 }
 0x52a   :  { %7243 = vmatprep.subr.bf16.mxu0 %v7966_v0 }
 0x52b   :  { %v7754_v17 = vpop.eup %7753 }
 0x52c   :  { %v404_v18 = vmul.f32 %v7754_v17, %v7750_v6  ;;  %v278_v6 = vld [vmem:[#allocation7 + $0xa0] sm:$0x3] }
 0x52e   :  { %v406_v20 = vpack.c.bf16 %v404_v18, %v404_v18 }
 0x530   :  { %7228 = vmatmul.mubr.msk.bf16.vlgmr.msra.gmra.mrb[12].mxu1 %vm382_vm6, %v406_v20  ;;  %7234 = vmatmul.mubr.msk.bf16.vlgmr.msra.gmra.mrb[8].mxu0 %vm286_vm5, %v506_v21 }
 0x531   :  { %7238 = vmatpush3.bf16.xpose.msra.mxu1 %v564_v22  ;;  %7239 = vmatprep.mubr.msk.bf16.mxu1 %vm7967_vm0, %v7966_v0 }
 0x532   :  { %7249 = vmatprep.subr.bf16.mxu1 %v7966_v0  ;;  %7245 = vmatprep.mubr.msk.bf16.mxu0 %vm7967_vm0, %v7966_v0 }
 0x538   :  { %7240 = vmatmul.mubr.msk.bf16.vlgmr.msra.gmra.mrb[16].mxu1 %vm286_vm5, %v557_v23 }
 0x539   :  { %7251 = vmatprep.mubr.msk.bf16.mxu1 %vm7967_vm0, %v7966_v0 }
 0x5fb   :  { %v8156_v24 = vpop.f32.mrb[4].mxu0 }
 0x5fc   :  { %v7223_v25 = vpop.f32.mrb[5].mxu0 }
 0x5fd   :  { %v452_v26 = vpop.f32.mrb[6].mxu0 }
 0x5fe   :  { %v7224_v27 = vpop.f32.mrb[7].mxu0 }
 0x603   :  { %v497_v28 = vpop.f32.mrb[12].mxu1  ;;  %v549_v31 = vpop.f32.mrb[8].mxu0 }
 0x604   :  { %v503_v32 = vpack.c.bf16 %v497_v28, %v8156_v24  ;;  %v7229_v33 = vpop.f32.mrb[13].mxu1  ;;  %v7235_v34 = vpop.f32.mrb[9].mxu0  ;;  %v606_v35 = vsel %vm382_vm6, %v549_v31, -inf  ;;  %v6392_v24 = vld [vmem:[#allocation10 + $0x1] ss:$0 sm:$0xff] }
 0x605   :  { %v500_v36 = vpop.f32.mrb[14].mxu1  ;;  %607 = vmax.xlane.f32.xlu0 %v606_v35  ;;  %v552_v38 = vpop.f32.mrb[10].mxu0 }
 0x606   :  { %v7230_v39 = vpop.f32.mrb[15].mxu1  ;;  %v7236_v41 = vpop.f32.mrb[11].mxu0 }
 0x60b   :  { %v600_v42 = vpop.f32.mrb[16].mxu1 }
 0x60c   :  { %v7241_v43 = vpop.f32.mrb[17].mxu1  ;;  %v609_v44 = vsel %vm382_vm6, %v600_v42, -inf }
 0x60d   :  { %610 = vmax.xlane.f32.xlu1 %v609_v44  ;;  %v603_v45 = vpop.f32.mrb[18].mxu1 }
 0x60e   :  { %v7242_v46 = vpop.f32.mrb[19].mxu1 }
 0x61e   :  { %630 = vrot.lane.b32.xlu1 %v8104_v37, %s7972_s9 }
 0x692   :  { %v608_v47 = vpop.xlane.xlu0 %607 }
 0x693   :  { %v612_v48 = vsub.f32 %v549_v31, %v608_v47 }
 0x695   :  { %v614_v49 = vmul.f32 1.442695, %v612_v48 }
 0x697   :  { %7755 = vpow2.f32 %v614_v49  ;;  %v7438_v49 = vld [vmem:[#allocation7 + $0x20] ss:$156 sps:$4 sm:$0x3f]  }
 0x69a   :  { %v611_v50 = vpop.xlane.xlu1 %610 }
 0x69b   :  { %v613_v51 = vsub.f32 %v600_v42, %v611_v50  ;;  %v7441_v50 = vld [vmem:[#allocation7 + $0x28] ss:$156 sps:$4 sm:$0x3f]  }
 0x69d   :  { %v616_v52 = vmul.f32 1.442695, %v613_v51  ;;  %v7443_v51 = vld [vmem:[#allocation7 + $0x24] ss:$156 sps:$4 sm:$0x3f]  }
 0x69e   :  { %v631_v53 = vpop.permute.xlu1 %630 }
 0x69f   :  { %7757 = vpow2.f32 %v616_v52  ;;  %v636_v54 = vsel %vm129_vm1, %v631_v53, 0  ;;  %v1059_v53 = vsel %vm230_vm3, %v7443_v51, 0  ;;  %v7486_v51 = vld [vmem:[#allocation8 + $0x98] sm:$0xff]  }
 0x6a0   :  { %7244 = vmatpush3.bf16.msra.mxu0 %v636_v54  ;;  %v7973_v54 = vmov 0  }
 0x6a1   :  { %v7756_v55 = vpop.eup %7755  ;;  %7255 = vmatprep.subr.bf16.mxu0 %v7966_v0 }
 0x6a2   :  { %v618_v56 = vsel %vm382_vm6, %v7756_v55, 0.0 }
 0x6a3   :  { %619 = vadd.xlane.f32.xlu0 %v618_v56  ;;  %v7446_v56 = vld [vmem:[#allocation7 + $0x38] ss:$156 sps:$4 sm:$0x3f]  }
 0x6a9   :  { %v7758_v57 = vpop.eup %7757 }
 0x6aa   :  { %v621_v37 = vsel %vm382_vm6, %v7758_v57, 0.0 }
 0x6ab   :  { %622 = vadd.xlane.f32.xlu0 %v621_v37 }
 0x6c1   :  { %678 = vrot.lane.b32.xlu0 %v8106_v40, %s7972_s9  ;;  %v277_v40 = vld [vmem:[#allocation7 + $0x4] sm:$0xf] }
 0x6c2   :  { %v785_v5 = vsel %vm736_vm7, %v277_v40, 0  ;;  %v6389_v7 = vcombine.low %v277_v40, %v278_v6  ;;  %v7448_v6 = vld [vmem:[#allocation7 + $0x2c] ss:$156 sps:$4 sm:$0x3f]  }
 0x6c4   :  { %v732_v8 = vrot.slane %v6389_v7, 3  ;;  %v7449_v7 = vld [vmem:[#allocation7 + $0x34] ss:$156 sps:$4 sm:$0x3f]  }
 0x6c6   :  { %v738_v9 = vsel %vm736_vm7, %v732_v8, 0 }
 0x730   :  { %v620_v58 = vpop.xlane.xlu0 %619 }
 0x731   :  { %7759 = vrcp.f32 %v620_v58 }
 0x738   :  { %v623_v59 = vpop.xlane.xlu0 %622 }
 0x739   :  { %7761 = vrcp.f32 %v623_v59 }
 0x73b   :  { %v7760_v60 = vpop.eup %7759 }
 0x73c   :  { %v626_v61 = vmul.f32 %v7760_v60, %v7756_v55  ;;  %v679_v62 = vpop.permute.xlu0 %678  ;;  %v7444_v55 = vld [vmem:[#allocation7 + $0x30] ss:$156 sps:$4 sm:$0x3f]  }
 0x73d   :  { %v684_v63 = vsel %vm129_vm1, %v679_v62, 0 }
 0x73e   :  { %7250 = vmatpush3.bf16.msra.mxu1 %v684_v63  ;;  %v628_v1 = vpack.c.bf16 %v626_v61, %v626_v61  ;;  %v6393_v63 = vld [vmem:[#allocation10 + $0x2] ss:$0 sm:$0xff] }
 0x73f   :  { %7261 = vmatprep.subr.bf16.mxu1 %v7966_v0 }
 0x740   :  { %7246 = vmatmul.mubr.msk.bf16.vlgmr.msra.gmra.mrb[12].mxu0 %vm382_vm6, %v628_v1 }
 0x741   :  { %7257 = vmatprep.mubr.msk.bf16.mxu0 %vm7967_vm0, %v7966_v0  ;;  %7256 = vmatpush3.bf16.msra.mxu0 %v738_v9 }
 0x742   :  { %6411 = vmatprep.subr.msk.bf16.mxu0 %vm230_vm3, %v7438_v49  ;;  %v7483_v49 = vld [vmem:[#allocation8 + $0x110] sm:$0xff]  }
 0x743   :  { %v7762_v2 = vpop.eup %7761 }
 0x744   :  { %v627_v3 = vmul.f32 %v7762_v2, %v7758_v57 }
 0x746   :  { %v629_v4 = vpack.c.bf16 %v627_v3, %v627_v3 }
 0x748   :  { %7252 = vmatmul.mubr.msk.bf16.vlgmr.msra.gmra.mrb[20].mxu1 %vm382_vm6, %v629_v4  ;;  %v6394_v4 = vld [vmem:[#allocation10 + $0x3] ss:$0 sm:$0xff] }
 0x749   :  { %7262 = vmatpush3.bf16.msra.mxu1 %v785_v5  ;;  %7263 = vmatprep.mubr.msk.bf16.mxu1 %vm7967_vm0, %v7966_v0 }
 0x74a   :  { %6413 = vmatprep.subr.msk.bf16.mxu1 %vm230_vm3, %v7441_v50  ;;  %v7485_v50 = vld [vmem:[#allocation8 + $0xd0] sm:$0xff]  }
 0x750   :  { %7264 = vmatmul.mubr.msk.bf16.vlgmr.msra.gmra.mrb[24].mxu1 %vm286_vm5, %v503_v32 }
 0x751   :  { %1144 = vmatpush1.bf16.msra.mxu1 %v1059_v53  ;;  %1175 = vmatprep.mubr.bf16.mxu1 %v7973_v54  ;;  %v7488_v53 = vld [vmem:[#allocation8 + $0x58] sm:$0xff]  }
 0x752   :  { %6417 = vmatprep.subr.msk.bf16.mxu1 %vm230_vm3, %v7446_v56  ;;  %v7490_v56 = vld [vmem:[#allocation8 + $0xa0] sm:$0xff]  }
 0x813   :  { %v672_v10 = vpop.f32.mrb[12].mxu0 }
 0x814   :  { %v7247_v11 = vpop.f32.mrb[13].mxu0 }
 0x815   :  { %v675_v12 = vpop.f32.mrb[14].mxu0  ;;  %v1065_v11 = vsel %vm230_vm3, %v7448_v6, 0 }
 0x816   :  { %v7248_v13 = vpop.f32.mrb[15].mxu0  ;;  %v1071_v12 = vsel %vm230_vm3, %v7449_v7, 0 }
 0x817   :  { %v7450_v13 = vld [vmem:[#allocation7 + $0x40] ss:$156 sps:$4 sm:$0x3f]  }
 0x81b   :  { %v720_v14 = vpop.f32.mrb[20].mxu1 }
 0x81c   :  { %v726_v15 = vpack.c.bf16 %v720_v14, %v672_v10  ;;  %v7253_v16 = vpop.f32.mrb[21].mxu1  ;;  %v7452_v14 = vld [vmem:[#allocation7 + $0x48] ss:$156 sps:$4 sm:$0x3f]  }
 0x81d   :  { %v723_v17 = vpop.f32.mrb[22].mxu1  ;;  %v7455_v16 = vld [vmem:[#allocation7 + $0x44] ss:$156 sps:$4 sm:$0x3f]  }
 0x81e   :  { %v7254_v18 = vpop.f32.mrb[23].mxu1  ;;  %7258 = vmatmul.mubr.msk.bf16.vlgmr.msra.gmra.mrb[16].mxu0 %vm286_vm5, %v726_v15  ;;  %v7454_v15 = vld [vmem:[#allocation7 + $0x3c] ss:$156 sps:$4 sm:$0x3f]  }
 0x81f   :  { %1132 = vmatprep.mubr.bf16.mxu0 %v7973_v54  ;;  %v1077_v17 = vsel %vm230_vm3, %v7454_v15, 0  ;;  %v1083_v18 = vsel %vm230_vm3, %v7455_v16, 0 }
 0x823   :  { %v821_v19 = vpop.f32.mrb[24].mxu1 }
 0x824   :  { %v7265_v20 = vpop.f32.mrb[25].mxu1 }
 0x825   :  { %v824_v21 = vpop.f32.mrb[26].mxu1  ;;  %v7458_v20 = vld [vmem:[#allocation7 + $0x58] ss:$156 sps:$4 sm:$0x3f]  }
 0x826   :  { %v7266_v22 = vpop.f32.mrb[27].mxu1 }
 0x827   :  { %v7461_v22 = vld [vmem:[#allocation7 + $0x54] ss:$156 sps:$4 sm:$0x3f]  }
 0x8f1   :  { %v774_v23 = vpop.f32.mrb[16].mxu0 }
 0x8f2   :  { %v822_v25 = vadd.f32 %v821_v19, %v774_v23  ;;  %v7259_v26 = vpop.f32.mrb[17].mxu0  ;;  %v7456_v19 = vld [vmem:[#allocation7 + $0x50] ss:$156 sps:$4 sm:$0x3f]  }
 0x8f3   :  { %v777_v27 = vpop.f32.mrb[18].mxu0  ;;  %v7463_v26 = vld [vmem:[#allocation8 + $0xe8] sm:$0xff]  }
 0x8f4   :  { %v835_v28 = vadd.f32 %v6392_v24, %v822_v25  ;;  %v825_v31 = vadd.f32 %v824_v21, %v777_v27  ;;  %v7260_v32 = vpop.f32.mrb[19].mxu0  ;;  %v7460_v21 = vld [vmem:[#allocation7 + $0x4c] ss:$156 sps:$4 sm:$0x3f]   ;;  %v7462_v25 = vld [vmem:[#allocation8 + $0x68] sm:$0xff]  }
 0x8f5   :  { %v1089_v23 = vsel %vm230_vm3, %v7460_v21, 0  ;;  %v7464_v27 = vld [vmem:[#allocation8 + $0x28] sm:$0xff]   ;;  %v7467_v32 = vld [vmem:[#allocation8 + $0xf0] sm:$0xff]  }
 0x8f6   :  { %v836_v33 = vadd.f32 %v6392_v24, %v825_v31  ;;  %v837_v34 = vadd.f32 %v835_v28, %v8095_v29  ;;  %v1095_v24 = vsel %vm230_vm3, %v7461_v22, 0  ;;  %v7465_v28 = vld [vmem:[#allocation8 + $0xa8] sm:$0xff]   ;;  %v7466_v31 = vld [vmem:[#allocation8 + $0x70] sm:$0xff]  }
 0x8f8   :  { %v839_v35 = vsel %vm226_vm4, %v837_v34, 0.0  ;;  %v838_v36 = vadd.f32 %v836_v33, %v8097_v30  ;;  %v7440_v30 = vld [vmem:[#allocation7 + $0x1c] ss:$156 sps:$4 sm:$0x3f]   ;;  %v7468_v33 = vld [vmem:[#allocation8 + $0x30] sm:$0xff]  }
 0x8f9   :  { %840 = vadd.xlane.f32.xlu1 %v839_v35  ;;  %v1053_v52 = vsel %vm230_vm3, %v7440_v30, 0  ;;  %v7470_v35 = vld [vmem:[#allocation8 + $0x78] sm:$0xff]   ;;  %v7484_v30 = vld [vmem:[#allocation8 + $0x50] sm:$0xff]  }
 0x8fa   :  { %v842_v38 = vsel %vm226_vm4, %v838_v36, 0.0  ;;  %1101 = vmatpush1.bf16.msra.mxu0 %v1053_v52  ;;  %v7487_v52 = vld [vmem:[#allocation8 + $0x118] sm:$0xff]  }
 0x8fb   :  { %843 = vadd.xlane.f32.xlu0 %v842_v38  ;;  %6415 = vmatprep.subr.msk.bf16.mxu0 %vm230_vm3, %v7444_v55  ;;  %v7472_v38 = vld [vmem:[#allocation8 + $0x38] sm:$0xff]  }
 0x8fc   :  { %v7489_v55 = vld [vmem:[#allocation8 + $0xd8] sm:$0xff]  }
 0x986   :  { %v841_v39 = vpop.xlane.xlu1 %840 }
 0x987   :  { %v846_v41 = vmul.f32 0.083333336, %v841_v39  ;;  %v7473_v39 = vld [vmem:[#allocation8 + $0xb8] sm:$0xff]  }
 0x988   :  { %v844_v42 = vpop.xlane.xlu0 %843 }
 0x989   :  { %v848_v43 = vsub.f32 %v837_v34, %v846_v41  ;;  %v847_v44 = vmul.f32 0.083333336, %v844_v42  ;;  %v7469_v34 = vld [vmem:[#allocation8 + $0xb0] sm:$0xff]   ;;  %v7474_v41 = vld [vmem:[#allocation8 + $0x80] sm:$0xff]  }
 0x98a   :  { %v7475_v42 = vld [vmem:[#allocation8 + $0x100] sm:$0xff]  }
 0x98b   :  { %v849_v45 = vsub.f32 %v838_v36, %v847_v44  ;;  %v850_v46 = vmul.f32 %v848_v43, %v848_v43  ;;  %v7471_v36 = vld [vmem:[#allocation8 + $0xf8] sm:$0xff]   ;;  %v7477_v44 = vld [vmem:[#allocation8 + $0xc0] sm:$0xff]  }
 0x98d   :  { %v852_v47 = vsel %vm226_vm4, %v850_v46, 0.0  ;;  %v851_v48 = vmul.f32 %v849_v45, %v849_v45  ;;  %v7479_v46 = vld [vmem:[#allocation8 + $0x108] sm:$0xff]  }
 0x98e   :  { %853 = vadd.xlane.f32.xlu1 %v852_v47  ;;  %v7480_v47 = vld [vmem:[#allocation8 + $0x48] sm:$0xff]  }
 0x98f   :  { %v855_v29 = vsel %vm226_vm4, %v851_v48, 0.0  ;;  %v7481_v48 = vld [vmem:[#allocation8 + $0xc8] sm:$0xff]  }
 0x990   :  { %856 = vadd.xlane.f32.xlu0 %v855_v29  ;;  %v7482_v29 = vld [vmem:[#allocation8 + $0x90] sm:$0xff]  }
 0xa1b   :  { %v854_v57 = vpop.xlane.xlu1 %853 }
 0xa1c   :  { %v858_v37 = vmul.f32 0.083333336, %v854_v57  ;;  %v7491_v57 = vld [vmem:[#allocation8 + $0x120] sm:$0xff]  }
 0xa1d   :  { %v857_v58 = vpop.xlane.xlu0 %856 }
 0xa1e   :  { %v860_v59 = vadd.f32 1e-05, %v858_v37  ;;  %v859_v60 = vmul.f32 0.083333336, %v857_v58  ;;  %v7492_v37 = vld [vmem:[#allocation8 + $0x60] sm:$0xff]  }
 0xa1f   :  { %v7493_v58 = vld [vmem:[#allocation8 + $0xe0] sm:$0xff]  }
 0xa20   :  { %7763 = vrsqrt.f32 %v860_v59  ;;  %v861_v61 = vadd.f32 1e-05, %v859_v60  ;;  %v7494_v59 = vld [vmem:[#allocation8 + $0x168] sm:$0xff]  }
 0xa21   :  { %v7495_v60 = vld [vmem:[#allocation8 + $0x1e8] sm:$0xff]  }
 0xa22   :  { %7765 = vrsqrt.f32 %v861_v61  ;;  %v905_v61 = vlaneseq }
 0xa2a   :  { %v7764_v62 = vpop.eup %7763 }
 0xa2b   :  { %v864_v1 = vmul.f32 %v7764_v62, %v848_v43  ;;  %v7476_v43 = vld [vmem:[#allocation8 + $0x40] sm:$0xff]   ;;  %v906_v62 = vshrl.u32 %v905_v61, 7 }
 0xa2c   :  { %v7766_v2 = vpop.eup %7765 }
 0xa2d   :  { %v873_v40 = vmul.f32 %v6393_v63, %v864_v1  ;;  %v865_v3 = vmul.f32 %v7766_v2, %v849_v45  ;;  %v7478_v45 = vld [vmem:[#allocation8 + $0x88] sm:$0xff]   ;;  %v8227_v1 = vsub.s32 2, %v906_v62  ;;  %v8243_v15 = vsub.s32 7, %v906_v62 }
 0xa2e   :  { %v901_v2 = vld [vmem:[#allocation10 + $0x4] sm:$0xff] }
 0xa2f   :  { %v874_v5 = vmul.f32 %v6393_v63, %v865_v3  ;;  %v8195_v8 = vadd.f32 %v6394_v4, %v873_v40  ;;  %v8225_v63 = vsub.s32 0, %v906_v62  ;;  %v8229_v40 = vsub.s32 1, %v906_v62 }
 0xa30   :  { %v8231_v3 = vsub.s32 3, %v906_v62 }
 0xa31   :  { %v8197_v9 = vadd.f32 %v6394_v4, %v874_v5  ;;  %v908_v4 = vrot.slane %v901_v2, %v8225_v63  ;;  %v916_v5 = vrot.slane %v901_v2, %v8227_v1  ;;  %v912_v6 = vrot.slane %v901_v2, %v8229_v40 }
 0xa32   :  { %v920_v7 = vrot.slane %v901_v2, %v8231_v3 }
 0xa33   :  { %v900_v10 = vpack.c.bf16 %v8197_v9, %v8195_v8 }
 0xa35   :  { %6412 = vmatmul.mubr.msk.bf16.vlgmr.msra.gmra.mrb[20].mxu0 %vm226_vm4, %v900_v10  ;;  %6414 = vmatmul.mubr.msk.bf16.vlgmr.msra.gmra.mrb[28].mxu1 %vm226_vm4, %v900_v10 }
 0xa36   :  { %1187 = vmatpush1.bf16.msra.mxu0 %v1065_v11  ;;  %1230 = vmatpush1.bf16.msra.mxu1 %v1071_v12  ;;  %v8239_v11 = vsub.s32 6, %v906_v62 }
 0xa37   :  { %1218 = vmatprep.mubr.bf16.mxu0 %v7973_v54  ;;  %1261 = vmatprep.mubr.bf16.mxu1 %v7973_v54 }
 0xa38   :  { %6419 = vmatprep.subr.msk.bf16.mxu0 %vm230_vm3, %v7450_v13  ;;  %6421 = vmatprep.subr.msk.bf16.mxu1 %vm230_vm3, %v7452_v14  ;;  %v8241_v14 = vsub.s32 5, %v906_v62 }
 0xa3d   :  { %6416 = vmatmul.mubr.msk.bf16.vlgmr.msra.gmra.mrb[24].mxu0 %vm226_vm4, %v900_v10  ;;  %6418 = vmatmul.mubr.msk.bf16.vlgmr.msra.gmra.mrb[32].mxu1 %vm226_vm4, %v900_v10 }
 0xa3e   :  { %1273 = vmatpush1.bf16.msra.mxu0 %v1077_v17  ;;  %1316 = vmatpush1.bf16.msra.mxu1 %v1083_v18 }
 0xa3f   :  { %1304 = vmatprep.mubr.bf16.mxu0 %v7973_v54  ;;  %1347 = vmatprep.mubr.bf16.mxu1 %v7973_v54 }
 0xa40   :  { %6423 = vmatprep.subr.msk.bf16.mxu0 %vm230_vm3, %v7456_v19  ;;  %6425 = vmatprep.subr.msk.bf16.mxu1 %vm230_vm3, %v7458_v20 }
 0xa45   :  { %6420 = vmatmul.mubr.msk.bf16.vlgmr.msra.gmra.mrb[28].mxu0 %vm226_vm4, %v900_v10  ;;  %6422 = vmatmul.mubr.msk.bf16.vlgmr.msra.gmra.mrb[36].mxu1 %vm226_vm4, %v900_v10 }
 0xa46   :  { %1359 = vmatpush1.bf16.msra.mxu0 %v1089_v23  ;;  %1402 = vmatpush1.bf16.msra.mxu1 %v1095_v24 }
 0xa47   :  { %1390 = vmatprep.mubr.bf16.mxu0 %v7973_v54  ;;  %1433 = vmatprep.mubr.bf16.mxu1 %v7973_v54 }
 0xa48   :  { %6787 = vmatprep.subr.bf16.mxu0 %v7462_v25  ;;  %6809 = vmatprep.subr.bf16.mxu1 %v7463_v26 }
 0xa4d   :  { %6424 = vmatmul.mubr.msk.bf16.vlgmr.msra.gmra.mrb[32].mxu0 %vm226_vm4, %v900_v10  ;;  %6426 = vmatmul.mubr.msk.bf16.vlgmr.msra.gmra.mrb[40].mxu1 %vm226_vm4, %v900_v10  ;;  %v8237_v10 = vsub.s32 4, %v906_v62 }
 0xa4e   :  { %6788 = vmatpush3.bf16.msra.mxu0 %v7464_v27  ;;  %6810 = vmatpush3.bf16.msra.mxu1 %v7465_v28 }
 0xa4f   :  { %6789 = vmatprep.subr.bf16.mxu0 %v7466_v31  ;;  %6811 = vmatprep.subr.bf16.mxu1 %v7467_v32  ;;  %v924_v28 = vrot.slane %v901_v2, %v8237_v10  ;;  %v932_v31 = vrot.slane %v901_v2, %v8239_v11 }
 0xa52   :  { %6790 = vmatpush3.bf16.msra.mxu0 %v7468_v33  ;;  %6812 = vmatpush3.bf16.msra.mxu1 %v7469_v34  ;;  %v928_v34 = vrot.slane %v901_v2, %v8241_v14 }
 0xa53   :  { %6791 = vmatprep.subr.bf16.mxu0 %v7470_v35  ;;  %6813 = vmatprep.subr.bf16.mxu1 %v7471_v36  ;;  %v936_v35 = vrot.slane %v901_v2, %v8243_v15 }
 0xa56   :  { %6792 = vmatpush3.bf16.msra.mxu0 %v7472_v38  ;;  %6814 = vmatpush3.bf16.msra.mxu1 %v7473_v39 }
 0xa57   :  { %6793 = vmatprep.subr.bf16.mxu0 %v7474_v41  ;;  %6815 = vmatprep.subr.bf16.mxu1 %v7475_v42 }
 0xa5a   :  { %6794 = vmatpush3.bf16.msra.mxu0 %v7476_v43  ;;  %6816 = vmatpush3.bf16.msra.mxu1 %v7477_v44 }
 0xa5b   :  { %6795 = vmatprep.subr.bf16.mxu0 %v7478_v45  ;;  %6817 = vmatprep.subr.bf16.mxu1 %v7479_v46  ;;  %v8249_v46 = vld [vmem:[#allocation10 + $0xc] sm:$0xff] }
 0xa5e   :  { %6796 = vmatpush3.bf16.msra.mxu0 %v7480_v47  ;;  %6818 = vmatpush3.bf16.msra.mxu1 %v7481_v48 }
 0xa5f   :  { %6797 = vmatprep.subr.bf16.mxu0 %v7482_v29  ;;  %6819 = vmatprep.subr.bf16.mxu1 %v7483_v49 }
 0xa62   :  { %6798 = vmatpush3.bf16.msra.mxu0 %v7484_v30  ;;  %6820 = vmatpush3.bf16.msra.mxu1 %v7485_v50 }
 0xa63   :  { %6799 = vmatprep.subr.bf16.mxu0 %v7486_v51  ;;  %6821 = vmatprep.subr.bf16.mxu1 %v7487_v52  ;;  %v7496_v51 = vld [vmem:[#allocation8 + $0x128] sm:$0xff]  }
 0xa64   :  { %v7497_v52 = vld [vmem:[#allocation8 + $0x1a8] sm:$0xff]  }
 0xa66   :  { %6800 = vmatpush3.bf16.msra.mxu0 %v7488_v53  ;;  %6822 = vmatpush3.bf16.msra.mxu1 %v7489_v55 }
 0xa67   :  { %6801 = vmatprep.subr.bf16.mxu0 %v7490_v56  ;;  %6823 = vmatprep.subr.bf16.mxu1 %v7491_v57 }
 0xa6a   :  { %6802 = vmatpush3.bf16.msra.mxu0 %v7492_v37  ;;  %6824 = vmatpush3.bf16.msra.mxu1 %v7493_v58  ;;  %v7498_v37 = vld [vmem:[#allocation8 + $0x170] sm:$0xff]  }
 0xa6b   :  { %6831 = vmatprep.subr.bf16.mxu0 %v7494_v59  ;;  %6853 = vmatprep.subr.bf16.mxu1 %v7495_v60  ;;  %v7499_v58 = vld [vmem:[#allocation8 + $0x1f0] sm:$0xff]   ;;  %v940_v59 = vrot.slane %v8249_v46, %v8225_v63 }
 0xb08   :  { %v1134_v12 = vpop.f32.mrb[20].mxu0  ;;  %v1177_v13 = vpop.f32.mrb[28].mxu1 }
 0xb09   :  { %v1135_v16 = vadd.f32 %v1134_v12, %v908_v4  ;;  %v1178_v17 = vadd.f32 %v1177_v13, %v916_v5  ;;  %v1136_v18 = vpop.f32.mrb[21].mxu0  ;;  %v1179_v19 = vpop.f32.mrb[29].mxu1  ;;  %v944_v13 = vrot.slane %v8249_v46, %v8229_v40 }
 0xb0a   :  { %v1137_v20 = vadd.f32 %v1136_v18, %v912_v6  ;;  %v1180_v21 = vadd.f32 %v1179_v19, %v920_v7  ;;  %v1138_v22 = vpop.f32.mrb[22].mxu0  ;;  %v1181_v23 = vpop.f32.mrb[30].mxu1  ;;  %v7500_v18 = vld [vmem:[#allocation8 + $0x130] sm:$0xff]  }
 0xb0b   :  { %v1139_v24 = vadd.f32 %v1138_v22, %v908_v4  ;;  %v1182_v25 = vadd.f32 %v1181_v23, %v916_v5  ;;  %v1140_v26 = vpop.f32.mrb[23].mxu0  ;;  %v1183_v27 = vpop.f32.mrb[31].mxu1  ;;  %v1444_v36 = vmax.f32 %v1135_v16, 0.0  ;;  %v1446_v38 = vmax.f32 %v1178_v17, 0.0  ;;  %v7501_v19 = vld [vmem:[#allocation8 + $0x1b0] sm:$0xff]  }
 0xb0c   :  { %v1141_v32 = vadd.f32 %v1140_v26, %v912_v6  ;;  %v1184_v33 = vadd.f32 %v1183_v27, %v920_v7  ;;  %v1445_v42 = vmax.f32 %v1137_v20, 0.0  ;;  %v1447_v43 = vmax.f32 %v1180_v21, 0.0  ;;  %v7503_v26 = vld [vmem:[#allocation8 + $0x1f8] sm:$0xff]  }
 0xb0d   :  { %v1460_v39 = vmax.f32 %v1139_v24, 0.0  ;;  %v1462_v41 = vmax.f32 %v1182_v25, 0.0  ;;  %v948_v4 = vrot.slane %v8249_v46, %v8227_v1  ;;  %v952_v20 = vrot.slane %v8249_v46, %v8231_v3  ;;  %v7502_v25 = vld [vmem:[#allocation8 + $0x178] sm:$0xff]  }
 0xb0e   :  { %v1461_v44 = vmax.f32 %v1141_v32, 0.0  ;;  %v1463_v45 = vmax.f32 %v1184_v33, 0.0 }
 0xb0f   :  { %v1732_v47 = vpack.c.bf16 %v1460_v39, %v1444_v36  ;;  %v1734_v48 = vpack.c.bf16 %v1462_v41, %v1446_v38  ;;  %v7504_v41 = vld [vmem:[#allocation8 + $0x138] sm:$0xff]  }
 0xb10   :  { %v1733_v29 = vpack.c.bf16 %v1461_v44, %v1445_v42  ;;  %v1735_v49 = vpack.c.bf16 %v1463_v45, %v1447_v43  ;;  %v1220_v30 = vpop.f32.mrb[24].mxu0  ;;  %v1263_v50 = vpop.f32.mrb[32].mxu1  ;;  %v7505_v42 = vld [vmem:[#allocation8 + $0x1b8] sm:$0xff]  }
 0xb11   :  { %v1221_v53 = vadd.f32 %v1220_v30, %v924_v28  ;;  %v1264_v55 = vadd.f32 %v1263_v50, %v932_v31  ;;  %v1222_v56 = vpop.f32.mrb[25].mxu0  ;;  %v1265_v57 = vpop.f32.mrb[33].mxu1 }
 0xb12   :  { %v1223_v60 = vadd.f32 %v1222_v56, %v928_v34  ;;  %v1266_v61 = vadd.f32 %v1265_v57, %v936_v35  ;;  %v1224_v62 = vpop.f32.mrb[26].mxu0  ;;  %v1267_v2 = vpop.f32.mrb[34].mxu1  ;;  %2555 = vmatprep.mubr.bf16.mxu0 %v1733_v29  ;;  %2596 = vmatprep.mubr.bf16.mxu1 %v1735_v49  ;;  %v7507_v29 = vld [vmem:[#allocation8 + $0x200] sm:$0xff]  }
 0xb13   :  { %v1225_v5 = vadd.f32 %v1224_v62, %v924_v28  ;;  %v1268_v6 = vadd.f32 %v1267_v2, %v932_v31  ;;  %v1226_v7 = vpop.f32.mrb[27].mxu0  ;;  %v1269_v12 = vpop.f32.mrb[35].mxu1  ;;  %2556 = vmatmul.mubr.bf16.vlgmr.msra.gmra.mrb[36].mxu0 %v1732_v47  ;;  %2597 = vmatmul.mubr.bf16.vlgmr.msra.gmra.mrb[44].mxu1 %v1734_v48  ;;  %v1448_v21 = vmax.f32 %v1221_v53, 0.0  ;;  %v1450_v22 = vmax.f32 %v1264_v55, 0.0  ;;  %v7506_v48 = vld [vmem:[#allocation8 + $0x180] sm:$0xff]  }
 0xb14   :  { %v1227_v16 = vadd.f32 %v1226_v7, %v928_v34  ;;  %v1270_v17 = vadd.f32 %v1269_v12, %v936_v35  ;;  %6832 = vmatpush3.bf16.msra.mxu0 %v7496_v51  ;;  %6854 = vmatpush3.bf16.msra.mxu1 %v7497_v52  ;;  %v1449_v27 = vmax.f32 %v1223_v60, 0.0  ;;  %v1451_v28 = vmax.f32 %v1266_v61, 0.0  ;;  %v7508_v62 = vld [vmem:[#allocation8 + $0x140] sm:$0xff]   ;;  %v7510_v12 = vld [vmem:[#allocation8 + $0x188] sm:$0xff]  }
 0xb15   :  { %v1464_v23 = vmax.f32 %v1225_v5, 0.0  ;;  %v1466_v24 = vmax.f32 %v1268_v6, 0.0  ;;  %6833 = vmatprep.subr.bf16.mxu0 %v7498_v37  ;;  %6855 = vmatprep.subr.bf16.mxu1 %v7499_v58  ;;  %v956_v52 = vrot.slane %v8249_v46, %v8237_v10  ;;  %v964_v37 = vrot.slane %v8249_v46, %v8239_v11  ;;  %v7509_v2 = vld [vmem:[#allocation8 + $0x1c0] sm:$0xff]  }
 0xb16   :  { %v1465_v31 = vmax.f32 %v1227_v16, 0.0  ;;  %v1467_v32 = vmax.f32 %v1270_v17, 0.0  ;;  %v960_v58 = vrot.slane %v8249_v46, %v8241_v14  ;;  %v968_v5 = vrot.slane %v8249_v46, %v8243_v15  ;;  %v7511_v16 = vld [vmem:[#allocation8 + $0x208] sm:$0xff]  }
 0xb17   :  { %v8259_v33 = vpack.c.bf16 %v1464_v23, %v1448_v21  ;;  %v8261_v34 = vpack.c.bf16 %v1466_v24, %v1450_v22 }
 0xb18   :  { %v1737_v35 = vpack.c.bf16 %v1465_v31, %v1449_v27  ;;  %v1739_v36 = vpack.c.bf16 %v1467_v32, %v1451_v28  ;;  %6834 = vmatpush3.bf16.msra.mxu0 %v7500_v18  ;;  %6856 = vmatpush3.bf16.msra.mxu1 %v7501_v19  ;;  %v1306_v38 = vpop.f32.mrb[28].mxu0  ;;  %v1349_v39 = vpop.f32.mrb[36].mxu1 }
 0xb19   :  { %v1307_v43 = vadd.f32 %v1306_v38, %v940_v59  ;;  %v1350_v44 = vadd.f32 %v1349_v39, %v948_v4  ;;  %v1308_v45 = vpop.f32.mrb[29].mxu0  ;;  %v1351_v47 = vpop.f32.mrb[37].mxu1  ;;  %6835 = vmatprep.subr.bf16.mxu0 %v7502_v25  ;;  %6857 = vmatprep.subr.bf16.mxu1 %v7503_v26  ;;  %v7512_v25 = vld [vmem:[#allocation8 + $0x148] sm:$0xff]  }
 0xb1a   :  { %v1309_v49 = vadd.f32 %v1308_v45, %v944_v13  ;;  %v1352_v30 = vadd.f32 %v1351_v47, %v952_v20  ;;  %v1310_v50 = vpop.f32.mrb[30].mxu0  ;;  %v1353_v51 = vpop.f32.mrb[38].mxu1  ;;  %2637 = vmatprep.mubr.bf16.mxu0 %v1737_v35  ;;  %2678 = vmatprep.mubr.bf16.mxu1 %v1739_v36  ;;  %v7513_v26 = vld [vmem:[#allocation8 + $0x1c8] sm:$0xff]   ;;  %v7514_v35 = vld [vmem:[#allocation8 + $0x190] sm:$0xff]  }
 0xb1b   :  { %v1311_v53 = vadd.f32 %v1310_v50, %v940_v59  ;;  %v1354_v55 = vadd.f32 %v1353_v51, %v948_v4  ;;  %v1312_v56 = vpop.f32.mrb[31].mxu0  ;;  %v1355_v57 = vpop.f32.mrb[39].mxu1  ;;  %v1452_v6 = vmax.f32 %v1307_v43, 0.0  ;;  %v1454_v59 = vmax.f32 %v1350_v44, 0.0  ;;  %v7515_v36 = vld [vmem:[#allocation8 + $0x210] sm:$0xff]  }
 0xb1c   :  { %v1313_v60 = vadd.f32 %v1312_v56, %v944_v13  ;;  %v1356_v61 = vadd.f32 %v1355_v57, %v952_v20  ;;  %6836 = vmatpush3.bf16.msra.mxu0 %v7504_v41  ;;  %6858 = vmatpush3.bf16.msra.mxu1 %v7505_v42  ;;  %v1453_v17 = vmax.f32 %v1309_v49, 0.0  ;;  %v1455_v18 = vmax.f32 %v1352_v30, 0.0  ;;  %v7516_v49 = vld [vmem:[#allocation8 + $0x150] sm:$0xff]   ;;  %v7518_v56 = vld [vmem:[#allocation8 + $0x198] sm:$0xff]  }
 0xb1d   :  { %v1468_v4 = vmax.f32 %v1311_v53, 0.0  ;;  %v1470_v7 = vmax.f32 %v1354_v55, 0.0  ;;  %6837 = vmatprep.subr.bf16.mxu0 %v7506_v48  ;;  %6859 = vmatprep.subr.bf16.mxu1 %v7507_v29  ;;  %v7517_v30 = vld [vmem:[#allocation8 + $0x1d0] sm:$0xff]   ;;  %v7519_v57 = vld [vmem:[#allocation8 + $0x218] sm:$0xff]  }
 0xb1e   :  { %v1469_v19 = vmax.f32 %v1313_v60, 0.0  ;;  %v1471_v13 = vmax.f32 %v1356_v61, 0.0 }
 0xb1f   :  { %v8271_v20 = vpack.c.bf16 %v1468_v4, %v1452_v6  ;;  %v8273_v21 = vpack.c.bf16 %v1470_v7, %v1454_v59  ;;  %v7520_v6 = vld [vmem:[#allocation8 + $0x158] sm:$0xff]   ;;  %v7522_v4 = vld [vmem:[#allocation8 + $0x1a0] sm:$0xff]  }
 0xb20   :  { %v8275_v22 = vpack.c.bf16 %v1469_v19, %v1453_v17  ;;  %v8277_v23 = vpack.c.bf16 %v1471_v13, %v1455_v18  ;;  %6838 = vmatpush3.bf16.msra.mxu0 %v7508_v62  ;;  %6860 = vmatpush3.bf16.msra.mxu1 %v7509_v2  ;;  %v1392_v46 = vpop.f32.mrb[32].mxu0  ;;  %v1435_v24 = vpop.f32.mrb[40].mxu1  ;;  %v7521_v59 = vld [vmem:[#allocation8 + $0x1d8] sm:$0xff]   ;;  %v7523_v7 = vld [vmem:[#allocation8 + $0x220] sm:$0xff]   ;;  %v7526_v17 = vld [vmem:[#allocation8 + $0x268] sm:$0xff]  }
 0xb21   :  { %v1393_v27 = vadd.f32 %v1392_v46, %v956_v52  ;;  %v1436_v28 = vadd.f32 %v1435_v24, %v964_v37  ;;  %v1394_v31 = vpop.f32.mrb[33].mxu0  ;;  %v1437_v32 = vpop.f32.mrb[41].mxu1  ;;  %6839 = vmatprep.subr.bf16.mxu0 %v7510_v12  ;;  %6861 = vmatprep.subr.bf16.mxu1 %v7511_v16  ;;  %v7524_v12 = vld [vmem:[#allocation8 + $0x160] sm:$0xff]   ;;  %v7527_v18 = vld [vmem:[#allocation8 + $0x2e8] sm:$0xff]   ;;  %v7530_v46 = vld [vmem:[#allocation8 + $0x270] sm:$0xff]  }
 0xb22   :  { %v1395_v38 = vadd.f32 %v1394_v31, %v960_v58  ;;  %v1438_v39 = vadd.f32 %v1437_v32, %v968_v5  ;;  %v1396_v41 = vpop.f32.mrb[34].mxu0  ;;  %v1439_v42 = vpop.f32.mrb[42].mxu1  ;;  %v7525_v16 = vld [vmem:[#allocation8 + $0x1e0] sm:$0xff]   ;;  %v7528_v19 = vld [vmem:[#allocation8 + $0x228] sm:$0xff]   ;;  %v7531_v24 = vld [vmem:[#allocation8 + $0x2f0] sm:$0xff]  }
 0xb23   :  { %v1397_v43 = vadd.f32 %v1396_v41, %v956_v52  ;;  %v1440_v44 = vadd.f32 %v1439_v42, %v964_v37  ;;  %v1398_v45 = vpop.f32.mrb[35].mxu0  ;;  %v1441_v47 = vpop.f32.mrb[43].mxu1  ;;  %v1456_v50 = vmax.f32 %v1393_v27, 0.0  ;;  %v1458_v51 = vmax.f32 %v1436_v28, 0.0  ;;  %v7529_v13 = vld [vmem:[#allocation8 + $0x2a8] sm:$0xff]   ;;  %v7534_v27 = vld [vmem:[#allocation8 + $0x278] sm:$0xff]  }
 0xb24   :  { %v1399_v48 = vadd.f32 %v1398_v45, %v960_v58  ;;  %v1442_v29 = vadd.f32 %v1441_v47, %v968_v5  ;;  %6840 = vmatpush3.bf16.msra.mxu0 %v7512_v25  ;;  %6862 = vmatpush3.bf16.msra.mxu1 %v7513_v26  ;;  %v1457_v60 = vmax.f32 %v1395_v38, 0.0  ;;  %v1459_v61 = vmax.f32 %v1438_v39, 0.0  ;;  %v7532_v25 = vld [vmem:[#allocation8 + $0x230] sm:$0xff]   ;;  %v7535_v28 = vld [vmem:[#allocation8 + $0x2f8] sm:$0xff]   ;;  %v7544_v38 = vld [vmem:[#allocation8 + $0x248] sm:$0xff]  }
 0xb25   :  { %v1472_v53 = vmax.f32 %v1397_v43, 0.0  ;;  %v1474_v55 = vmax.f32 %v1440_v44, 0.0  ;;  %6841 = vmatprep.subr.bf16.mxu0 %v7514_v35  ;;  %6863 = vmatprep.subr.bf16.mxu1 %v7515_v36  ;;  %v7533_v26 = vld [vmem:[#allocation8 + $0x2b0] sm:$0xff]   ;;  %v7536_v31 = vld [vmem:[#allocation8 + $0x238] sm:$0xff]   ;;  %v7540_v35 = vld [vmem:[#allocation8 + $0x240] sm:$0xff]  }
 0xb26   :  { %v1473_v52 = vmax.f32 %v1399_v48, 0.0  ;;  %v1475_v37 = vmax.f32 %v1442_v29, 0.0  ;;  %v7537_v32 = vld [vmem:[#allocation8 + $0x2b8] sm:$0xff]   ;;  %v7542_v36 = vld [vmem:[#allocation8 + $0x288] sm:$0xff]   ;;  %v7546_v41 = vld [vmem:[#allocation8 + $0x290] sm:$0xff]  }
 0xb27   :  { %v8279_v62 = vpack.c.bf16 %v1472_v53, %v1456_v50  ;;  %v8281_v58 = vpack.c.bf16 %v1474_v55, %v1458_v51  ;;  %v7545_v39 = vld [vmem:[#allocation8 + $0x2c8] sm:$0xff]   ;;  %v7547_v42 = vld [vmem:[#allocation8 + $0x310] sm:$0xff]   ;;  %v7550_v45 = vld [vmem:[#allocation8 + $0x298] sm:$0xff]  }
 0xb28   :  { %v8283_v2 = vpack.c.bf16 %v1473_v52, %v1457_v60  ;;  %v8285_v5 = vpack.c.bf16 %v1475_v37, %v1459_v61  ;;  %6842 = vmatpush3.bf16.msra.mxu0 %v7516_v49  ;;  %6864 = vmatpush3.bf16.msra.mxu1 %v7517_v30  ;;  %v7548_v43 = vld [vmem:[#allocation8 + $0x250] sm:$0xff]   ;;  %v7551_v47 = vld [vmem:[#allocation8 + $0x318] sm:$0xff]   ;;  %v7554_v49 = vld [vmem:[#allocation8 + $0x2a0] sm:$0xff]  }
 0xb29   :  { %6843 = vmatprep.subr.bf16.mxu0 %v7518_v56  ;;  %6865 = vmatprep.subr.bf16.mxu1 %v7519_v57  ;;  %v7549_v44 = vld [vmem:[#allocation8 + $0x2d0] sm:$0xff]   ;;  %v7552_v48 = vld [vmem:[#allocation8 + $0x258] sm:$0xff]   ;;  %v7555_v30 = vld [vmem:[#allocation8 + $0x320] sm:$0xff]  }
 0xb2a   :  { %v7553_v29 = vld [vmem:[#allocation8 + $0x2d8] sm:$0xff]   ;;  %v7556_v50 = vld [vmem:[#allocation8 + $0x260] sm:$0xff]   ;;  %v7558_v53 = vld [vmem:[#allocation8 + $0x368] sm:$0xff]  }
 0xb2b   :  { %v7557_v51 = vld [vmem:[#allocation8 + $0x2e0] sm:$0xff]   ;;  %v7559_v55 = vld [vmem:[#allocation8 + $0x3e8] sm:$0xff]   ;;  %v7562_v60 = vld [vmem:[#allocation8 + $0x370] sm:$0xff]  }
 0xb2c   :  { %6844 = vmatpush3.bf16.msra.mxu0 %v7520_v6  ;;  %6866 = vmatpush3.bf16.msra.mxu1 %v7521_v59  ;;  %v7560_v56 = vld [vmem:[#allocation8 + $0x328] sm:$0xff]   ;;  %v7563_v61 = vld [vmem:[#allocation8 + $0x3f0] sm:$0xff]   ;;  %v7566_v6 = vld [vmem:[#allocation8 + $0x378] sm:$0xff]  }
 0xb2d   :  { %6845 = vmatprep.subr.bf16.mxu0 %v7522_v4  ;;  %6867 = vmatprep.subr.bf16.mxu1 %v7523_v7  ;;  %v7561_v57 = vld [vmem:[#allocation8 + $0x3a8] sm:$0xff]   ;;  %v7564_v52 = vld [vmem:[#allocation8 + $0x330] sm:$0xff]   ;;  %v7567_v59 = vld [vmem:[#allocation8 + $0x3f8] sm:$0xff]  }
 0xb2e   :  { %v7565_v37 = vld [vmem:[#allocation8 + $0x3b0] sm:$0xff]   ;;  %v7568_v4 = vld [vmem:[#allocation8 + $0x338] sm:$0xff]   ;;  %v7570_v7 = vld [vmem:[#allocation8 + $0x380] sm:$0xff]  }
 0xb30   :  { %6846 = vmatpush3.bf16.msra.mxu0 %v7524_v12  ;;  %6868 = vmatpush3.bf16.msra.mxu1 %v7525_v16  ;;  %v7572_v12 = vld [vmem:[#allocation8 + $0x340] sm:$0xff]   ;;  %v7574_v16 = vld [vmem:[#allocation8 + $0x388] sm:$0xff]  }
 0xb31   :  { %6875 = vmatprep.subr.bf16.mxu0 %v7526_v17  ;;  %6897 = vmatprep.subr.bf16.mxu1 %v7527_v18  ;;  %v7575_v17 = vld [vmem:[#allocation8 + $0x408] sm:$0xff]  }
 0xb32   :  { %v7577_v18 = vld [vmem:[#allocation8 + $0x3c8] sm:$0xff]  }
 0xb33   :  { %2638 = vmatmul.mubr.bf16.vlgmr.msra.gmra.mrb[40].mxu0 %v8259_v33  ;;  %2679 = vmatmul.mubr.bf16.vlgmr.msra.gmra.mrb[48].mxu1 %v8261_v34  ;;  %v7538_v33 = vld [vmem:[#allocation8 + $0x280] sm:$0xff]  }
 0xb34   :  { %6876 = vmatpush3.bf16.msra.mxu0 %v7528_v19  ;;  %2719 = vmatprep.mubr.bf16.mxu0 %v8275_v22  ;;  %v7539_v34 = vld [vmem:[#allocation8 + $0x300] sm:$0xff]   ;;  %v7578_v19 = vld [vmem:[#allocation8 + $0x390] sm:$0xff]  }
 0xb35   :  { %6898 = vmatpush3.bf16.msra.mxu1 %v7529_v13  ;;  %2760 = vmatprep.mubr.bf16.mxu1 %v8277_v23  ;;  %v7541_v22 = vld [vmem:[#allocation8 + $0x2c0] sm:$0xff]   ;;  %v7543_v23 = vld [vmem:[#allocation8 + $0x308] sm:$0xff]   ;;  %v7579_v13 = vld [vmem:[#allocation8 + $0x410] sm:$0xff]  }
 0xb36   :  { %6877 = vmatprep.subr.bf16.mxu0 %v7530_v46  ;;  %6899 = vmatprep.subr.bf16.mxu1 %v7531_v24  ;;  %v7580_v46 = vld [vmem:[#allocation8 + $0x350] sm:$0xff]  }
 0xb37   :  { %v7581_v24 = vld [vmem:[#allocation8 + $0x3d0] sm:$0xff]  }
 0xb38   :  { %6878 = vmatpush3.bf16.msra.mxu0 %v7532_v25  ;;  %v7582_v25 = vld [vmem:[#allocation8 + $0x398] sm:$0xff]  }
 0xb39   :  { %6900 = vmatpush3.bf16.msra.mxu1 %v7533_v26  ;;  %6879 = vmatprep.subr.bf16.mxu0 %v7534_v27  ;;  %v7583_v26 = vld [vmem:[#allocation8 + $0x418] sm:$0xff]  }
 0xb3a   :  { %6901 = vmatprep.subr.bf16.mxu1 %v7535_v28  ;;  %v7584_v27 = vld [vmem:[#allocation8 + $0x358] sm:$0xff]  }
 0xb3b   :  { %v7585_v28 = vld [vmem:[#allocation8 + $0x3d8] sm:$0xff]  }
 0xb3c   :  { %6880 = vmatpush3.bf16.msra.mxu0 %v7536_v31  ;;  %v7586_v31 = vld [vmem:[#allocation8 + $0x3a0] sm:$0xff]  }
 0xb3d   :  { %6902 = vmatpush3.bf16.msra.mxu1 %v7537_v32  ;;  %6881 = vmatprep.subr.bf16.mxu0 %v7538_v33  ;;  %v7587_v32 = vld [vmem:[#allocation8 + $0x420] sm:$0xff]  }
 0xb3e   :  { %6903 = vmatprep.subr.bf16.mxu1 %v7539_v34  ;;  %v7588_v33 = vld [vmem:[#allocation8 + $0x360] sm:$0xff]  }
 0xb3f   :  { %v7589_v34 = vld [vmem:[#allocation8 + $0x3e0] sm:$0xff]  }
 0xb40   :  { %6882 = vmatpush3.bf16.msra.mxu0 %v7540_v35 }
 0xb41   :  { %6904 = vmatpush3.bf16.msra.mxu1 %v7541_v22  ;;  %6883 = vmatprep.subr.bf16.mxu0 %v7542_v36  ;;  %v6427_v36 = vld [vmem:[#allocation10 + $0x14] ss:$0 sm:$0xff] }
 0xb42   :  { %6905 = vmatprep.subr.bf16.mxu1 %v7543_v23 }
 0xb44   :  { %6884 = vmatpush3.bf16.msra.mxu0 %v7544_v38 }
 0xb45   :  { %6906 = vmatpush3.bf16.msra.mxu1 %v7545_v39  ;;  %6885 = vmatprep.subr.bf16.mxu0 %v7546_v41 }
 0xb46   :  { %6907 = vmatprep.subr.bf16.mxu1 %v7547_v42 }
 0xb48   :  { %6886 = vmatpush3.bf16.msra.mxu0 %v7548_v43 }
 0xb49   :  { %6908 = vmatpush3.bf16.msra.mxu1 %v7549_v44  ;;  %6887 = vmatprep.subr.bf16.mxu0 %v7550_v45 }
 0xb4a   :  { %6909 = vmatprep.subr.bf16.mxu1 %v7551_v47 }
 0xb4c   :  { %6888 = vmatpush3.bf16.msra.mxu0 %v7552_v48 }
 0xb4d   :  { %6910 = vmatpush3.bf16.msra.mxu1 %v7553_v29  ;;  %6889 = vmatprep.subr.bf16.mxu0 %v7554_v49 }
 0xb4e   :  { %6911 = vmatprep.subr.bf16.mxu1 %v7555_v30 }
 0xb50   :  { %6890 = vmatpush3.bf16.msra.mxu0 %v7556_v50 }
 0xb51   :  { %6912 = vmatpush3.bf16.msra.mxu1 %v7557_v51  ;;  %6919 = vmatprep.subr.bf16.mxu0 %v7558_v53 }
 0xb52   :  { %6941 = vmatprep.subr.bf16.mxu1 %v7559_v55 }
 0xb53   :  { %2720 = vmatmul.mubr.bf16.vlgmr.msra.gmra.mrb[44].mxu0 %v8271_v20  ;;  %v7569_v20 = vld [vmem:[#allocation8 + $0x3b8] sm:$0xff]  }
 0xb54   :  { %2761 = vmatmul.mubr.bf16.vlgmr.msra.gmra.mrb[52].mxu1 %v8273_v21  ;;  %6920 = vmatpush3.bf16.msra.mxu0 %v7560_v56  ;;  %v7571_v21 = vld [vmem:[#allocation8 + $0x400] sm:$0xff]  }
 0xb55   :  { %2801 = vmatprep.mubr.bf16.mxu0 %v8283_v2  ;;  %6942 = vmatpush3.bf16.msra.mxu1 %v7561_v57  ;;  %v7573_v2 = vld [vmem:[#allocation8 + $0x3c0] sm:$0xff]  }
 0xb56   :  { %2842 = vmatprep.mubr.bf16.mxu1 %v8285_v5  ;;  %6921 = vmatprep.subr.bf16.mxu0 %v7562_v60  ;;  %v7576_v5 = vld [vmem:[#allocation8 + $0x348] sm:$0xff]  }
 0xb57   :  { %6943 = vmatprep.subr.bf16.mxu1 %v7563_v61 }
 0xb58   :  { %6922 = vmatpush3.bf16.msra.mxu0 %v7564_v52 }
 0xb59   :  { %6944 = vmatpush3.bf16.msra.mxu1 %v7565_v37  ;;  %6923 = vmatprep.subr.bf16.mxu0 %v7566_v6 }
 0xb5a   :  { %6945 = vmatprep.subr.bf16.mxu1 %v7567_v59 }
 0xb5c   :  { %6924 = vmatpush3.bf16.msra.mxu0 %v7568_v4 }
 0xb5d   :  { %6946 = vmatpush3.bf16.msra.mxu1 %v7569_v20  ;;  %6925 = vmatprep.subr.bf16.mxu0 %v7570_v7 }
 0xb5e   :  { %6947 = vmatprep.subr.bf16.mxu1 %v7571_v21 }
 0xb60   :  { %6926 = vmatpush3.bf16.msra.mxu0 %v7572_v12 }
 0xb61   :  { %6948 = vmatpush3.bf16.msra.mxu1 %v7573_v2  ;;  %6927 = vmatprep.subr.bf16.mxu0 %v7574_v16 }
 0xb62   :  { %6949 = vmatprep.subr.bf16.mxu1 %v7575_v17 }
 0xb64   :  { %6928 = vmatpush3.bf16.msra.mxu0 %v7576_v5 }
 0xb65   :  { %6950 = vmatpush3.bf16.msra.mxu1 %v7577_v18  ;;  %6929 = vmatprep.subr.bf16.mxu0 %v7578_v19 }
 0xb66   :  { %6951 = vmatprep.subr.bf16.mxu1 %v7579_v13 }
 0xb68   :  { %6930 = vmatpush3.bf16.msra.mxu0 %v7580_v46 }
 0xb69   :  { %6952 = vmatpush3.bf16.msra.mxu1 %v7581_v24  ;;  %6931 = vmatprep.subr.bf16.mxu0 %v7582_v25 }
 0xb6a   :  { %6953 = vmatprep.subr.bf16.mxu1 %v7583_v26 }
 0xb6c   :  { %6932 = vmatpush3.bf16.msra.mxu0 %v7584_v27 }
 0xb6d   :  { %6954 = vmatpush3.bf16.msra.mxu1 %v7585_v28  ;;  %6933 = vmatprep.subr.bf16.mxu0 %v7586_v31 }
 0xb6e   :  { %6955 = vmatprep.subr.bf16.mxu1 %v7587_v32 }
 0xb70   :  { %6934 = vmatpush3.bf16.msra.mxu0 %v7588_v33 }
 0xb71   :  { %6956 = vmatpush3.bf16.msra.mxu1 %v7589_v34  ;;  %7267 = vmatprep.subr.bf16.mxu0 %v7966_v0 }
 0xb72   :  { %7273 = vmatprep.subr.bf16.mxu1 %v7966_v0 }
 0xb73   :  { %2802 = vmatmul.mubr.bf16.vlgmr.msra.gmra.mrb[48].mxu0 %v8279_v62 }
 0xb74   :  { %2843 = vmatmul.mubr.bf16.vlgmr.msra.gmra.mrb[56].mxu1 %v8281_v58  ;;  %7269 = vmatprep.mubr.msk.bf16.mxu0 %vm7967_vm0, %v7966_v0 }
 0xb75   :  { %7275 = vmatprep.mubr.msk.bf16.mxu1 %vm7967_vm0, %v7966_v0 }
 0xbe6   :  { %v6803_v35 = vpop.f32.mrb[36].mxu0  ;;  %v6825_v22 = vpop.f32.mrb[44].mxu1 }
 0xbe7   :  { %v6804_v23 = vpop.f32.mrb[37].mxu0  ;;  %v6826_v38 = vpop.f32.mrb[45].mxu1 }
 0xbe8   :  { %v6805_v39 = vadd.f32 %v6804_v23, %v6803_v35  ;;  %v6827_v41 = vadd.f32 %v6826_v38, %v6825_v22  ;;  %v6806_v42 = vpop.f32.mrb[38].mxu0  ;;  %v6828_v43 = vpop.f32.mrb[46].mxu1 }
 0xbe9   :  { %v6807_v44 = vpop.f32.mrb[39].mxu0  ;;  %v6829_v45 = vpop.f32.mrb[47].mxu1 }
 0xbea   :  { %v2558_v62 = vadd.f32 %v6805_v39, %v6427_v36  ;;  %v6808_v47 = vadd.f32 %v6807_v44, %v6806_v42  ;;  %v6830_v58 = vadd.f32 %v6829_v45, %v6828_v43 }
 0xbec   :  { %v2599_v48 = vadd.f32 %v6827_v41, %v2558_v62  ;;  %v2561_v29 = vadd.f32 %v6808_v47, %v6427_v36 }
 0xbee   :  { %v2602_v49 = vadd.f32 %v6830_v58, %v2561_v29 }
 0xc06   :  { %v6847_v30 = vpop.f32.mrb[40].mxu0  ;;  %v6869_v50 = vpop.f32.mrb[48].mxu1 }
 0xc07   :  { %v6848_v51 = vpop.f32.mrb[41].mxu0  ;;  %v6870_v53 = vpop.f32.mrb[49].mxu1 }
 0xc08   :  { %v6849_v55 = vadd.f32 %v6848_v51, %v6847_v30  ;;  %v6871_v56 = vadd.f32 %v6870_v53, %v6869_v50  ;;  %v6850_v57 = vpop.f32.mrb[42].mxu0  ;;  %v6872_v60 = vpop.f32.mrb[50].mxu1 }
 0xc09   :  { %v6851_v61 = vpop.f32.mrb[43].mxu0  ;;  %v6873_v52 = vpop.f32.mrb[51].mxu1 }
 0xc0a   :  { %v2640_v37 = vadd.f32 %v6849_v55, %v2599_v48  ;;  %v6852_v6 = vadd.f32 %v6851_v61, %v6850_v57  ;;  %v6874_v59 = vadd.f32 %v6873_v52, %v6872_v60  ;;  %v7590_v52 = vld [vmem:[#allocation7 + $0x8] ss:$156 sps:$4 sm:$0x3f]  }
 0xc0c   :  { %v2681_v4 = vadd.f32 %v6871_v56, %v2640_v37  ;;  %v2643_v20 = vadd.f32 %v6852_v6, %v2602_v49 }
 0xc0e   :  { %v2684_v7 = vadd.f32 %v6874_v59, %v2643_v20 }
 0xc26   :  { %v6891_v21 = vpop.f32.mrb[44].mxu0 }
 0xc27   :  { %v6913_v12 = vpop.f32.mrb[52].mxu1  ;;  %v6892_v2 = vpop.f32.mrb[45].mxu0 }
 0xc28   :  { %v6893_v16 = vadd.f32 %v6892_v2, %v6891_v21  ;;  %v6914_v17 = vpop.f32.mrb[53].mxu1  ;;  %v6894_v5 = vpop.f32.mrb[46].mxu0 }
 0xc29   :  { %v6915_v18 = vadd.f32 %v6914_v17, %v6913_v12  ;;  %v6916_v19 = vpop.f32.mrb[54].mxu1  ;;  %v6895_v13 = vpop.f32.mrb[47].mxu0  ;;  %v6556_v12 = vld [vmem:[#allocation10 + $0x15] ss:$0 sm:$0xff] }
 0xc2a   :  { %v2722_v46 = vadd.f32 %v6893_v16, %v2681_v4  ;;  %v6896_v24 = vadd.f32 %v6895_v13, %v6894_v5  ;;  %v6917_v25 = vpop.f32.mrb[55].mxu1 }
 0xc2b   :  { %v6918_v26 = vadd.f32 %v6917_v25, %v6916_v19  ;;  %v6558_v25 = vld [vmem:[#allocation10 + $0x17] ss:$0 sm:$0xff] }
 0xc2c   :  { %v2763_v27 = vadd.f32 %v6915_v18, %v2722_v46  ;;  %v2725_v28 = vadd.f32 %v6896_v24, %v2684_v7  ;;  %v6557_v18 = vld [vmem:[#allocation10 + $0x16] ss:$0 sm:$0xff] }
 0xc2e   :  { %v2766_v31 = vadd.f32 %v6918_v26, %v2725_v28 }
 0xc46   :  { %v6935_v32 = vpop.f32.mrb[48].mxu0 }
 0xc47   :  { %v6957_v33 = vpop.f32.mrb[56].mxu1  ;;  %v6936_v34 = vpop.f32.mrb[49].mxu0 }
 0xc48   :  { %v6937_v35 = vadd.f32 %v6936_v34, %v6935_v32  ;;  %v6958_v22 = vpop.f32.mrb[57].mxu1  ;;  %v6938_v36 = vpop.f32.mrb[50].mxu0 }
 0xc49   :  { %v6959_v23 = vadd.f32 %v6958_v22, %v6957_v33  ;;  %v6960_v38 = vpop.f32.mrb[58].mxu1  ;;  %v6939_v39 = vpop.f32.mrb[51].mxu0 }
 0xc4a   :  { %v2804_v41 = vadd.f32 %v6937_v35, %v2763_v27  ;;  %v6940_v42 = vadd.f32 %v6939_v39, %v6938_v36  ;;  %v6961_v43 = vpop.f32.mrb[59].mxu1 }
 0xc4b   :  { %v6962_v44 = vadd.f32 %v6961_v43, %v6960_v38 }
 0xc4c   :  { %v2845_v45 = vadd.f32 %v6959_v23, %v2804_v41  ;;  %v2807_v62 = vadd.f32 %v6940_v42, %v2766_v31 }
 0xc4e   :  { %v2848_v47 = vadd.f32 %v6962_v44, %v2807_v62  ;;  %v2851_v58 = vadd.f32 %v2845_v45, %v8195_v8 }
 0xc50   :  { %v2853_v48 = vsel %vm226_vm4, %v2851_v58, 0.0  ;;  %v2852_v29 = vadd.f32 %v2848_v47, %v8197_v9  ;;  %v2916_v9 = vsel %vm230_vm3, %v7590_v52, 0 }
 0xc51   :  { %2854 = vadd.xlane.f32.xlu1 %v2853_v48  ;;  %7268 = vmatpush3.bf16.msra.mxu0 %v2916_v9 }
 0xc52   :  { %v2856_v49 = vsel %vm226_vm4, %v2852_v29, 0.0  ;;  %7279 = vmatprep.subr.bf16.mxu0 %v7966_v0 }
 0xc53   :  { %2857 = vadd.xlane.f32.xlu0 %v2856_v49 }
 0xcde   :  { %v2855_v30 = vpop.xlane.xlu1 %2854 }
 0xcdf   :  { %v2859_v50 = vmul.f32 0.083333336, %v2855_v30 }
 0xce0   :  { %v2858_v51 = vpop.xlane.xlu0 %2857 }
 0xce1   :  { %v2861_v53 = vsub.f32 %v2851_v58, %v2859_v50  ;;  %v2860_v55 = vmul.f32 0.083333336, %v2858_v51 }
 0xce3   :  { %v2862_v56 = vsub.f32 %v2852_v29, %v2860_v55  ;;  %v2863_v57 = vmul.f32 %v2861_v53, %v2861_v53 }
 0xce5   :  { %v2865_v60 = vsel %vm226_vm4, %v2863_v57, 0.0  ;;  %v2864_v61 = vmul.f32 %v2862_v56, %v2862_v56 }
 0xce6   :  { %2866 = vadd.xlane.f32.xlu1 %v2865_v60 }
 0xce7   :  { %v2868_v8 = vsel %vm226_vm4, %v2864_v61, 0.0 }
 0xce8   :  { %2869 = vadd.xlane.f32.xlu0 %v2868_v8 }
 0xd73   :  { %v2867_v37 = vpop.xlane.xlu1 %2866 }
 0xd74   :  { %v2871_v6 = vmul.f32 0.083333336, %v2867_v37 }
 0xd75   :  { %v2870_v59 = vpop.xlane.xlu0 %2869 }
 0xd76   :  { %v2873_v4 = vadd.f32 1e-05, %v2871_v6  ;;  %v2872_v20 = vmul.f32 0.083333336, %v2870_v59 }
 0xd78   :  { %7767 = vrsqrt.f32 %v2873_v4  ;;  %v2874_v7 = vadd.f32 1e-05, %v2872_v20 }
 0xd7a   :  { %7769 = vrsqrt.f32 %v2874_v7 }
 0xd82   :  { %v7768_v21 = vpop.eup %7767 }
 0xd83   :  { %v2877_v2 = vmul.f32 %v7768_v21, %v2861_v53 }
 0xd84   :  { %v7770_v16 = vpop.eup %7769 }
 0xd85   :  { %v2886_v17 = vmul.f32 %v6556_v12, %v2877_v2  ;;  %v2878_v5 = vmul.f32 %v7770_v16, %v2862_v56 }
 0xd87   :  { %v2887_v19 = vmul.f32 %v6556_v12, %v2878_v5  ;;  %v8311_v13 = vadd.f32 %v6557_v18, %v2886_v17 }
 0xd89   :  { %v8313_v46 = vadd.f32 %v6557_v18, %v2887_v19 }
 0xd8b   :  { %v8317_v24 = vpack.c.bf16 %v8313_v46, %v8311_v13 }
 0xd8d   :  { %7270 = vmatmul.mubr.msk.bf16.vlgmr.msra.gmra.mrb[52].mxu0 %vm226_vm4, %v8317_v24 }
 0xd8e   :  { %7281 = vmatprep.mubr.msk.bf16.mxu0 %vm7967_vm0, %v7966_v0 }
 0xe60   :  { %v2952_v26 = vpop.f32.mrb[52].mxu0 }
 0xe61   :  { %v2953_v27 = vadd.f32 %v6558_v25, %v2952_v26  ;;  %v7271_v28 = vpop.f32.mrb[53].mxu0 }
 0xe62   :  { %v2955_v31 = vpop.f32.mrb[54].mxu0 }
 0xe63   :  { %v8323_v32 = vpack.c.bf16 %v2953_v27, %v2953_v27  ;;  %v2956_v33 = vadd.f32 %v6558_v25, %v2955_v31  ;;  %v7272_v34 = vpop.f32.mrb[55].mxu0  ;;  %v2959_v38 = vmul.f32 0.4082483, %v2953_v27 }
 0xe65   :  { %v8325_v35 = vpack.c.bf16 %v2956_v33, %v2956_v33  ;;  %2968 = vrot.lane.b32.xlu1 %v8323_v32, %s7968_s4  ;;  %v2960_v41 = vmul.f32 0.4082483, %v2956_v33  ;;  %v2963_v42 = vpack.c.bf16 %v2959_v38, %v2959_v38 }
 0xe67   :  { %3017 = vrot.lane.b32.xlu0 %v8325_v35, %s7968_s4  ;;  %v2964_v43 = vpack.c.bf16 %v2960_v41, %v2960_v41 }
 0xed7   :  { %v2969_v22 = vpop.permute.xlu1 %2968 }
 0xed8   :  { %v2974_v36 = vsel %vm286_vm5, %v2969_v22, 0 }
 0xed9   :  { %7274 = vmatpush3.bf16.xpose.msra.mxu1 %v2974_v36  ;;  %v3018_v23 = vpop.permute.xlu0 %3017 }
 0xeda   :  { %v3023_v39 = vsel %vm286_vm5, %v3018_v23, 0  ;;  %7285 = vmatprep.subr.bf16.mxu1 %v7966_v0 }
 0xedb   :  { %7280 = vmatpush3.bf16.xpose.msra.mxu0 %v3023_v39 }
 0xedc   :  { %7291 = vmatprep.subr.bf16.mxu0 %v7966_v0 }
 0xee0   :  { %7276 = vmatmul.mubr.msk.bf16.vlgmr.msra.gmra.mrb[60].mxu1 %vm286_vm5, %v2963_v42 }
 0xee1   :  { %7287 = vmatprep.mubr.msk.bf16.mxu1 %vm7967_vm0, %v7966_v0 }
 0xee2   :  { %7282 = vmatmul.mubr.msk.bf16.vlgmr.msra.gmra.mrb[56].mxu0 %vm286_vm5, %v2964_v43 }
 0xee3   :  { %7293 = vmatprep.mubr.msk.bf16.mxu0 %vm7967_vm0, %v7966_v0 }
 0xfb3   :  { %v3010_v44 = vpop.f32.mrb[60].mxu1 }
 0xfb4   :  { %v7277_v45 = vpop.f32.mrb[61].mxu1  ;;  %v3065_v62 = vsel %vm382_vm6, %v3010_v44, -inf }
 0xfb5   :  { %3066 = vmax.xlane.f32.xlu1 %v3065_v62  ;;  %v3013_v47 = vpop.f32.mrb[62].mxu1  ;;  %v3059_v58 = vpop.f32.mrb[56].mxu0 }
 0xfb6   :  { %v7278_v48 = vpop.f32.mrb[63].mxu1  ;;  %v7283_v29 = vpop.f32.mrb[57].mxu0  ;;  %v3068_v49 = vsel %vm382_vm6, %v3059_v58, -inf }
 0xfb7   :  { %3069 = vmax.xlane.f32.xlu0 %v3068_v49  ;;  %v3062_v30 = vpop.f32.mrb[58].mxu0 }
 0xfb8   :  { %v7284_v50 = vpop.f32.mrb[59].mxu0 }
 0xfc6   :  { %3089 = vrot.lane.b32.xlu1 %v8323_v32, %s7969_s6 }
0x1042   :  { %v3067_v51 = vpop.xlane.xlu1 %3066 }
0x1043   :  { %v3071_v53 = vsub.f32 %v3010_v44, %v3067_v51 }
0x1044   :  { %v3070_v55 = vpop.xlane.xlu0 %3069 }
0x1045   :  { %v3073_v56 = vmul.f32 1.442695, %v3071_v53  ;;  %v3072_v57 = vsub.f32 %v3059_v58, %v3070_v55 }
0x1046   :  { %v3090_v60 = vpop.permute.xlu1 %3089 }
0x1047   :  { %7771 = vpow2.f32 %v3073_v56  ;;  %v3075_v61 = vmul.f32 1.442695, %v3072_v57  ;;  %v3095_v8 = vsel %vm129_vm1, %v3090_v60, 0 }
0x1048   :  { %7286 = vmatpush3.bf16.msra.mxu1 %v3095_v8 }
0x1049   :  { %7773 = vpow2.f32 %v3075_v61  ;;  %7297 = vmatprep.subr.bf16.mxu1 %v7966_v0 }
0x1051   :  { %v7772_v52 = vpop.eup %7771 }
0x1052   :  { %v3077_v9 = vsel %vm382_vm6, %v7772_v52, 0.0 }
0x1053   :  { %v7774_v37 = vpop.eup %7773  ;;  %3078 = vadd.xlane.f32.xlu1 %v3077_v9 }
0x1054   :  { %v3080_v6 = vsel %vm382_vm6, %v7774_v37, 0.0 }
0x1055   :  { %3081 = vadd.xlane.f32.xlu0 %v3080_v6 }
0x1064   :  { %3189 = vrot.lane.b32.xlu1 %v8323_v32, %s7970_s7 }
0x1068   :  { %3240 = vrot.lane.b32.xlu1 %v8325_v35, %s7970_s7 }
0x106b   :  { %3137 = vrot.lane.b32.xlu0 %v8325_v35, %s7969_s6 }
0x106c   :  { %3238 = vrot.lane.b32.xlu1 %v2964_v43, %s7971_s8 }
0x106f   :  { %3187 = vrot.lane.b32.xlu0 %v2963_v42, %s7971_s8 }
0x10e0   :  { %v3079_v59 = vpop.xlane.xlu1 %3078 }
0x10e1   :  { %7775 = vrcp.f32 %v3079_v59 }
0x10e2   :  { %v3082_v4 = vpop.xlane.xlu0 %3081 }
0x10e3   :  { %7777 = vrcp.f32 %v3082_v4 }
0x10e4   :  { %v3190_v21 = vpop.permute.xlu1 %3189 }
0x10e5   :  { %v3195_v19 = vsel %vm286_vm5, %v3190_v21, 0 }
0x10e6   :  { %v3138_v20 = vpop.permute.xlu0 %3137 }
0x10e7   :  { %v3143_v7 = vsel %vm129_vm1, %v3138_v20, 0 }
0x10e8   :  { %7292 = vmatpush3.bf16.msra.mxu0 %v3143_v7  ;;  %v3241_v18 = vpop.permute.xlu1 %3240 }
0x10e9   :  { %7303 = vmatprep.subr.bf16.mxu0 %v7966_v0  ;;  %v3246_v26 = vsel %vm286_vm5, %v3241_v18, 0 }
0x10ea   :  { %v3188_v27 = vpop.permute.xlu0 %3187 }
0x10eb   :  { %v7776_v12 = vpop.eup %7775 }
0x10ec   :  { %v3085_v2 = vmul.f32 %v7776_v12, %v7772_v52  ;;  %v3239_v28 = vpop.permute.xlu1 %3238  ;;  %v2961_v12 = vld [vmem:[#allocation7 + $0xc] sm:$0xf] }
0x10ed   :  { %v7778_v16 = vpop.eup %7777 }
0x10ee   :  { %v3086_v17 = vmul.f32 %v7778_v16, %v7774_v37  ;;  %v3087_v5 = vpack.c.bf16 %v3085_v2, %v3085_v2  ;;  %v3466_v16 = vsel %vm736_vm7, %v2961_v12, 0 }
0x10f0   :  { %7288 = vmatmul.mubr.msk.bf16.vlgmr.msra.gmra.mrb[64].mxu1 %vm382_vm6, %v3087_v5  ;;  %v3088_v25 = vpack.c.bf16 %v3086_v17, %v3086_v17  ;;  %v2962_v17 = vld [vmem:[#allocation7 + $0xa8] sm:$0x3] }
0x10f1   :  { %7298 = vmatpush3.bf16.xpose.msra.mxu1 %v3195_v19  ;;  %7299 = vmatprep.mubr.msk.bf16.mxu1 %vm7967_vm0, %v7966_v0  ;;  %v6569_v5 = vcombine.low %v2961_v12, %v2962_v17 }
0x10f2   :  { %7294 = vmatmul.mubr.msk.bf16.vlgmr.msra.gmra.mrb[60].mxu0 %vm382_vm6, %v3088_v25  ;;  %7309 = vmatprep.subr.bf16.mxu1 %v7966_v0 }
0x10f3   :  { %7304 = vmatpush3.bf16.xpose.msra.mxu0 %v3246_v26  ;;  %7305 = vmatprep.mubr.msk.bf16.mxu0 %vm7967_vm0, %v7966_v0  ;;  %v3414_v18 = vrot.slane %v6569_v5, 3 }
0x10f4   :  { %7315 = vmatprep.subr.bf16.mxu0 %v7966_v0 }
0x10f5   :  { %v3419_v19 = vsel %vm736_vm7, %v3414_v18, 0 }
0x10f8   :  { %7300 = vmatmul.mubr.msk.bf16.vlgmr.msra.gmra.mrb[68].mxu1 %vm286_vm5, %v3188_v27 }
0x10f9   :  { %7311 = vmatprep.mubr.msk.bf16.mxu1 %vm7967_vm0, %v7966_v0 }
0x10fa   :  { %7306 = vmatmul.mubr.msk.bf16.vlgmr.msra.gmra.mrb[64].mxu0 %vm286_vm5, %v3239_v28 }
0x10fb   :  { %7317 = vmatprep.mubr.msk.bf16.mxu0 %vm7967_vm0, %v7966_v0 }
0x11c3   :  { %v8375_v31 = vpop.f32.mrb[64].mxu1 }
0x11c4   :  { %v7289_v33 = vpop.f32.mrb[65].mxu1 }
0x11c5   :  { %v3134_v34 = vpop.f32.mrb[66].mxu1  ;;  %v3179_v22 = vpop.f32.mrb[60].mxu0 }
0x11c6   :  { %v3185_v36 = vpack.c.bf16 %v3179_v22, %v8375_v31  ;;  %v7290_v23 = vpop.f32.mrb[67].mxu1  ;;  %v7295_v38 = vpop.f32.mrb[61].mxu0 }
0x11c7   :  { %v3182_v39 = vpop.f32.mrb[62].mxu0 }
0x11c8   :  { %v7296_v41 = vpop.f32.mrb[63].mxu0 }
0x11cb   :  { %v3231_v42 = vpop.f32.mrb[68].mxu1 }
0x11cc   :  { %v7301_v43 = vpop.f32.mrb[69].mxu1  ;;  %v3288_v44 = vsel %vm382_vm6, %v3231_v42, -inf }
0x11cd   :  { %3289 = vmax.xlane.f32.xlu0 %v3288_v44  ;;  %v3234_v45 = vpop.f32.mrb[70].mxu1  ;;  %v3282_v62 = vpop.f32.mrb[64].mxu0  ;;  %v6572_v43 = vld [vmem:[#allocation10 + $0x18] ss:$0 sm:$0xff] }
0x11ce   :  { %v7302_v47 = vpop.f32.mrb[71].mxu1  ;;  %v7307_v58 = vpop.f32.mrb[65].mxu0  ;;  %v3291_v48 = vsel %vm382_vm6, %v3282_v62, -inf }
0x11cf   :  { %3292 = vmax.xlane.f32.xlu1 %v3291_v48  ;;  %v3285_v29 = vpop.f32.mrb[66].mxu0 }
0x11d0   :  { %v7308_v49 = vpop.f32.mrb[67].mxu0 }
0x11e0   :  { %3312 = vrot.lane.b32.xlu1 %v8323_v32, %s7972_s9 }
0x125a   :  { %v3290_v30 = vpop.xlane.xlu0 %3289 }
0x125b   :  { %v3294_v50 = vsub.f32 %v3231_v42, %v3290_v30 }
0x125c   :  { %v3293_v51 = vpop.xlane.xlu1 %3292 }
0x125d   :  { %v3296_v53 = vmul.f32 1.442695, %v3294_v50  ;;  %v3295_v55 = vsub.f32 %v3282_v62, %v3293_v51 }
0x125f   :  { %7779 = vpow2.f32 %v3296_v53  ;;  %v3298_v56 = vmul.f32 1.442695, %v3295_v55 }
0x1260   :  { %v3313_v57 = vpop.permute.xlu1 %3312 }
0x1261   :  { %7781 = vpow2.f32 %v3298_v56  ;;  %v3318_v60 = vsel %vm129_vm1, %v3313_v57, 0 }
0x1262   :  { %7310 = vmatpush3.bf16.msra.mxu1 %v3318_v60 }
0x1263   :  { %7321 = vmatprep.subr.bf16.mxu1 %v7966_v0 }
0x1269   :  { %v7780_v61 = vpop.eup %7779 }
0x126a   :  { %v3300_v8 = vsel %vm382_vm6, %v7780_v61, 0.0 }
0x126b   :  { %v7782_v52 = vpop.eup %7781  ;;  %3301 = vadd.xlane.f32.xlu0 %v3300_v8 }
0x126c   :  { %v3303_v32 = vsel %vm382_vm6, %v7782_v52, 0.0 }
0x126f   :  { %3304 = vadd.xlane.f32.xlu0 %v3303_v32 }
0x1285   :  { %3360 = vrot.lane.b32.xlu0 %v8325_v35, %s7972_s9 }
0x12f8   :  { %v3302_v9 = vpop.xlane.xlu0 %3301 }
0x12f9   :  { %7783 = vrcp.f32 %v3302_v9  ;;  %v7592_v9 = vld [vmem:[#allocation7 + $0x10] ss:$156 sps:$4 sm:$0x3f]  }
0x12fc   :  { %v3305_v37 = vpop.xlane.xlu0 %3304 }
0x12fd   :  { %7785 = vrcp.f32 %v3305_v37  ;;  %v6575_v37 = vld [vmem:[#allocation10 + $0x1b] ss:$0 sm:$0xff] }
0x1300   :  { %v3361_v6 = vpop.permute.xlu0 %3360 }
0x1301   :  { %v3366_v59 = vsel %vm129_vm1, %v3361_v6, 0 }
0x1302   :  { %7316 = vmatpush3.bf16.msra.mxu0 %v3366_v59 }
0x1303   :  { %v7784_v4 = vpop.eup %7783  ;;  %7327 = vmatprep.subr.bf16.mxu0 %v7966_v0 }
0x1304   :  { %v3308_v20 = vmul.f32 %v7784_v4, %v7780_v61 }
0x1306   :  { %v3310_v7 = vpack.c.bf16 %v3308_v20, %v3308_v20 }
0x1307   :  { %v7786_v21 = vpop.eup %7785 }
0x1308   :  { %v3309_v2 = vmul.f32 %v7786_v21, %v7782_v52  ;;  %7312 = vmatmul.mubr.msk.bf16.vlgmr.msra.gmra.mrb[72].mxu1 %vm382_vm6, %v3310_v7 }
0x1309   :  { %7323 = vmatprep.mubr.msk.bf16.mxu1 %vm7967_vm0, %v7966_v0  ;;  %7322 = vmatpush3.bf16.msra.mxu1 %v3419_v19 }
0x130a   :  { %v3311_v35 = vpack.c.bf16 %v3309_v2, %v3309_v2  ;;  %7333 = vmatprep.subr.bf16.mxu1 %v7966_v0 }
0x130c   :  { %7318 = vmatmul.mubr.msk.bf16.vlgmr.msra.gmra.mrb[68].mxu0 %vm382_vm6, %v3311_v35 }
0x130d   :  { %7328 = vmatpush3.bf16.msra.mxu0 %v3466_v16  ;;  %7329 = vmatprep.mubr.msk.bf16.mxu0 %vm7967_vm0, %v7966_v0  ;;  %v6573_v16 = vld [vmem:[#allocation10 + $0x19] ss:$0 sm:$0xff] }
0x130e   :  { %7339 = vmatprep.subr.bf16.mxu0 %v7966_v0 }
0x1314   :  { %7330 = vmatmul.mubr.msk.bf16.vlgmr.msra.gmra.mrb[72].mxu0 %vm286_vm5, %v3185_v36 }
0x1315   :  { %7341 = vmatprep.mubr.msk.bf16.mxu0 %vm7967_vm0, %v7966_v0 }
0x13db   :  { %v3354_v25 = vpop.f32.mrb[72].mxu1 }
0x13dc   :  { %v7313_v26 = vpop.f32.mrb[73].mxu1 }
0x13dd   :  { %v3357_v27 = vpop.f32.mrb[74].mxu1 }
0x13de   :  { %v7314_v28 = vpop.f32.mrb[75].mxu1 }
0x13df   :  { %v3402_v31 = vpop.f32.mrb[68].mxu0 }
0x13e0   :  { %v3408_v33 = vpack.c.bf16 %v3402_v31, %v3354_v25  ;;  %v7319_v34 = vpop.f32.mrb[69].mxu0  ;;  %v6574_v25 = vld [vmem:[#allocation10 + $0x1a] ss:$0 sm:$0xff] }
0x13e1   :  { %v3405_v22 = vpop.f32.mrb[70].mxu0 }
0x13e2   :  { %v7320_v36 = vpop.f32.mrb[71].mxu0  ;;  %7324 = vmatmul.mubr.msk.bf16.vlgmr.msra.gmra.mrb[76].mxu1 %vm286_vm5, %v3408_v33 }
0x13e3   :  { %7335 = vmatprep.mubr.msk.bf16.mxu1 %vm7967_vm0, %v7966_v0 }
0x13e7   :  { %v3502_v23 = vpop.f32.mrb[72].mxu0 }
0x13e8   :  { %v7331_v38 = vpop.f32.mrb[73].mxu0 }
0x13e9   :  { %v3505_v39 = vpop.f32.mrb[74].mxu0 }
0x13ea   :  { %v7332_v41 = vpop.f32.mrb[75].mxu0 }
0x14b5   :  { %v3455_v42 = vpop.f32.mrb[76].mxu1 }
0x14b6   :  { %v3503_v44 = vadd.f32 %v3502_v23, %v3455_v42  ;;  %v7325_v45 = vpop.f32.mrb[77].mxu1 }
0x14b7   :  { %v3458_v62 = vpop.f32.mrb[78].mxu1 }
0x14b8   :  { %v3516_v47 = vadd.f32 %v6572_v43, %v3503_v44  ;;  %v3506_v58 = vadd.f32 %v3505_v39, %v3458_v62  ;;  %v7326_v48 = vpop.f32.mrb[79].mxu1 }
0x14ba   :  { %v3517_v29 = vadd.f32 %v6572_v43, %v3506_v58  ;;  %v3518_v49 = vadd.f32 %v3516_v47, %v8311_v13 }
0x14bc   :  { %v3520_v30 = vsel %vm226_vm4, %v3518_v49, 0.0  ;;  %v3519_v50 = vadd.f32 %v3517_v29, %v8313_v46  ;;  %v3583_v46 = vsel %vm230_vm3, %v7592_v9, 0 }
0x14bd   :  { %3521 = vadd.xlane.f32.xlu1 %v3520_v30  ;;  %7334 = vmatpush3.bf16.msra.mxu1 %v3583_v46 }
0x14be   :  { %v3523_v51 = vsel %vm226_vm4, %v3519_v50, 0.0  ;;  %7345 = vmatprep.subr.bf16.mxu1 %v7966_v0 }
0x14bf   :  { %3524 = vadd.xlane.f32.xlu0 %v3523_v51 }
0x154a   :  { %v3522_v53 = vpop.xlane.xlu1 %3521 }
0x154b   :  { %v3526_v55 = vmul.f32 0.083333336, %v3522_v53 }
0x154c   :  { %v3525_v56 = vpop.xlane.xlu0 %3524 }
0x154d   :  { %v3528_v57 = vsub.f32 %v3518_v49, %v3526_v55  ;;  %v3527_v60 = vmul.f32 0.083333336, %v3525_v56 }
0x154f   :  { %v3529_v61 = vsub.f32 %v3519_v50, %v3527_v60  ;;  %v3530_v8 = vmul.f32 %v3528_v57, %v3528_v57 }
0x1551   :  { %v3532_v52 = vsel %vm226_vm4, %v3530_v8, 0.0  ;;  %v3531_v32 = vmul.f32 %v3529_v61, %v3529_v61 }
0x1552   :  { %3533 = vadd.xlane.f32.xlu1 %v3532_v52 }
0x1553   :  { %v3535_v13 = vsel %vm226_vm4, %v3531_v32, 0.0 }
0x1554   :  { %3536 = vadd.xlane.f32.xlu0 %v3535_v13 }
0x1563   :  { %3626 = vrot.lane.b32.xlu1 %v7592_v9, %s7968_s4 }
0x156a   :  { %3628 = vrot.lane.b32.xlu0 %v6575_v37, %s7968_s4 }
0x15df   :  { %v3534_v6 = vpop.xlane.xlu1 %3533 }
0x15e0   :  { %v3538_v59 = vmul.f32 0.083333336, %v3534_v6 }
0x15e1   :  { %v3537_v4 = vpop.xlane.xlu0 %3536 }
0x15e2   :  { %v3540_v20 = vadd.f32 1e-05, %v3538_v59  ;;  %v3539_v7 = vmul.f32 0.083333336, %v3537_v4 }
0x15e3   :  { %v3627_v21 = vpop.permute.xlu1 %3626 }
0x15e4   :  { %7787 = vrsqrt.f32 %v3540_v20  ;;  %v3541_v12 = vadd.f32 1e-05, %v3539_v7  ;;  %v3632_v2 = vsel %vm230_vm3, %v3627_v21, 0 }
0x15e5   :  { %7340 = vmatpush3.bf16.msra.mxu0 %v3632_v2 }
0x15e6   :  { %7789 = vrsqrt.f32 %v3541_v12  ;;  %7351 = vmatprep.subr.bf16.mxu0 %v7966_v0 }
0x15e8   :  { %7342 = vmatmul.mubr.msk.bf16.vlgmr.msra.gmra.mrb[76].mxu0 %vm226_vm4, %v8317_v24  ;;  %v3629_v24 = vpop.permute.xlu0 %3628 }
0x15e9   :  { %7353 = vmatprep.mubr.msk.bf16.mxu0 %vm7967_vm0, %v7966_v0 }
0x15ee   :  { %v7788_v35 = vpop.eup %7787 }
0x15ef   :  { %v3544_v17 = vmul.f32 %v7788_v35, %v3528_v57 }
0x15f0   :  { %v7790_v5 = vpop.eup %7789 }
0x15f1   :  { %v3553_v18 = vmul.f32 %v6573_v16, %v3544_v17  ;;  %v3545_v19 = vmul.f32 %v7790_v5, %v3529_v61 }
0x15f3   :  { %v3554_v26 = vmul.f32 %v6573_v16, %v3545_v19  ;;  %v8422_v27 = vadd.f32 %v6574_v25, %v3553_v18 }
0x15f5   :  { %v8424_v28 = vadd.f32 %v6574_v25, %v3554_v26 }
0x15f7   :  { %v3567_v31 = vpack.c.bf16 %v8424_v28, %v8422_v27 }
0x15f9   :  { %7336 = vmatmul.mubr.msk.bf16.vlgmr.msra.gmra.mrb[80].mxu1 %vm226_vm4, %v3567_v31 }
0x15fa   :  { %7347 = vmatprep.mubr.msk.bf16.mxu1 %vm7967_vm0, %v7966_v0 }
0x16bb   :  { %v3668_v33 = vpop.f32.mrb[76].mxu0 }
0x16bc   :  { %v3669_v34 = vadd.f32 %v3668_v33, %v3629_v24  ;;  %v7343_v22 = vpop.f32.mrb[77].mxu0 }
0x16bd   :  { %v3671_v36 = vpop.f32.mrb[78].mxu0 }
0x16be   :  { %v8431_v23 = vpack.c.bf16 %v3669_v34, %v3669_v34  ;;  %v3672_v38 = vadd.f32 %v3671_v36, %v3629_v24  ;;  %v7344_v39 = vpop.f32.mrb[79].mxu0 }
0x16c0   :  { %v8433_v41 = vpack.c.bf16 %v3672_v38, %v3672_v38  ;;  %v3687_v42 = vsel %vm286_vm5, %v8431_v23, 0 }
0x16c1   :  { %7346 = vmatpush3.bf16.xpose.msra.mxu1 %v3687_v42 }
0x16c2   :  { %v3733_v43 = vsel %vm286_vm5, %v8433_v41, 0  ;;  %7357 = vmatprep.subr.bf16.mxu1 %v7966_v0 }
0x16c3   :  { %7352 = vmatpush3.bf16.xpose.msra.mxu0 %v3733_v43 }
0x16c4   :  { %7363 = vmatprep.subr.bf16.mxu0 %v7966_v0 }
0x16cc   :  { %v3619_v44 = vpop.f32.mrb[80].mxu1 }
0x16cd   :  { %v3620_v45 = vadd.f32 %v6575_v37, %v3619_v44  ;;  %v7337_v62 = vpop.f32.mrb[81].mxu1 }
0x16ce   :  { %v3622_v47 = vpop.f32.mrb[82].mxu1 }
0x16cf   :  { %v3675_v58 = vmul.f32 0.4082483, %v3620_v45  ;;  %v3623_v48 = vadd.f32 %v6575_v37, %v3622_v47  ;;  %v7338_v29 = vpop.f32.mrb[83].mxu1 }
0x16d1   :  { %v3679_v49 = vpack.c.bf16 %v3675_v58, %v3675_v58  ;;  %v3676_v30 = vmul.f32 0.4082483, %v3623_v48 }
0x16d3   :  { %v3680_v50 = vpack.c.bf16 %v3676_v30, %v3676_v30  ;;  %7348 = vmatmul.mubr.msk.bf16.vlgmr.msra.gmra.mrb[84].mxu1 %vm286_vm5, %v3679_v49 }
0x16d4   :  { %7359 = vmatprep.mubr.msk.bf16.mxu1 %vm7967_vm0, %v7966_v0 }
0x16d5   :  { %7354 = vmatmul.mubr.msk.bf16.vlgmr.msra.gmra.mrb[80].mxu0 %vm286_vm5, %v3680_v50 }
0x16d6   :  { %7365 = vmatprep.mubr.msk.bf16.mxu0 %vm7967_vm0, %v7966_v0 }
0x17a6   :  { %v3723_v51 = vpop.f32.mrb[84].mxu1 }
0x17a7   :  { %v7349_v53 = vpop.f32.mrb[85].mxu1  ;;  %v3775_v55 = vsel %vm382_vm6, %v3723_v51, -inf }
0x17a8   :  { %3776 = vmax.xlane.f32.xlu1 %v3775_v55  ;;  %v3726_v56 = vpop.f32.mrb[86].mxu1  ;;  %v3769_v57 = vpop.f32.mrb[80].mxu0 }
0x17a9   :  { %v7350_v60 = vpop.f32.mrb[87].mxu1  ;;  %v7355_v61 = vpop.f32.mrb[81].mxu0  ;;  %v3778_v8 = vsel %vm382_vm6, %v3769_v57, -inf }
0x17aa   :  { %3779 = vmax.xlane.f32.xlu0 %v3778_v8  ;;  %v3772_v52 = vpop.f32.mrb[82].mxu0 }
0x17ab   :  { %v7356_v32 = vpop.f32.mrb[83].mxu0 }
0x17b9   :  { %3800 = vrot.lane.b32.xlu1 %v8431_v23, %s7968_s4 }
0x1835   :  { %v3777_v13 = vpop.xlane.xlu1 %3776 }
0x1836   :  { %v3781_v9 = vsub.f32 %v3723_v51, %v3777_v13 }
0x1837   :  { %v3780_v46 = vpop.xlane.xlu0 %3779 }
0x1838   :  { %v3783_v37 = vmul.f32 1.442695, %v3781_v9  ;;  %v3782_v6 = vsub.f32 %v3769_v57, %v3780_v46 }
0x1839   :  { %v3801_v59 = vpop.permute.xlu1 %3800 }
0x183a   :  { %7791 = vpow2.f32 %v3783_v37  ;;  %v3785_v4 = vmul.f32 1.442695, %v3782_v6  ;;  %v3806_v20 = vsel %vm129_vm1, %v3801_v59, 0 }
0x183b   :  { %7358 = vmatpush3.bf16.msra.mxu1 %v3806_v20 }
0x183c   :  { %7793 = vpow2.f32 %v3785_v4  ;;  %7369 = vmatprep.subr.bf16.mxu1 %v7966_v0 }
0x1844   :  { %v7792_v7 = vpop.eup %7791 }
0x1845   :  { %v3787_v21 = vsel %vm382_vm6, %v7792_v7, 0.0 }
0x1846   :  { %v7794_v12 = vpop.eup %7793  ;;  %3788 = vadd.xlane.f32.xlu1 %v3787_v21 }
0x1847   :  { %v3790_v2 = vsel %vm382_vm6, %v7794_v12, 0.0 }
0x1848   :  { %3791 = vadd.xlane.f32.xlu0 %v3790_v2 }
0x1857   :  { %3901 = vrot.lane.b32.xlu1 %v8431_v23, %s7971_s8 }
0x185b   :  { %3952 = vrot.lane.b32.xlu1 %v8433_v41, %s7971_s8 }
0x185e   :  { %3849 = vrot.lane.b32.xlu0 %v8433_v41, %s7968_s4 }
0x185f   :  { %3950 = vrot.lane.b32.xlu1 %v3680_v50, %s7971_s8 }
0x1862   :  { %3899 = vrot.lane.b32.xlu0 %v3679_v49, %s7971_s8 }
0x18d3   :  { %v3789_v35 = vpop.xlane.xlu1 %3788 }
0x18d4   :  { %7795 = vrcp.f32 %v3789_v35 }
0x18d5   :  { %v3792_v16 = vpop.xlane.xlu0 %3791 }
0x18d6   :  { %7797 = vrcp.f32 %v3792_v16 }
0x18d7   :  { %v3902_v18 = vpop.permute.xlu1 %3901 }
0x18d8   :  { %v3907_v34 = vsel %vm286_vm5, %v3902_v18, 0  ;;  %v3677_v18 = vld [vmem:[#allocation7 + $0x14] sm:$0xf] }
0x18d9   :  { %v3850_v17 = vpop.permute.xlu0 %3849 }
0x18da   :  { %v3855_v5 = vsel %vm129_vm1, %v3850_v17, 0 }
0x18db   :  { %7364 = vmatpush3.bf16.msra.mxu0 %v3855_v5  ;;  %v3953_v33 = vpop.permute.xlu1 %3952 }
0x18dc   :  { %7375 = vmatprep.subr.bf16.mxu0 %v7966_v0  ;;  %v3958_v36 = vsel %vm286_vm5, %v3953_v33, 0 }
0x18dd   :  { %v3900_v38 = vpop.permute.xlu0 %3899 }
0x18de   :  { %v7796_v19 = vpop.eup %7795 }
0x18df   :  { %v3795_v25 = vmul.f32 %v7796_v19, %v7792_v7  ;;  %v3951_v39 = vpop.permute.xlu1 %3950 }
0x18e0   :  { %v7798_v26 = vpop.eup %7797 }
0x18e1   :  { %v3796_v31 = vmul.f32 %v7798_v26, %v7794_v12  ;;  %v3797_v24 = vpack.c.bf16 %v3795_v25, %v3795_v25  ;;  %v4178_v25 = vsel %vm736_vm7, %v3677_v18, 0  ;;  %v3678_v26 = vld [vmem:[#allocation7 + $0xb0] sm:$0x3] }
0x18e3   :  { %7360 = vmatmul.mubr.msk.bf16.vlgmr.msra.gmra.mrb[88].mxu1 %vm382_vm6, %v3797_v24  ;;  %v3798_v22 = vpack.c.bf16 %v3796_v31, %v3796_v31  ;;  %v6587_v31 = vcombine.low %v3677_v18, %v3678_v26 }
0x18e4   :  { %7370 = vmatpush3.bf16.xpose.msra.mxu1 %v3907_v34  ;;  %7371 = vmatprep.mubr.msk.bf16.mxu1 %vm7967_vm0, %v7966_v0 }
0x18e5   :  { %7366 = vmatmul.mubr.msk.bf16.vlgmr.msra.gmra.mrb[84].mxu0 %vm382_vm6, %v3798_v22  ;;  %7381 = vmatprep.subr.bf16.mxu1 %v7966_v0  ;;  %v4126_v24 = vrot.slane %v6587_v31, 3  ;;  %v6591_v31 = vld [vmem:[#allocation10 + $0x1d] ss:$0 sm:$0xff] }
0x18e6   :  { %7376 = vmatpush3.bf16.xpose.msra.mxu0 %v3958_v36  ;;  %7377 = vmatprep.mubr.msk.bf16.mxu0 %vm7967_vm0, %v7966_v0 }
0x18e7   :  { %7387 = vmatprep.subr.bf16.mxu0 %v7966_v0  ;;  %v4131_v33 = vsel %vm736_vm7, %v4126_v24, 0 }
0x18eb   :  { %7372 = vmatmul.mubr.msk.bf16.vlgmr.msra.gmra.mrb[92].mxu1 %vm286_vm5, %v3900_v38 }
0x18ec   :  { %7383 = vmatprep.mubr.msk.bf16.mxu1 %vm7967_vm0, %v7966_v0 }
0x18ed   :  { %7378 = vmatmul.mubr.msk.bf16.vlgmr.msra.gmra.mrb[88].mxu0 %vm286_vm5, %v3951_v39 }
0x18ee   :  { %7389 = vmatprep.mubr.msk.bf16.mxu0 %vm7967_vm0, %v7966_v0 }
0x19b6   :  { %v8481_v42 = vpop.f32.mrb[88].mxu1 }
0x19b7   :  { %v7361_v43 = vpop.f32.mrb[89].mxu1 }
0x19b8   :  { %v3845_v44 = vpop.f32.mrb[90].mxu1  ;;  %v3891_v45 = vpop.f32.mrb[84].mxu0 }
0x19b9   :  { %v3897_v62 = vpack.c.bf16 %v3891_v45, %v8481_v42  ;;  %v7362_v47 = vpop.f32.mrb[91].mxu1  ;;  %v7367_v58 = vpop.f32.mrb[85].mxu0 }
0x19ba   :  { %v3894_v48 = vpop.f32.mrb[86].mxu0 }
0x19bb   :  { %v7368_v29 = vpop.f32.mrb[87].mxu0 }
0x19be   :  { %v3943_v49 = vpop.f32.mrb[92].mxu1 }
0x19bf   :  { %v7373_v30 = vpop.f32.mrb[93].mxu1  ;;  %v4000_v50 = vsel %vm382_vm6, %v3943_v49, -inf }
0x19c0   :  { %4001 = vmax.xlane.f32.xlu0 %v4000_v50  ;;  %v3946_v51 = vpop.f32.mrb[94].mxu1  ;;  %v3994_v53 = vpop.f32.mrb[88].mxu0 }
0x19c1   :  { %v7374_v55 = vpop.f32.mrb[95].mxu1  ;;  %v7379_v56 = vpop.f32.mrb[89].mxu0  ;;  %v4003_v57 = vsel %vm382_vm6, %v3994_v53, -inf }
0x19c2   :  { %4004 = vmax.xlane.f32.xlu1 %v4003_v57  ;;  %v3997_v60 = vpop.f32.mrb[90].mxu0 }
0x19c3   :  { %v7380_v61 = vpop.f32.mrb[91].mxu0 }
0x19d3   :  { %4024 = vrot.lane.b32.xlu1 %v8431_v23, %s7970_s7 }
0x1a4d   :  { %v4002_v8 = vpop.xlane.xlu0 %4001 }
0x1a4e   :  { %v4006_v52 = vsub.f32 %v3943_v49, %v4002_v8  ;;  %v6590_v49 = vld [vmem:[#allocation10 + $0x1c] ss:$0 sm:$0xff] }
0x1a4f   :  { %v4005_v32 = vpop.xlane.xlu1 %4004 }
0x1a50   :  { %v4008_v13 = vmul.f32 1.442695, %v4006_v52  ;;  %v4007_v9 = vsub.f32 %v3994_v53, %v4005_v32 }
0x1a52   :  { %7799 = vpow2.f32 %v4008_v13  ;;  %v4010_v46 = vmul.f32 1.442695, %v4007_v9 }
0x1a53   :  { %v4025_v37 = vpop.permute.xlu1 %4024 }
0x1a54   :  { %7801 = vpow2.f32 %v4010_v46  ;;  %v4030_v6 = vsel %vm129_vm1, %v4025_v37, 0 }
0x1a55   :  { %7382 = vmatpush3.bf16.msra.mxu1 %v4030_v6 }
0x1a56   :  { %7393 = vmatprep.subr.bf16.mxu1 %v7966_v0 }
0x1a5c   :  { %v7800_v59 = vpop.eup %7799 }
0x1a5d   :  { %v4012_v4 = vsel %vm382_vm6, %v7800_v59, 0.0 }
0x1a5e   :  { %v7802_v20 = vpop.eup %7801  ;;  %4013 = vadd.xlane.f32.xlu0 %v4012_v4 }
0x1a5f   :  { %v4015_v23 = vsel %vm382_vm6, %v7802_v20, 0.0 }
0x1a62   :  { %4016 = vadd.xlane.f32.xlu0 %v4015_v23  ;;  %v7594_v23 = vld [vmem:[#allocation7 + $0x60] ss:$156 sps:$4 sm:$0x3f]  }
0x1a78   :  { %4072 = vrot.lane.b32.xlu0 %v8433_v41, %s7970_s7 }
0x1aeb   :  { %v4014_v7 = vpop.xlane.xlu0 %4013 }
0x1aec   :  { %7803 = vrcp.f32 %v4014_v7  ;;  %v7597_v7 = vld [vmem:[#allocation7 + $0x68] ss:$156 sps:$4 sm:$0x3f]  }
0x1aef   :  { %v4017_v21 = vpop.xlane.xlu0 %4016 }
0x1af0   :  { %7805 = vrcp.f32 %v4017_v21  ;;  %v7599_v21 = vld [vmem:[#allocation7 + $0x64] ss:$156 sps:$4 sm:$0x3f]  }
0x1af3   :  { %v4073_v12 = vpop.permute.xlu0 %4072 }
0x1af4   :  { %v4078_v2 = vsel %vm129_vm1, %v4073_v12, 0 }
0x1af5   :  { %7388 = vmatpush3.bf16.msra.mxu0 %v4078_v2  ;;  %v4451_v2 = vsel %vm230_vm3, %v7599_v21, 0  ;;  %v7635_v21 = vld [vmem:[#allocation8 + $0x508] sm:$0xff]  }
0x1af6   :  { %v7804_v35 = vpop.eup %7803  ;;  %7399 = vmatprep.subr.bf16.mxu0 %v7966_v0 }
0x1af7   :  { %v4020_v16 = vmul.f32 %v7804_v35, %v7800_v59  ;;  %v7600_v35 = vld [vmem:[#allocation7 + $0x70] ss:$156 sps:$4 sm:$0x3f]  }
0x1af9   :  { %v4022_v17 = vpack.c.bf16 %v4020_v16, %v4020_v16  ;;  %v7602_v16 = vld [vmem:[#allocation7 + $0x78] ss:$156 sps:$4 sm:$0x3f]  }
0x1afa   :  { %v7806_v5 = vpop.eup %7805 }
0x1afb   :  { %v4021_v19 = vmul.f32 %v7806_v5, %v7802_v20  ;;  %7384 = vmatmul.mubr.msk.bf16.vlgmr.msra.gmra.mrb[96].mxu1 %vm382_vm6, %v4022_v17 }
0x1afc   :  { %7395 = vmatprep.mubr.msk.bf16.mxu1 %vm7967_vm0, %v7966_v0  ;;  %7394 = vmatpush3.bf16.msra.mxu1 %v4131_v33 }
0x1afd   :  { %v4023_v41 = vpack.c.bf16 %v4021_v19, %v4021_v19  ;;  %6609 = vmatprep.subr.msk.bf16.mxu1 %vm230_vm3, %v7594_v23  ;;  %v7632_v23 = vld [vmem:[#allocation8 + $0x440] sm:$0xff]  }
0x1aff   :  { %7390 = vmatmul.mubr.msk.bf16.vlgmr.msra.gmra.mrb[92].mxu0 %vm382_vm6, %v4023_v41 }
0x1b00   :  { %7400 = vmatpush3.bf16.msra.mxu0 %v4178_v25  ;;  %7401 = vmatprep.mubr.msk.bf16.mxu0 %vm7967_vm0, %v7966_v0 }
0x1b01   :  { %6611 = vmatprep.subr.msk.bf16.mxu0 %vm230_vm3, %v7597_v7  ;;  %v7634_v7 = vld [vmem:[#allocation8 + $0x488] sm:$0xff]  }
0x1b07   :  { %7402 = vmatmul.mubr.msk.bf16.vlgmr.msra.gmra.mrb[96].mxu0 %vm286_vm5, %v3897_v62 }
0x1b08   :  { %4567 = vmatprep.mubr.bf16.mxu0 %v7973_v54  ;;  %4536 = vmatpush1.bf16.msra.mxu0 %v4451_v2  ;;  %v7637_v2 = vld [vmem:[#allocation8 + $0x4c8] sm:$0xff]  }
0x1b09   :  { %6615 = vmatprep.subr.msk.bf16.mxu0 %vm230_vm3, %v7602_v16  ;;  %v7639_v16 = vld [vmem:[#allocation8 + $0x510] sm:$0xff]  }
0x1bce   :  { %v4066_v34 = vpop.f32.mrb[96].mxu1 }
0x1bcf   :  { %v7385_v22 = vpop.f32.mrb[97].mxu1 }
0x1bd0   :  { %v4069_v36 = vpop.f32.mrb[98].mxu1 }
0x1bd1   :  { %v7386_v38 = vpop.f32.mrb[99].mxu1  ;;  %v6592_v36 = vld [vmem:[#allocation10 + $0x1e] ss:$0 sm:$0xff] }
0x1bd2   :  { %v4114_v39 = vpop.f32.mrb[92].mxu0 }
0x1bd3   :  { %v4120_v42 = vpack.c.bf16 %v4114_v39, %v4066_v34  ;;  %v7391_v43 = vpop.f32.mrb[93].mxu0  ;;  %v7604_v39 = vld [vmem:[#allocation7 + $0x6c] ss:$156 sps:$4 sm:$0x3f]  }
0x1bd4   :  { %v4117_v44 = vpop.f32.mrb[94].mxu0 }
0x1bd5   :  { %v7392_v45 = vpop.f32.mrb[95].mxu0  ;;  %7396 = vmatmul.mubr.msk.bf16.vlgmr.msra.gmra.mrb[100].mxu1 %vm286_vm5, %v4120_v42  ;;  %v7605_v42 = vld [vmem:[#allocation7 + $0x74] ss:$156 sps:$4 sm:$0x3f]  }
0x1bd6   :  { %4524 = vmatprep.mubr.bf16.mxu1 %v7973_v54 }
0x1bda   :  { %v4214_v62 = vpop.f32.mrb[96].mxu0 }
0x1bdb   :  { %v7403_v47 = vpop.f32.mrb[97].mxu0 }
0x1bdc   :  { %v4217_v58 = vpop.f32.mrb[98].mxu0  ;;  %v4463_v47 = vsel %vm230_vm3, %v7605_v42, 0 }
0x1bdd   :  { %v7404_v48 = vpop.f32.mrb[99].mxu0 }
0x1bde   :  { %v7608_v48 = vld [vmem:[#allocation7 + $0x88] ss:$156 sps:$4 sm:$0x3f]  }
0x1ca8   :  { %v4167_v29 = vpop.f32.mrb[100].mxu1 }
0x1ca9   :  { %v4215_v30 = vadd.f32 %v4214_v62, %v4167_v29  ;;  %v7397_v50 = vpop.f32.mrb[101].mxu1  ;;  %v4457_v62 = vsel %vm230_vm3, %v7604_v39, 0  ;;  %v7610_v29 = vld [vmem:[#allocation7 + $0x7c] ss:$156 sps:$4 sm:$0x3f]  }
0x1caa   :  { %v4170_v51 = vpop.f32.mrb[102].mxu1 }
0x1cab   :  { %v4228_v53 = vadd.f32 %v6590_v49, %v4215_v30  ;;  %v4218_v55 = vadd.f32 %v4217_v58, %v4170_v51  ;;  %v7398_v56 = vpop.f32.mrb[103].mxu1  ;;  %v7606_v58 = vld [vmem:[#allocation7 + $0x80] ss:$156 sps:$4 sm:$0x3f]   ;;  %v4469_v30 = vsel %vm230_vm3, %v7610_v29, 0 }
0x1cac   :  { %v7612_v51 = vld [vmem:[#allocation7 + $0x90] ss:$156 sps:$4 sm:$0x3f]  }
0x1cad   :  { %v4229_v57 = vadd.f32 %v6590_v49, %v4218_v55  ;;  %v4230_v60 = vadd.f32 %v4228_v53, %v8422_v27  ;;  %v7611_v49 = vld [vmem:[#allocation7 + $0x84] ss:$156 sps:$4 sm:$0x3f]   ;;  %v7614_v53 = vld [vmem:[#allocation7 + $0x98] ss:$156 sps:$4 sm:$0x3f]  }
0x1cae   :  { %v4475_v50 = vsel %vm230_vm3, %v7611_v49, 0  ;;  %v7616_v55 = vld [vmem:[#allocation7 + $0x8c] ss:$156 sps:$4 sm:$0x3f]  }
0x1caf   :  { %v4232_v61 = vsel %vm226_vm4, %v4230_v60, 0.0  ;;  %v4231_v8 = vadd.f32 %v4229_v57, %v8424_v28  ;;  %v7596_v28 = vld [vmem:[#allocation7 + $0x5c] ss:$156 sps:$4 sm:$0x3f]   ;;  %v4481_v57 = vsel %vm230_vm3, %v7616_v55, 0 }
0x1cb0   :  { %4233 = vadd.xlane.f32.xlu1 %v4232_v61  ;;  %v4445_v12 = vsel %vm230_vm3, %v7596_v28, 0  ;;  %v7617_v56 = vld [vmem:[#allocation7 + $0x94] ss:$156 sps:$4 sm:$0x3f]   ;;  %v7618_v61 = vld [vmem:[#allocation8 + $0x468] sm:$0xff]   ;;  %v7633_v28 = vld [vmem:[#allocation8 + $0x4c0] sm:$0xff]  }
0x1cb1   :  { %v4235_v52 = vsel %vm226_vm4, %v4231_v8, 0.0  ;;  %4493 = vmatpush1.bf16.msra.mxu1 %v4445_v12  ;;  %v7636_v12 = vld [vmem:[#allocation8 + $0x448] sm:$0xff]  }
0x1cb2   :  { %4236 = vadd.xlane.f32.xlu0 %v4235_v52  ;;  %6613 = vmatprep.subr.msk.bf16.mxu1 %vm230_vm3, %v7600_v35  ;;  %v7620_v52 = vld [vmem:[#allocation8 + $0x428] sm:$0xff]   ;;  %v7638_v35 = vld [vmem:[#allocation8 + $0x490] sm:$0xff]  }
0x1d3d   :  { %v4234_v32 = vpop.xlane.xlu1 %4233 }
0x1d3e   :  { %v4238_v13 = vmul.f32 0.083333336, %v4234_v32  ;;  %v7621_v32 = vld [vmem:[#allocation8 + $0x4a8] sm:$0xff]  }
0x1d3f   :  { %v4237_v9 = vpop.xlane.xlu0 %4236 }
0x1d40   :  { %v4240_v46 = vsub.f32 %v4230_v60, %v4238_v13  ;;  %v4239_v37 = vmul.f32 0.083333336, %v4237_v9  ;;  %v4487_v60 = vsel %vm230_vm3, %v7617_v56, 0  ;;  %v7622_v13 = vld [vmem:[#allocation8 + $0x470] sm:$0xff]  }
0x1d41   :  { %v7623_v9 = vld [vmem:[#allocation8 + $0x4f0] sm:$0xff]  }
0x1d42   :  { %v4241_v6 = vsub.f32 %v4231_v8, %v4239_v37  ;;  %v4242_v59 = vmul.f32 %v4240_v46, %v4240_v46  ;;  %v7619_v8 = vld [vmem:[#allocation8 + $0x4e8] sm:$0xff]   ;;  %v7625_v37 = vld [vmem:[#allocation8 + $0x4b0] sm:$0xff]  }
0x1d44   :  { %v4244_v4 = vsel %vm226_vm4, %v4242_v59, 0.0  ;;  %v4243_v20 = vmul.f32 %v4241_v6, %v4241_v6  ;;  %v7627_v59 = vld [vmem:[#allocation8 + $0x4f8] sm:$0xff]  }
0x1d45   :  { %4245 = vadd.xlane.f32.xlu1 %v4244_v4  ;;  %v7629_v4 = vld [vmem:[#allocation8 + $0x4b8] sm:$0xff]  }
0x1d46   :  { %v4247_v27 = vsel %vm226_vm4, %v4243_v20, 0.0  ;;  %v7630_v20 = vld [vmem:[#allocation8 + $0x480] sm:$0xff]  }
0x1d47   :  { %4248 = vadd.xlane.f32.xlu0 %v4247_v27  ;;  %v7631_v27 = vld [vmem:[#allocation8 + $0x500] sm:$0xff]  }
0x1dd2   :  { %v4246_v17 = vpop.xlane.xlu1 %4245 }
0x1dd3   :  { %v4250_v5 = vmul.f32 0.083333336, %v4246_v17  ;;  %v7640_v17 = vld [vmem:[#allocation8 + $0x450] sm:$0xff]  }
0x1dd4   :  { %v4249_v18 = vpop.xlane.xlu0 %4248 }
0x1dd5   :  { %v4252_v19 = vadd.f32 1e-05, %v4250_v5  ;;  %v4251_v41 = vmul.f32 0.083333336, %v4249_v18  ;;  %v7641_v5 = vld [vmem:[#allocation8 + $0x4d0] sm:$0xff]   ;;  %v7642_v18 = vld [vmem:[#allocation8 + $0x498] sm:$0xff]  }
0x1dd7   :  { %7807 = vrsqrt.f32 %v4252_v19  ;;  %v4253_v25 = vadd.f32 1e-05, %v4251_v41  ;;  %v7643_v19 = vld [vmem:[#allocation8 + $0x518] sm:$0xff]  }
0x1dd8   :  { %v7644_v41 = vld [vmem:[#allocation8 + $0x458] sm:$0xff]  }
0x1dd9   :  { %7809 = vrsqrt.f32 %v4253_v25  ;;  %v7645_v25 = vld [vmem:[#allocation8 + $0x4d8] sm:$0xff]  }
0x1de1   :  { %v7808_v26 = vpop.eup %7807 }
0x1de2   :  { %v4256_v24 = vmul.f32 %v7808_v26, %v4240_v46  ;;  %v7624_v46 = vld [vmem:[#allocation8 + $0x430] sm:$0xff]   ;;  %v7646_v26 = vld [vmem:[#allocation8 + $0x4a0] sm:$0xff]  }
0x1de3   :  { %v7810_v33 = vpop.eup %7809 }
0x1de4   :  { %v4265_v34 = vmul.f32 %v6591_v31, %v4256_v24  ;;  %v4257_v22 = vmul.f32 %v7810_v33, %v4241_v6  ;;  %v7626_v6 = vld [vmem:[#allocation8 + $0x478] sm:$0xff]   ;;  %v7648_v24 = vld [vmem:[#allocation8 + $0x460] sm:$0xff]  }
0x1de5   :  { %v7649_v33 = vld [vmem:[#allocation8 + $0x4e0] sm:$0xff]  }
0x1de6   :  { %v4266_v38 = vmul.f32 %v6591_v31, %v4257_v22  ;;  %v8520_v43 = vadd.f32 %v6592_v36, %v4265_v34  ;;  %v7647_v31 = vld [vmem:[#allocation8 + $0x520] sm:$0xff]   ;;  %v7650_v34 = vld [vmem:[#allocation8 + $0x568] sm:$0xff]  }
0x1de7   :  { %v7651_v22 = vld [vmem:[#allocation8 + $0x5e8] sm:$0xff]  }
0x1de8   :  { %v8522_v44 = vadd.f32 %v6592_v36, %v4266_v38  ;;  %v4293_v36 = vld [vmem:[#allocation10 + $0x1f] sm:$0xff] }
0x1de9   :  { %v4300_v38 = vrot.slane %v4293_v36, %v8225_v63  ;;  %v4308_v39 = vrot.slane %v4293_v36, %v8227_v1  ;;  %v4304_v42 = vrot.slane %v4293_v36, %v8229_v40 }
0x1dea   :  { %v4292_v45 = vpack.c.bf16 %v8522_v44, %v8520_v43 }
0x1dec   :  { %6610 = vmatmul.mubr.msk.bf16.vlgmr.msra.gmra.mrb[104].mxu1 %vm226_vm4, %v4292_v45  ;;  %6612 = vmatmul.mubr.msk.bf16.vlgmr.msra.gmra.mrb[100].mxu0 %vm226_vm4, %v4292_v45 }
0x1ded   :  { %4579 = vmatpush1.bf16.msra.mxu1 %v4457_v62  ;;  %4622 = vmatpush1.bf16.msra.mxu0 %v4463_v47 }
0x1dee   :  { %4610 = vmatprep.mubr.bf16.mxu1 %v7973_v54  ;;  %4653 = vmatprep.mubr.bf16.mxu0 %v7973_v54 }
0x1def   :  { %6617 = vmatprep.subr.msk.bf16.mxu1 %vm230_vm3, %v7606_v58  ;;  %6619 = vmatprep.subr.msk.bf16.mxu0 %vm230_vm3, %v7608_v48 }
0x1df4   :  { %6614 = vmatmul.mubr.msk.bf16.vlgmr.msra.gmra.mrb[108].mxu1 %vm226_vm4, %v4292_v45  ;;  %6616 = vmatmul.mubr.msk.bf16.vlgmr.msra.gmra.mrb[104].mxu0 %vm226_vm4, %v4292_v45 }
0x1df5   :  { %4665 = vmatpush1.bf16.msra.mxu1 %v4469_v30  ;;  %4708 = vmatpush1.bf16.msra.mxu0 %v4475_v50 }
0x1df6   :  { %4696 = vmatprep.mubr.bf16.mxu1 %v7973_v54  ;;  %4739 = vmatprep.mubr.bf16.mxu0 %v7973_v54 }
0x1df7   :  { %6621 = vmatprep.subr.msk.bf16.mxu1 %vm230_vm3, %v7612_v51  ;;  %6623 = vmatprep.subr.msk.bf16.mxu0 %vm230_vm3, %v7614_v53 }
0x1dfc   :  { %6618 = vmatmul.mubr.msk.bf16.vlgmr.msra.gmra.mrb[112].mxu1 %vm226_vm4, %v4292_v45  ;;  %6620 = vmatmul.mubr.msk.bf16.vlgmr.msra.gmra.mrb[108].mxu0 %vm226_vm4, %v4292_v45 }
0x1dfd   :  { %4751 = vmatpush1.bf16.msra.mxu1 %v4481_v57  ;;  %4794 = vmatpush1.bf16.msra.mxu0 %v4487_v60 }
0x1dfe   :  { %4782 = vmatprep.mubr.bf16.mxu1 %v7973_v54  ;;  %4825 = vmatprep.mubr.bf16.mxu0 %v7973_v54  ;;  %v7628_v54 = vld [vmem:[#allocation8 + $0x438] sm:$0xff]  }
0x1dff   :  { %7009 = vmatprep.subr.bf16.mxu1 %v7618_v61  ;;  %7031 = vmatprep.subr.bf16.mxu0 %v7619_v8  ;;  %v4316_v61 = vrot.slane %v4293_v36, %v8237_v10  ;;  %v4324_v8 = vrot.slane %v4293_v36, %v8239_v11 }
0x1e04   :  { %6622 = vmatmul.mubr.msk.bf16.vlgmr.msra.gmra.mrb[116].mxu1 %vm226_vm4, %v4292_v45  ;;  %6624 = vmatmul.mubr.msk.bf16.vlgmr.msra.gmra.mrb[112].mxu0 %vm226_vm4, %v4292_v45  ;;  %v4312_v45 = vrot.slane %v4293_v36, %v8231_v3 }
0x1e05   :  { %7010 = vmatpush3.bf16.msra.mxu1 %v7620_v52  ;;  %7032 = vmatpush3.bf16.msra.mxu0 %v7621_v32 }
0x1e06   :  { %7011 = vmatprep.subr.bf16.mxu1 %v7622_v13  ;;  %7033 = vmatprep.subr.bf16.mxu0 %v7623_v9  ;;  %v4320_v13 = vrot.slane %v4293_v36, %v8241_v14  ;;  %v4328_v9 = vrot.slane %v4293_v36, %v8243_v15 }
0x1e09   :  { %7012 = vmatpush3.bf16.msra.mxu1 %v7624_v46  ;;  %7034 = vmatpush3.bf16.msra.mxu0 %v7625_v37 }
0x1e0a   :  { %7013 = vmatprep.subr.bf16.mxu1 %v7626_v6  ;;  %7035 = vmatprep.subr.bf16.mxu0 %v7627_v59 }
0x1e0d   :  { %7014 = vmatpush3.bf16.msra.mxu1 %v7628_v54  ;;  %7036 = vmatpush3.bf16.msra.mxu0 %v7629_v4 }
0x1e0e   :  { %7015 = vmatprep.subr.bf16.mxu1 %v7630_v20  ;;  %7037 = vmatprep.subr.bf16.mxu0 %v7631_v27 }
0x1e11   :  { %7016 = vmatpush3.bf16.msra.mxu1 %v7632_v23  ;;  %7038 = vmatpush3.bf16.msra.mxu0 %v7633_v28  ;;  %v8558_v23 = vld [vmem:[#allocation10 + $0x27] sm:$0xff] }
0x1e12   :  { %7017 = vmatprep.subr.bf16.mxu1 %v7634_v7  ;;  %7039 = vmatprep.subr.bf16.mxu0 %v7635_v21  ;;  %v4340_v36 = vrot.slane %v8558_v23, %v8227_v1 }
0x1e15   :  { %7018 = vmatpush3.bf16.msra.mxu1 %v7636_v12  ;;  %7040 = vmatpush3.bf16.msra.mxu0 %v7637_v2 }
0x1e16   :  { %7019 = vmatprep.subr.bf16.mxu1 %v7638_v35  ;;  %7041 = vmatprep.subr.bf16.mxu0 %v7639_v16  ;;  %v7652_v16 = vld [vmem:[#allocation8 + $0x528] sm:$0xff]  }
0x1e19   :  { %7020 = vmatpush3.bf16.msra.mxu1 %v7640_v17  ;;  %7042 = vmatpush3.bf16.msra.mxu0 %v7641_v5  ;;  %v7653_v17 = vld [vmem:[#allocation8 + $0x5a8] sm:$0xff]  }
0x1e1a   :  { %7021 = vmatprep.subr.bf16.mxu1 %v7642_v18  ;;  %7043 = vmatprep.subr.bf16.mxu0 %v7643_v19 }
0x1e1d   :  { %7022 = vmatpush3.bf16.msra.mxu1 %v7644_v41  ;;  %7044 = vmatpush3.bf16.msra.mxu0 %v7645_v25  ;;  %v7654_v25 = vld [vmem:[#allocation8 + $0x570] sm:$0xff]  }
0x1e1e   :  { %7023 = vmatprep.subr.bf16.mxu1 %v7646_v26  ;;  %7045 = vmatprep.subr.bf16.mxu0 %v7647_v31  ;;  %v7655_v26 = vld [vmem:[#allocation8 + $0x5f0] sm:$0xff]   ;;  %v4332_v31 = vrot.slane %v8558_v23, %v8225_v63 }
0x1e21   :  { %7024 = vmatpush3.bf16.msra.mxu1 %v7648_v24  ;;  %7046 = vmatpush3.bf16.msra.mxu0 %v7649_v33 }
0x1e22   :  { %7053 = vmatprep.subr.bf16.mxu1 %v7650_v34  ;;  %7075 = vmatprep.subr.bf16.mxu0 %v7651_v22 }
0x1ebf   :  { %v4526_v62 = vpop.f32.mrb[104].mxu1  ;;  %v4569_v47 = vpop.f32.mrb[100].mxu0 }
0x1ec0   :  { %v4527_v58 = vadd.f32 %v4526_v62, %v4300_v38  ;;  %v4570_v48 = vadd.f32 %v4569_v47, %v4308_v39  ;;  %v4528_v29 = vpop.f32.mrb[105].mxu1  ;;  %v4571_v49 = vpop.f32.mrb[101].mxu0  ;;  %v4336_v62 = vrot.slane %v8558_v23, %v8229_v40 }
0x1ec1   :  { %v4529_v30 = vadd.f32 %v4528_v29, %v4304_v42  ;;  %v4572_v50 = vadd.f32 %v4571_v49, %v4312_v45  ;;  %v4530_v51 = vpop.f32.mrb[106].mxu1  ;;  %v4573_v53 = vpop.f32.mrb[102].mxu0  ;;  %v4344_v29 = vrot.slane %v8558_v23, %v8231_v3 }
0x1ec2   :  { %v4531_v55 = vadd.f32 %v4530_v51, %v4300_v38  ;;  %v4574_v56 = vadd.f32 %v4573_v53, %v4308_v39  ;;  %v4532_v57 = vpop.f32.mrb[107].mxu1  ;;  %v4575_v60 = vpop.f32.mrb[103].mxu0  ;;  %v4836_v46 = vmax.f32 %v4527_v58, 0.0  ;;  %v4838_v37 = vmax.f32 %v4570_v48, 0.0  ;;  %v7656_v58 = vld [vmem:[#allocation8 + $0x530] sm:$0xff]   ;;  %v7658_v51 = vld [vmem:[#allocation8 + $0x578] sm:$0xff]  }
0x1ec3   :  { %v4533_v52 = vadd.f32 %v4532_v57, %v4304_v42  ;;  %v4576_v32 = vadd.f32 %v4575_v60, %v4312_v45  ;;  %v4837_v54 = vmax.f32 %v4529_v30, 0.0  ;;  %v4839_v4 = vmax.f32 %v4572_v50, 0.0  ;;  %v7657_v48 = vld [vmem:[#allocation8 + $0x5b0] sm:$0xff]   ;;  %v7659_v53 = vld [vmem:[#allocation8 + $0x5f8] sm:$0xff]  }
0x1ec4   :  { %v4852_v6 = vmax.f32 %v4531_v55, 0.0  ;;  %v4854_v59 = vmax.f32 %v4574_v56, 0.0 }
0x1ec5   :  { %v4853_v20 = vmax.f32 %v4533_v52, 0.0  ;;  %v4855_v27 = vmax.f32 %v4576_v32, 0.0 }
0x1ec6   :  { %v5124_v28 = vpack.c.bf16 %v4852_v6, %v4836_v46  ;;  %v5126_v7 = vpack.c.bf16 %v4854_v59, %v4838_v37 }
0x1ec7   :  { %v5125_v21 = vpack.c.bf16 %v4853_v20, %v4837_v54  ;;  %v5127_v12 = vpack.c.bf16 %v4855_v27, %v4839_v4  ;;  %v4612_v2 = vpop.f32.mrb[108].mxu1  ;;  %v4655_v35 = vpop.f32.mrb[104].mxu0  ;;  %v7662_v54 = vld [vmem:[#allocation8 + $0x580] sm:$0xff]  }
0x1ec8   :  { %v4613_v5 = vadd.f32 %v4612_v2, %v4316_v61  ;;  %v4656_v18 = vadd.f32 %v4655_v35, %v4324_v8  ;;  %v4614_v19 = vpop.f32.mrb[109].mxu1  ;;  %v4657_v41 = vpop.f32.mrb[105].mxu0  ;;  %v7663_v4 = vld [vmem:[#allocation8 + $0x600] sm:$0xff]  }
0x1ec9   :  { %v4615_v24 = vadd.f32 %v4614_v19, %v4320_v13  ;;  %v4658_v33 = vadd.f32 %v4657_v41, %v4328_v9  ;;  %v4616_v34 = vpop.f32.mrb[110].mxu1  ;;  %v4659_v22 = vpop.f32.mrb[106].mxu0  ;;  %5947 = vmatprep.mubr.bf16.mxu1 %v5125_v21  ;;  %5988 = vmatprep.mubr.bf16.mxu0 %v5127_v12  ;;  %v4348_v21 = vrot.slane %v8558_v23, %v8237_v10  ;;  %v7664_v41 = vld [vmem:[#allocation8 + $0x540] sm:$0xff]  }
0x1eca   :  { %v4617_v38 = vadd.f32 %v4616_v34, %v4316_v61  ;;  %v4660_v39 = vadd.f32 %v4659_v22, %v4324_v8  ;;  %v4618_v42 = vpop.f32.mrb[111].mxu1  ;;  %v4661_v45 = vpop.f32.mrb[107].mxu0  ;;  %5948 = vmatmul.mubr.bf16.vlgmr.msra.gmra.mrb[120].mxu1 %v5124_v28  ;;  %5989 = vmatmul.mubr.bf16.vlgmr.msra.gmra.mrb[116].mxu0 %v5126_v7  ;;  %v4840_v49 = vmax.f32 %v4613_v5, 0.0  ;;  %v4842_v1 = vmax.f32 %v4656_v18, 0.0  ;;  %v7666_v34 = vld [vmem:[#allocation8 + $0x588] sm:$0xff]  }
0x1ecb   :  { %v4619_v47 = vadd.f32 %v4618_v42, %v4320_v13  ;;  %v4662_v63 = vadd.f32 %v4661_v45, %v4328_v9  ;;  %7054 = vmatpush3.bf16.msra.mxu1 %v7652_v16  ;;  %7076 = vmatpush3.bf16.msra.mxu0 %v7653_v17  ;;  %v4841_v55 = vmax.f32 %v4615_v24, 0.0  ;;  %v4843_v56 = vmax.f32 %v4658_v33, 0.0  ;;  %v7660_v13 = vld [vmem:[#allocation8 + $0x538] sm:$0xff]  }
0x1ecc   :  { %v4856_v30 = vmax.f32 %v4617_v38, 0.0  ;;  %v4858_v50 = vmax.f32 %v4660_v39, 0.0  ;;  %7055 = vmatprep.subr.bf16.mxu1 %v7654_v25  ;;  %7077 = vmatprep.subr.bf16.mxu0 %v7655_v26  ;;  %v7661_v9 = vld [vmem:[#allocation8 + $0x5b8] sm:$0xff]   ;;  %v4356_v17 = vrot.slane %v8558_v23, %v8239_v11  ;;  %v4352_v5 = vrot.slane %v8558_v23, %v8241_v14  ;;  %v7665_v25 = vld [vmem:[#allocation8 + $0x5c0] sm:$0xff]   ;;  %v7667_v11 = vld [vmem:[#allocation8 + $0x608] sm:$0xff]  }
0x1ecd   :  { %v4857_v40 = vmax.f32 %v4619_v47, 0.0  ;;  %v4859_v57 = vmax.f32 %v4662_v63, 0.0  ;;  %v4360_v26 = vrot.slane %v8558_v23, %v8243_v15  ;;  %v7668_v47 = vld [vmem:[#allocation8 + $0x548] sm:$0xff]  }
0x1ece   :  { %v8568_v60 = vpack.c.bf16 %v4856_v30, %v4840_v49  ;;  %v8570_v61 = vpack.c.bf16 %v4858_v50, %v4842_v1  ;;  %v7669_v63 = vld [vmem:[#allocation8 + $0x5c8] sm:$0xff]   ;;  %v7670_v1 = vld [vmem:[#allocation8 + $0x590] sm:$0xff]  }
0x1ecf   :  { %v5129_v8 = vpack.c.bf16 %v4857_v40, %v4841_v55  ;;  %v5131_v52 = vpack.c.bf16 %v4859_v57, %v4843_v56  ;;  %7056 = vmatpush3.bf16.msra.mxu1 %v7656_v58  ;;  %7078 = vmatpush3.bf16.msra.mxu0 %v7657_v48  ;;  %v4698_v3 = vpop.f32.mrb[112].mxu1  ;;  %v4741_v32 = vpop.f32.mrb[108].mxu0  ;;  %v7671_v30 = vld [vmem:[#allocation8 + $0x610] sm:$0xff]  }
0x1ed0   :  { %v4699_v46 = vadd.f32 %v4698_v3, %v4332_v31  ;;  %v4742_v37 = vadd.f32 %v4741_v32, %v4340_v36  ;;  %v4700_v6 = vpop.f32.mrb[113].mxu1  ;;  %v4743_v59 = vpop.f32.mrb[109].mxu0  ;;  %7057 = vmatprep.subr.bf16.mxu1 %v7658_v51  ;;  %7079 = vmatprep.subr.bf16.mxu0 %v7659_v53  ;;  %v7672_v32 = vld [vmem:[#allocation8 + $0x550] sm:$0xff]  }
0x1ed1   :  { %v4701_v20 = vadd.f32 %v4700_v6, %v4336_v62  ;;  %v4744_v27 = vadd.f32 %v4743_v59, %v4344_v29  ;;  %v4702_v28 = vpop.f32.mrb[114].mxu1  ;;  %v4745_v7 = vpop.f32.mrb[110].mxu0  ;;  %6029 = vmatprep.mubr.bf16.mxu1 %v5129_v8  ;;  %6070 = vmatprep.mubr.bf16.mxu0 %v5131_v52  ;;  %v7674_v59 = vld [vmem:[#allocation8 + $0x598] sm:$0xff]  }
0x1ed2   :  { %v4703_v12 = vadd.f32 %v4702_v28, %v4332_v31  ;;  %v4746_v2 = vadd.f32 %v4745_v7, %v4340_v36  ;;  %v4704_v35 = vpop.f32.mrb[115].mxu1  ;;  %v4747_v16 = vpop.f32.mrb[111].mxu0  ;;  %v4844_v10 = vmax.f32 %v4699_v46, 0.0  ;;  %v4846_v31 = vmax.f32 %v4742_v37, 0.0 }
0x1ed3   :  { %v4705_v18 = vadd.f32 %v4704_v35, %v4336_v62  ;;  %v4748_v19 = vadd.f32 %v4747_v16, %v4344_v29  ;;  %7058 = vmatpush3.bf16.msra.mxu1 %v7660_v13  ;;  %7080 = vmatpush3.bf16.msra.mxu0 %v7661_v9  ;;  %v4845_v22 = vmax.f32 %v4701_v20, 0.0  ;;  %v4847_v36 = vmax.f32 %v4744_v27, 0.0  ;;  %v7673_v13 = vld [vmem:[#allocation8 + $0x5d0] sm:$0xff]   ;;  %v7676_v35 = vld [vmem:[#allocation8 + $0x558] sm:$0xff]  }
0x1ed4   :  { %v4860_v24 = vmax.f32 %v4703_v12, 0.0  ;;  %v4862_v33 = vmax.f32 %v4746_v2, 0.0  ;;  %7059 = vmatprep.subr.bf16.mxu1 %v7662_v54  ;;  %7081 = vmatprep.subr.bf16.mxu0 %v7663_v4  ;;  %v7675_v54 = vld [vmem:[#allocation8 + $0x618] sm:$0xff]  }
0x1ed5   :  { %v4861_v14 = vmax.f32 %v4705_v18, 0.0  ;;  %v4863_v38 = vmax.f32 %v4748_v19, 0.0  ;;  %v7677_v16 = vld [vmem:[#allocation8 + $0x5d8] sm:$0xff]   ;;  %v7680_v18 = vld [vmem:[#allocation8 + $0x560] sm:$0xff]  }
0x1ed6   :  { %v8580_v39 = vpack.c.bf16 %v4860_v24, %v4844_v10  ;;  %v8582_v42 = vpack.c.bf16 %v4862_v33, %v4846_v31  ;;  %v7681_v19 = vld [vmem:[#allocation8 + $0x5e0] sm:$0xff]   ;;  %v7685_v10 = vld [vmem:[#allocation8 + $0x6a8] sm:$0xff]   ;;  %v7686_v31 = vld [vmem:[#allocation8 + $0x670] sm:$0xff]  }
0x1ed7   :  { %v8584_v45 = vpack.c.bf16 %v4861_v14, %v4845_v22  ;;  %v8586_v62 = vpack.c.bf16 %v4863_v38, %v4847_v36  ;;  %7060 = vmatpush3.bf16.msra.mxu1 %v7664_v41  ;;  %7082 = vmatpush3.bf16.msra.mxu0 %v7665_v25  ;;  %v4784_v15 = vpop.f32.mrb[116].mxu1  ;;  %v4827_v23 = vpop.f32.mrb[112].mxu0  ;;  %v7682_v41 = vld [vmem:[#allocation8 + $0x668] sm:$0xff]   ;;  %v7687_v24 = vld [vmem:[#allocation8 + $0x6f0] sm:$0xff]   ;;  %v7691_v22 = vld [vmem:[#allocation8 + $0x6f8] sm:$0xff]  }
0x1ed8   :  { %v4785_v58 = vadd.f32 %v4784_v15, %v4348_v21  ;;  %v4828_v48 = vadd.f32 %v4827_v23, %v4356_v17  ;;  %v4786_v29 = vpop.f32.mrb[117].mxu1  ;;  %v4829_v49 = vpop.f32.mrb[113].mxu0  ;;  %7061 = vmatprep.subr.bf16.mxu1 %v7666_v34  ;;  %7083 = vmatprep.subr.bf16.mxu0 %v7667_v11  ;;  %v7683_v25 = vld [vmem:[#allocation8 + $0x6e8] sm:$0xff]   ;;  %v7688_v33 = vld [vmem:[#allocation8 + $0x630] sm:$0xff]   ;;  %v7690_v11 = vld [vmem:[#allocation8 + $0x678] sm:$0xff]  }
0x1ed9   :  { %v4787_v50 = vadd.f32 %v4786_v29, %v4352_v5  ;;  %v4830_v51 = vadd.f32 %v4829_v49, %v4360_v26  ;;  %v4788_v53 = vpop.f32.mrb[118].mxu1  ;;  %v4831_v55 = vpop.f32.mrb[114].mxu0  ;;  %v7689_v34 = vld [vmem:[#allocation8 + $0x6b0] sm:$0xff]   ;;  %v7692_v36 = vld [vmem:[#allocation8 + $0x638] sm:$0xff]   ;;  %v7696_v38 = vld [vmem:[#allocation8 + $0x640] sm:$0xff]  }
0x1eda   :  { %v4789_v56 = vadd.f32 %v4788_v53, %v4348_v21  ;;  %v4832_v40 = vadd.f32 %v4831_v55, %v4356_v17  ;;  %v4790_v57 = vpop.f32.mrb[119].mxu1  ;;  %v4833_v8 = vpop.f32.mrb[115].mxu0  ;;  %v4848_v9 = vmax.f32 %v4785_v58, 0.0  ;;  %v4850_v46 = vmax.f32 %v4828_v48, 0.0  ;;  %v7678_v17 = vld [vmem:[#allocation8 + $0x5a0] sm:$0xff]   ;;  %v7693_v14 = vld [vmem:[#allocation8 + $0x6b8] sm:$0xff]  }
0x1edb   :  { %v4791_v52 = vadd.f32 %v4790_v57, %v4352_v5  ;;  %v4834_v3 = vadd.f32 %v4833_v8, %v4360_v26  ;;  %7062 = vmatpush3.bf16.msra.mxu1 %v7668_v47  ;;  %7084 = vmatpush3.bf16.msra.mxu0 %v7669_v63  ;;  %v4849_v4 = vmax.f32 %v4787_v50, 0.0  ;;  %v4851_v20 = vmax.f32 %v4830_v51, 0.0  ;;  %v7679_v5 = vld [vmem:[#allocation8 + $0x620] sm:$0xff]   ;;  %v7684_v26 = vld [vmem:[#allocation8 + $0x628] sm:$0xff]   ;;  %v7702_v63 = vld [vmem:[#allocation8 + $0x690] sm:$0xff]  }
0x1edc   :  { %v4864_v37 = vmax.f32 %v4789_v56, 0.0  ;;  %v4866_v6 = vmax.f32 %v4832_v40, 0.0  ;;  %7063 = vmatprep.subr.bf16.mxu1 %v7670_v1  ;;  %7085 = vmatprep.subr.bf16.mxu0 %v7671_v30  ;;  %v7698_v15 = vld [vmem:[#allocation8 + $0x688] sm:$0xff]   ;;  %v7703_v58 = vld [vmem:[#allocation8 + $0x710] sm:$0xff]   ;;  %v7706_v49 = vld [vmem:[#allocation8 + $0x698] sm:$0xff]  }
0x1edd   :  { %v4865_v27 = vmax.f32 %v4791_v52, 0.0  ;;  %v4867_v28 = vmax.f32 %v4834_v3, 0.0  ;;  %v7700_v23 = vld [vmem:[#allocation8 + $0x648] sm:$0xff]   ;;  %v7704_v48 = vld [vmem:[#allocation8 + $0x650] sm:$0xff]   ;;  %v7707_v1 = vld [vmem:[#allocation8 + $0x718] sm:$0xff]  }
0x1ede   :  { %v8588_v7 = vpack.c.bf16 %v4864_v37, %v4848_v9  ;;  %v8590_v21 = vpack.c.bf16 %v4866_v6, %v4850_v46  ;;  %v7701_v47 = vld [vmem:[#allocation8 + $0x6c8] sm:$0xff]   ;;  %v7705_v29 = vld [vmem:[#allocation8 + $0x6d0] sm:$0xff]   ;;  %v7708_v30 = vld [vmem:[#allocation8 + $0x658] sm:$0xff]  }
0x1edf   :  { %v8592_v12 = vpack.c.bf16 %v4865_v27, %v4849_v4  ;;  %v8594_v2 = vpack.c.bf16 %v4867_v28, %v4851_v20  ;;  %7064 = vmatpush3.bf16.msra.mxu1 %v7672_v32  ;;  %7086 = vmatpush3.bf16.msra.mxu0 %v7673_v13  ;;  %v7709_v50 = vld [vmem:[#allocation8 + $0x6d8] sm:$0xff]   ;;  %v7710_v51 = vld [vmem:[#allocation8 + $0x6a0] sm:$0xff]   ;;  %v7714_v40 = vld [vmem:[#allocation8 + $0x768] sm:$0xff]  }
0x1ee0   :  { %7065 = vmatprep.subr.bf16.mxu1 %v7674_v59  ;;  %7087 = vmatprep.subr.bf16.mxu0 %v7675_v54  ;;  %v7711_v53 = vld [vmem:[#allocation8 + $0x720] sm:$0xff]   ;;  %v7715_v57 = vld [vmem:[#allocation8 + $0x7e8] sm:$0xff]   ;;  %v7718_v3 = vld [vmem:[#allocation8 + $0x770] sm:$0xff]  }
0x1ee1   :  { %v7712_v55 = vld [vmem:[#allocation8 + $0x660] sm:$0xff]   ;;  %v7716_v8 = vld [vmem:[#allocation8 + $0x728] sm:$0xff]   ;;  %v7719_v32 = vld [vmem:[#allocation8 + $0x7f0] sm:$0xff]  }
0x1ee2   :  { %v7713_v56 = vld [vmem:[#allocation8 + $0x6e0] sm:$0xff]   ;;  %v7717_v52 = vld [vmem:[#allocation8 + $0x7a8] sm:$0xff]   ;;  %v7720_v13 = vld [vmem:[#allocation8 + $0x730] sm:$0xff]  }
0x1ee3   :  { %7066 = vmatpush3.bf16.msra.mxu1 %v7676_v35  ;;  %7088 = vmatpush3.bf16.msra.mxu0 %v7677_v16  ;;  %v7721_v9 = vld [vmem:[#allocation8 + $0x7b0] sm:$0xff]   ;;  %v7722_v46 = vld [vmem:[#allocation8 + $0x778] sm:$0xff]   ;;  %v7726_v59 = vld [vmem:[#allocation8 + $0x780] sm:$0xff]  }
0x1ee4   :  { %7067 = vmatprep.subr.bf16.mxu1 %v7678_v17  ;;  %7089 = vmatprep.subr.bf16.mxu0 %v7679_v5  ;;  %v7723_v37 = vld [vmem:[#allocation8 + $0x7f8] sm:$0xff]   ;;  %v7728_v54 = vld [vmem:[#allocation8 + $0x740] sm:$0xff]   ;;  %v7730_v20 = vld [vmem:[#allocation8 + $0x788] sm:$0xff]  }
0x1ee5   :  { %v7724_v6 = vld [vmem:[#allocation8 + $0x738] sm:$0xff]   ;;  %v7729_v4 = vld [vmem:[#allocation8 + $0x7c0] sm:$0xff]   ;;  %v7731_v27 = vld [vmem:[#allocation8 + $0x808] sm:$0xff]  }
0x1ee6   :  { %v7732_v28 = vld [vmem:[#allocation8 + $0x748] sm:$0xff]   ;;  %v7735_v35 = vld [vmem:[#allocation8 + $0x810] sm:$0xff]   ;;  %v7738_v5 = vld [vmem:[#allocation8 + $0x798] sm:$0xff]  }
0x1ee7   :  { %7068 = vmatpush3.bf16.msra.mxu1 %v7680_v18  ;;  %7090 = vmatpush3.bf16.msra.mxu0 %v7681_v19  ;;  %v7736_v16 = vld [vmem:[#allocation8 + $0x750] sm:$0xff]   ;;  %v7739_v18 = vld [vmem:[#allocation8 + $0x818] sm:$0xff]  }
0x1ee8   :  { %7097 = vmatprep.subr.bf16.mxu1 %v7682_v41  ;;  %7119 = vmatprep.subr.bf16.mxu0 %v7683_v25  ;;  %v7737_v17 = vld [vmem:[#allocation8 + $0x7d0] sm:$0xff]   ;;  %v7740_v19 = vld [vmem:[#allocation8 + $0x758] sm:$0xff]   ;;  %v7742_v25 = vld [vmem:[#allocation8 + $0x7a0] sm:$0xff]  }
0x1ee9   :  { %v7741_v41 = vld [vmem:[#allocation8 + $0x7d8] sm:$0xff]  }
0x1eea   :  { %6030 = vmatmul.mubr.bf16.vlgmr.msra.gmra.mrb[124].mxu1 %v8568_v60  ;;  %6071 = vmatmul.mubr.bf16.vlgmr.msra.gmra.mrb[120].mxu0 %v8570_v61  ;;  %v7694_v60 = vld [vmem:[#allocation8 + $0x680] sm:$0xff]  }
0x1eeb   :  { %7098 = vmatpush3.bf16.msra.mxu1 %v7684_v26  ;;  %6111 = vmatprep.mubr.bf16.mxu1 %v8584_v45  ;;  %v7695_v61 = vld [vmem:[#allocation8 + $0x700] sm:$0xff]  }
0x1eec   :  { %7120 = vmatpush3.bf16.msra.mxu0 %v7685_v10  ;;  %6152 = vmatprep.mubr.bf16.mxu0 %v8586_v62  ;;  %v7697_v45 = vld [vmem:[#allocation8 + $0x6c0] sm:$0xff]   ;;  %v7699_v62 = vld [vmem:[#allocation8 + $0x708] sm:$0xff]  }
0x1eed   :  { %7099 = vmatprep.subr.bf16.mxu1 %v7686_v31  ;;  %7121 = vmatprep.subr.bf16.mxu0 %v7687_v24  ;;  %v7743_v26 = vld [vmem:[#allocation8 + $0x820] sm:$0xff]  }
0x1eee   :  { %v7744_v10 = vld [vmem:[#allocation8 + $0x760] sm:$0xff]  }
0x1eef   :  { %7100 = vmatpush3.bf16.msra.mxu1 %v7688_v33  ;;  %v7745_v31 = vld [vmem:[#allocation8 + $0x7e0] sm:$0xff]  }
0x1ef0   :  { %7122 = vmatpush3.bf16.msra.mxu0 %v7689_v34  ;;  %7101 = vmatprep.subr.bf16.mxu1 %v7690_v11  ;;  %v6625_v34 = vld [vmem:[#allocation10 + $0x2f] ss:$0 sm:$0xff] }
0x1ef1   :  { %7123 = vmatprep.subr.bf16.mxu0 %v7691_v22 }
0x1ef3   :  { %7102 = vmatpush3.bf16.msra.mxu1 %v7692_v36 }
0x1ef4   :  { %7124 = vmatpush3.bf16.msra.mxu0 %v7693_v14  ;;  %7103 = vmatprep.subr.bf16.mxu1 %v7694_v60 }
0x1ef5   :  { %7125 = vmatprep.subr.bf16.mxu0 %v7695_v61 }
0x1ef7   :  { %7104 = vmatpush3.bf16.msra.mxu1 %v7696_v38 }
0x1ef8   :  { %7126 = vmatpush3.bf16.msra.mxu0 %v7697_v45  ;;  %7105 = vmatprep.subr.bf16.mxu1 %v7698_v15 }
0x1ef9   :  { %7127 = vmatprep.subr.bf16.mxu0 %v7699_v62 }
0x1efb   :  { %7106 = vmatpush3.bf16.msra.mxu1 %v7700_v23 }
0x1efc   :  { %7128 = vmatpush3.bf16.msra.mxu0 %v7701_v47  ;;  %7107 = vmatprep.subr.bf16.mxu1 %v7702_v63 }
0x1efd   :  { %7129 = vmatprep.subr.bf16.mxu0 %v7703_v58 }
0x1eff   :  { %7108 = vmatpush3.bf16.msra.mxu1 %v7704_v48 }
0x1f00   :  { %7130 = vmatpush3.bf16.msra.mxu0 %v7705_v29  ;;  %7109 = vmatprep.subr.bf16.mxu1 %v7706_v49 }
0x1f01   :  { %7131 = vmatprep.subr.bf16.mxu0 %v7707_v1 }
0x1f03   :  { %7110 = vmatpush3.bf16.msra.mxu1 %v7708_v30 }
0x1f04   :  { %7132 = vmatpush3.bf16.msra.mxu0 %v7709_v50  ;;  %7111 = vmatprep.subr.bf16.mxu1 %v7710_v51 }
0x1f05   :  { %7133 = vmatprep.subr.bf16.mxu0 %v7711_v53 }
0x1f07   :  { %7112 = vmatpush3.bf16.msra.mxu1 %v7712_v55 }
0x1f08   :  { %7134 = vmatpush3.bf16.msra.mxu0 %v7713_v56  ;;  %7141 = vmatprep.subr.bf16.mxu1 %v7714_v40 }
0x1f09   :  { %7163 = vmatprep.subr.bf16.mxu0 %v7715_v57 }
0x1f0a   :  { %6112 = vmatmul.mubr.bf16.vlgmr.msra.gmra.mrb[128].mxu1 %v8580_v39  ;;  %v7725_v39 = vld [vmem:[#allocation8 + $0x7b8] sm:$0xff]  }
0x1f0b   :  { %6153 = vmatmul.mubr.bf16.vlgmr.msra.gmra.mrb[124].mxu0 %v8582_v42  ;;  %7142 = vmatpush3.bf16.msra.mxu1 %v7716_v8  ;;  %v7727_v42 = vld [vmem:[#allocation8 + $0x800] sm:$0xff]  }
0x1f0c   :  { %6193 = vmatprep.mubr.bf16.mxu1 %v8592_v12  ;;  %7164 = vmatpush3.bf16.msra.mxu0 %v7717_v52  ;;  %v7733_v12 = vld [vmem:[#allocation8 + $0x7c8] sm:$0xff]  }
0x1f0d   :  { %6234 = vmatprep.mubr.bf16.mxu0 %v8594_v2  ;;  %7143 = vmatprep.subr.bf16.mxu1 %v7718_v3  ;;  %v7734_v2 = vld [vmem:[#allocation8 + $0x790] sm:$0xff]  }
0x1f0e   :  { %7165 = vmatprep.subr.bf16.mxu0 %v7719_v32 }
0x1f0f   :  { %7144 = vmatpush3.bf16.msra.mxu1 %v7720_v13 }
0x1f10   :  { %7166 = vmatpush3.bf16.msra.mxu0 %v7721_v9  ;;  %7145 = vmatprep.subr.bf16.mxu1 %v7722_v46 }
0x1f11   :  { %7167 = vmatprep.subr.bf16.mxu0 %v7723_v37 }
0x1f13   :  { %7146 = vmatpush3.bf16.msra.mxu1 %v7724_v6 }
0x1f14   :  { %7168 = vmatpush3.bf16.msra.mxu0 %v7725_v39  ;;  %7147 = vmatprep.subr.bf16.mxu1 %v7726_v59 }
0x1f15   :  { %7169 = vmatprep.subr.bf16.mxu0 %v7727_v42 }
0x1f17   :  { %7148 = vmatpush3.bf16.msra.mxu1 %v7728_v54 }
0x1f18   :  { %7170 = vmatpush3.bf16.msra.mxu0 %v7729_v4  ;;  %7149 = vmatprep.subr.bf16.mxu1 %v7730_v20 }
0x1f19   :  { %7171 = vmatprep.subr.bf16.mxu0 %v7731_v27 }
0x1f1b   :  { %7150 = vmatpush3.bf16.msra.mxu1 %v7732_v28 }
0x1f1c   :  { %7172 = vmatpush3.bf16.msra.mxu0 %v7733_v12  ;;  %7151 = vmatprep.subr.bf16.mxu1 %v7734_v2 }
0x1f1d   :  { %7173 = vmatprep.subr.bf16.mxu0 %v7735_v35 }
0x1f1f   :  { %7152 = vmatpush3.bf16.msra.mxu1 %v7736_v16 }
0x1f20   :  { %7174 = vmatpush3.bf16.msra.mxu0 %v7737_v17  ;;  %7153 = vmatprep.subr.bf16.mxu1 %v7738_v5 }
0x1f21   :  { %7175 = vmatprep.subr.bf16.mxu0 %v7739_v18 }
0x1f23   :  { %7154 = vmatpush3.bf16.msra.mxu1 %v7740_v19 }
0x1f24   :  { %7176 = vmatpush3.bf16.msra.mxu0 %v7741_v41  ;;  %7155 = vmatprep.subr.bf16.mxu1 %v7742_v25 }
0x1f25   :  { %7177 = vmatprep.subr.bf16.mxu0 %v7743_v26 }
0x1f27   :  { %7156 = vmatpush3.bf16.msra.mxu1 %v7744_v10 }
0x1f28   :  { %7178 = vmatpush3.bf16.msra.mxu0 %v7745_v31  ;;  %7405 = vmatprep.subr.bf16.mxu1 %v7966_v0 }
0x1f2a   :  { %6194 = vmatmul.mubr.bf16.vlgmr.msra.gmra.mrb[132].mxu1 %v8588_v7 }
0x1f2b   :  { %6235 = vmatmul.mubr.bf16.vlgmr.msra.gmra.mrb[128].mxu0 %v8590_v21  ;;  %7407 = vmatprep.mubr.msk.bf16.mxu1 %vm7967_vm0, %v7966_v0 }
0x1f9d   :  { %v7025_v24 = vpop.f32.mrb[120].mxu1  ;;  %v7047_v33 = vpop.f32.mrb[116].mxu0 }
0x1f9e   :  { %v7026_v11 = vpop.f32.mrb[121].mxu1  ;;  %v7048_v22 = vpop.f32.mrb[117].mxu0 }
0x1f9f   :  { %v7027_v36 = vadd.f32 %v7026_v11, %v7025_v24  ;;  %v7049_v14 = vadd.f32 %v7048_v22, %v7047_v33  ;;  %v7028_v60 = vpop.f32.mrb[122].mxu1  ;;  %v7050_v61 = vpop.f32.mrb[118].mxu0 }
0x1fa0   :  { %v7029_v38 = vpop.f32.mrb[123].mxu1  ;;  %v7051_v45 = vpop.f32.mrb[119].mxu0 }
0x1fa1   :  { %v5950_v15 = vadd.f32 %v7027_v36, %v6625_v34  ;;  %v7030_v62 = vadd.f32 %v7029_v38, %v7028_v60  ;;  %v7052_v23 = vadd.f32 %v7051_v45, %v7050_v61 }
0x1fa3   :  { %v5991_v7 = vadd.f32 %v7049_v14, %v5950_v15  ;;  %v5953_v47 = vadd.f32 %v7030_v62, %v6625_v34 }
0x1fa5   :  { %v5994_v21 = vadd.f32 %v7052_v23, %v5953_v47 }
0x1fbd   :  { %v7069_v63 = vpop.f32.mrb[124].mxu1  ;;  %v7091_v58 = vpop.f32.mrb[120].mxu0 }
0x1fbe   :  { %v7070_v0 = vpop.f32.mrb[125].mxu1  ;;  %v7092_v48 = vpop.f32.mrb[121].mxu0 }
0x1fbf   :  { %v7071_v29 = vadd.f32 %v7070_v0, %v7069_v63  ;;  %v7093_v49 = vadd.f32 %v7092_v48, %v7091_v58  ;;  %v7072_v1 = vpop.f32.mrb[126].mxu1  ;;  %v7094_v30 = vpop.f32.mrb[122].mxu0 }
0x1fc0   :  { %v7073_v50 = vpop.f32.mrb[127].mxu1  ;;  %v7095_v51 = vpop.f32.mrb[123].mxu0 }
0x1fc1   :  { %v6032_v53 = vadd.f32 %v7071_v29, %v5991_v7  ;;  %v7074_v55 = vadd.f32 %v7073_v50, %v7072_v1  ;;  %v7096_v56 = vadd.f32 %v7095_v51, %v7094_v30  ;;  %v6754_v30 = vld [vmem:[#allocation10 + $0x30] ss:$0 sm:$0xff] }
0x1fc3   :  { %v6073_v40 = vadd.f32 %v7093_v49, %v6032_v53  ;;  %v6035_v57 = vadd.f32 %v7074_v55, %v5994_v21  ;;  %v7746_v21 = vld [vmem:[#allocation7 + $0x18] ss:$156 sps:$4 sm:$0x3f]  }
0x1fc5   :  { %v6076_v8 = vadd.f32 %v7096_v56, %v6035_v57  ;;  %v6755_v56 = vld [vmem:[#allocation10 + $0x31] ss:$0 sm:$0xff] }
0x1fdd   :  { %v7113_v52 = vpop.f32.mrb[128].mxu1 }
0x1fde   :  { %v7135_v3 = vpop.f32.mrb[124].mxu0  ;;  %v7114_v32 = vpop.f32.mrb[129].mxu1 }
0x1fdf   :  { %v7115_v13 = vadd.f32 %v7114_v32, %v7113_v52  ;;  %v7136_v9 = vpop.f32.mrb[125].mxu0  ;;  %v7116_v46 = vpop.f32.mrb[130].mxu1 }
0x1fe0   :  { %v7137_v37 = vadd.f32 %v7136_v9, %v7135_v3  ;;  %v7138_v6 = vpop.f32.mrb[126].mxu0  ;;  %v7117_v39 = vpop.f32.mrb[131].mxu1  ;;  %v6756_v3 = vld [vmem:[#allocation10 + $0x32] ss:$0 sm:$0xff] }
0x1fe1   :  { %v6114_v59 = vadd.f32 %v7115_v13, %v6073_v40  ;;  %v7118_v42 = vadd.f32 %v7117_v39, %v7116_v46  ;;  %v7139_v54 = vpop.f32.mrb[127].mxu0 }
0x1fe2   :  { %v7140_v4 = vadd.f32 %v7139_v54, %v7138_v6 }
0x1fe3   :  { %v6155_v20 = vadd.f32 %v7137_v37, %v6114_v59  ;;  %v6117_v27 = vadd.f32 %v7118_v42, %v6076_v8 }
0x1fe5   :  { %v6158_v28 = vadd.f32 %v7140_v4, %v6117_v27 }
0x1ffd   :  { %v7157_v12 = vpop.f32.mrb[132].mxu1 }
0x1ffe   :  { %v7179_v2 = vpop.f32.mrb[128].mxu0  ;;  %v7158_v35 = vpop.f32.mrb[133].mxu1 }
0x1fff   :  { %v7159_v16 = vadd.f32 %v7158_v35, %v7157_v12  ;;  %v7180_v17 = vpop.f32.mrb[129].mxu0  ;;  %v7160_v5 = vpop.f32.mrb[134].mxu1 }
0x2000   :  { %v7181_v18 = vadd.f32 %v7180_v17, %v7179_v2  ;;  %v7182_v19 = vpop.f32.mrb[130].mxu0  ;;  %v7161_v41 = vpop.f32.mrb[135].mxu1 }
0x2001   :  { %v6196_v25 = vadd.f32 %v7159_v16, %v6155_v20  ;;  %v7162_v26 = vadd.f32 %v7161_v41, %v7160_v5  ;;  %v7183_v10 = vpop.f32.mrb[131].mxu0 }
0x2002   :  { %v7184_v31 = vadd.f32 %v7183_v10, %v7182_v19 }
0x2003   :  { %v6237_v24 = vadd.f32 %v7181_v18, %v6196_v25  ;;  %v6199_v33 = vadd.f32 %v7162_v26, %v6158_v28 }
0x2005   :  { %v6240_v34 = vadd.f32 %v7184_v31, %v6199_v33  ;;  %v6243_v11 = vadd.f32 %v6237_v24, %v8520_v43 }
0x2007   :  { %v6245_v22 = vsel %vm226_vm4, %v6243_v11, 0.0  ;;  %v6244_v36 = vadd.f32 %v6240_v34, %v8522_v44  ;;  %v6308_v44 = vsel %vm230_vm3, %v7746_v21, 0 }
0x2008   :  { %6246 = vadd.xlane.f32.xlu1 %v6245_v22  ;;  %7406 = vmatpush3.bf16.msra.mxu1 %v6308_v44 }
0x2009   :  { %v6248_v14 = vsel %vm226_vm4, %v6244_v36, 0.0 }
0x200a   :  { %6249 = vadd.xlane.f32.xlu0 %v6248_v14 }
0x2095   :  { %v6247_v60 = vpop.xlane.xlu1 %6246 }
0x2096   :  { %v6251_v61 = vmul.f32 0.083333336, %v6247_v60 }
0x2097   :  { %v6250_v38 = vpop.xlane.xlu0 %6249 }
0x2098   :  { %v6253_v45 = vsub.f32 %v6243_v11, %v6251_v61  ;;  %v6252_v15 = vmul.f32 0.083333336, %v6250_v38 }
0x209a   :  { %v6254_v62 = vsub.f32 %v6244_v36, %v6252_v15  ;;  %v6255_v23 = vmul.f32 %v6253_v45, %v6253_v45 }
0x209c   :  { %v6257_v7 = vsel %vm226_vm4, %v6255_v23, 0.0  ;;  %v6256_v47 = vmul.f32 %v6254_v62, %v6254_v62 }
0x209d   :  { %6258 = vadd.xlane.f32.xlu1 %v6257_v7 }
0x209e   :  { %v6260_v43 = vsel %vm226_vm4, %v6256_v47, 0.0 }
0x209f   :  { %6261 = vadd.xlane.f32.xlu0 %v6260_v43 }
0x212a   :  { %v6259_v63 = vpop.xlane.xlu1 %6258 }
0x212b   :  { %v6263_v58 = vmul.f32 0.083333336, %v6259_v63 }
0x212c   :  { %v6262_v0 = vpop.xlane.xlu0 %6261 }
0x212d   :  { %v6265_v48 = vadd.f32 1e-05, %v6263_v58  ;;  %v6264_v29 = vmul.f32 0.083333336, %v6262_v0 }
0x212f   :  { %7811 = vrsqrt.f32 %v6265_v48  ;;  %v6266_v49 = vadd.f32 1e-05, %v6264_v29 }
0x2131   :  { %7813 = vrsqrt.f32 %v6266_v49 }
0x2139   :  { %v7812_v1 = vpop.eup %7811 }
0x213a   :  { %v6269_v50 = vmul.f32 %v7812_v1, %v6253_v45 }
0x213b   :  { %v7814_v51 = vpop.eup %7813 }
0x213c   :  { %v6278_v53 = vmul.f32 %v6754_v30, %v6269_v50  ;;  %v6270_v55 = vmul.f32 %v7814_v51, %v6254_v62 }
0x213e   :  { %v6279_v40 = vmul.f32 %v6754_v30, %v6270_v55  ;;  %v6287_v57 = vadd.f32 %v6755_v56, %v6278_v53 }
0x2140   :  { %v6288_v8 = vadd.f32 %v6755_v56, %v6279_v40 }
0x2142   :  { %v6291_v52 = vpack.c.bf16 %v6288_v8, %v6287_v57 }
0x2144   :  { %7408 = vmatmul.mubr.msk.bf16.vlgmr.msra.gmra.mrb[136].mxu1 %vm226_vm4, %v6291_v52 }
0x2217   :  { %v6344_v32 = vpop.f32.mrb[136].mxu1 }
0x2218   :  { %v6345_v13 = vadd.f32 %v6756_v3, %v6344_v32  ;;  %v7409_v9 = vpop.f32.mrb[137].mxu1 }
0x2219   :  { %v6347_v46 = vpop.f32.mrb[138].mxu1 }
0x221a   :  { %6351 = vst [vmem:[#allocation11] sm:$0xff] %v6345_v13  ;;  %v6348_v37 = vadd.f32 %v6756_v3, %v6347_v46  ;;  %v7410_v6 = vpop.f32.mrb[139].mxu1 }
0x221c   :  { %6352 = vst [vmem:[#allocation11 + $0x8] sm:$0xff] %v6348_v37 }
0x221d   :  { %7936 = shalt.err (!%p7933_p2)
}
0x221e   :  { %s7937_s1 = scalar_lea.hbm %s8637_s5, 256 }
0x221f   :  { %p7938_p3 = scmp.ne.s32.totalorder %s8637_s5, %s7937_s1  ;;  %p7941_p4 = scmp.lt.u32.totalorder %s7937_s1, %s8637_s5 }
0x2221   :  { %p7943_p5 = pnand %p7941_p4, %p7938_p3 }
0x2223   :  { %7946 = shalt.err (!%p7943_p5)
}
0x2224   :  { %6364 = dma.vmem_to_hbm [thread:$0]  %s6359_s11, 256, %s8637_s5, [#allocation4], %s7960_s3, %s7960_s3, %s7961_s21  }
0x2225   :  { %7953 = dma.done.wait [#allocation4], 256  }
0x2226   :  { %7954 = vsyncadd [#allocation4], 4294967040 }
0x2227   :  { %6368 = vsyncpa [#allocation3], 1 }
0x2228   :  { %6369 = vsyncpa [#allocation6], 1 }
0x2229   :  { %6370 = vsyncpa [#allocation9], 1 }
0x222a   :  { %6371 = vsyncpa [#allocation4], 1 }

</bundles_post_ra>
